<compile_context>
chip_gen: v6e
topology: v6e:2x2x1
jax: 0.10.0
libtpu: 0.0.40
codegen_flags: <defaults>
</compile_context>

<pallas_src>
import numpy as np
import jax
import jax.numpy as jnp
from jax import lax
from jax.experimental import pallas as pl
from jax.experimental.pallas import tpu as pltpu

FC1_NEURONS = 64
DROPOUT_RATE = 0.5          # unused in eval-mode forward
OUT_CLASSES = 60
OUT_PAD = 128               # lane-dense padded logits width (multiple of 128)
IN_FEATS = 28 * 28          # 784
IN_PAD = 896                # 784 -> 896  (7 * 128)
C1_FEATS, C1_PAD = 10 * 12 * 12, 1536   # 1440 -> 1536 (12 * 128)
C2_FEATS, C2_PAD = 20 * 4 * 4, 384      # 320  -> 384  (3 * 128)
NEG_INF = np.float32(-1e30)


def _round_up(n, m):
    return -(-n // m) * m


# --------------------------------------------------------------------------
# Fused kernel: whole forward pass for one batch tile
# --------------------------------------------------------------------------
def _fused_cnn_kernel(x_ref, wa_ref, ba_ref, wb_ref, bb_ref,
                      w1_ref, b1_ref, w2_ref, b2_ref, o_ref):
    # x_ref : (B_T, 896)  bf16   zero-padded flattened 28x28 images
    # wa_ref: (896, 1536) bf16   conv1+bias+bn1+avg_pool folded dense matrix
    # ba_ref: (1, 1536)   f32    folded per-channel bias (zeros in padding)
    # wb_ref: (1536, 384) bf16   conv2+bias+bn2+avg_pool folded dense matrix
    # bb_ref: (1, 384)    f32
    # w1_ref: (384, 128)  bf16   fc1 (zero-padded)     b1_ref: (1, 128) f32
    # w2_ref: (128, 128)  bf16   fc2 (zero-padded)     b2_ref: (1, 128) f32,
    #                            padded lanes carry -1e30 -> excluded from lse
    # o_ref : (B_T, 128)  f32    log-softmax, first 60 lanes valid
    x = x_ref[...]

    # conv1 -> bn1(eval) -> avg_pool(2) -> relu     (single bf16 MXU GEMM)
    h1 = jnp.dot(x, wa_ref[...], preferred_element_type=jnp.float32) + ba_ref[...]
    h1 = jnp.maximum(h1, 0.0).astype(jnp.bfloat16)

    # conv2 -> Dropout2d -> bn2(eval) -> avg_pool(2) -> relu
    # TODO(synk): nn.Dropout2d training-mode channel mask not implemented (eval identity).
    h2 = jnp.dot(h1, wb_ref[...], preferred_element_type=jnp.float32) + bb_ref[...]
    h2 = jnp.maximum(h2, 0.0).astype(jnp.bfloat16)   # == x.view(-1, 320), zero-padded

    # fc1 + relu
    h3 = jnp.dot(h2, w1_ref[...], preferred_element_type=jnp.float32) + b1_ref[...]
    h3 = jnp.maximum(h3, 0.0).astype(jnp.bfloat16)
    # TODO(synk): F.dropout(p=dropout_rate, training=True) not implemented (eval identity).

    # fc2 + log_softmax in f32 (padded lanes carry -1e30 bias -> exp() == 0)
    logits = jnp.dot(h3, w2_ref[...], preferred_element_type=jnp.float32) + b2_ref[...]
    m = jnp.max(logits, axis=-1, keepdims=True)
    z = logits - m
    lse = jnp.log(jnp.sum(jnp.exp(z), axis=-1, keepdims=True))
    o_ref[...] = z - lse


# --------------------------------------------------------------------------
# Host-side folding: conv + bias + BN(eval) + avg_pool(2) -> dense GEMM matrix
# --------------------------------------------------------------------------
def _pool_fold(w, scale):
    # w: (OC, IC, 5, 5) -> effective 6x6 stride-2 kernel of avg_pool2(bn(conv(.)))
    oc, ic = w.shape[:2]
    weff = np.zeros((oc, ic, 6, 6), np.float32)
    for di in (0, 1):
        for dj in (0, 1):
            weff[:, :, di:di + 5, dj:dj + 5] += w
    return (0.25 * weff * scale.reshape(oc, 1, 1, 1)).astype(np.float32)


def _conv_to_dense(weff, in_hw, out_hw):
    # Dense (Toeplitz) matrix of the 6x6 stride-2 conv; channel-major (C,H,W)
    # flattening on both sides (matches PyTorch .view ordering).
    oc, ic = weff.shape[:2]
    mat = np.zeros((ic * in_hw * in_hw, oc * out_hw * out_hw), np.float32)
    u = np.arange(6)
    for o in range(oc):
        for i in range(out_hw):
            for j in range(out_hw):
                col = o * out_hw * out_hw + i * out_hw + j
                rows = (2 * i + u)[:, None] * in_hw + (2 * j + u)[None, :]
                for c in range(ic):
                    mat[c * in_hw * in_hw + rows.ravel(), col] = weff[o, c].ravel()
    return mat


# --------------------------------------------------------------------------
# Parameter init (deterministic, synthetic) + host-side folding / padding
# --------------------------------------------------------------------------
def init_params(key, fc1_neurons=FC1_NEURONS):
    ks = jax.random.split(key, 16)
    w1 = jax.random.normal(ks[0], (10, 1, 5, 5), jnp.float32) * 0.2
    b1 = jax.random.normal(ks[1], (10,), jnp.float32) * 0.05
    w2 = jax.random.normal(ks[2], (20, 10, 5, 5), jnp.float32) * 0.1
    b2 = jax.random.normal(ks[3], (20,), jnp.float32) * 0.05

    g1 = 1.0 + 0.2 * jax.random.normal(ks[4], (10,), jnp.float32)
    be1 = 0.1 * jax.random.normal(ks[5], (10,), jnp.float32)
    m1 = 0.1 * jax.random.normal(ks[6], (10,), jnp.float32)
    v1 = 0.7 + 0.3 * jnp.abs(jax.random.normal(ks[7], (10,), jnp.float32))
    g2 = 1.0 + 0.2 * jax.random.normal(ks[8], (20,), jnp.float32)
    be2 = 0.1 * jax.random.normal(ks[9], (20,), jnp.float32)
    m2 = 0.1 * jax.random.normal(ks[10], (20,), jnp.float32)
    v2 = 0.7 + 0.3 * jnp.abs(jax.random.normal(ks[11], (20,), jnp.float32))

    eps = 1e-5
    scale1 = g1 / jnp.sqrt(v1 + eps)
    shift1 = be1 - m1 * scale1
    scale2 = g2 / jnp.sqrt(v2 + eps)
    shift2 = be2 - m2 * scale2

    fcw1 = jax.random.normal(ks[12], (320, fc1_neurons), jnp.float32) * 0.05
    fcb1 = jax.random.normal(ks[13], (fc1_neurons,), jnp.float32) * 0.05
    fcw2 = jax.random.normal(ks[14], (fc1_neurons, OUT_CLASSES), jnp.float32) * 0.05
    fcb2 = jax.random.normal(ks[15], (OUT_CLASSES,), jnp.float32) * 0.05

    w1_np, w2_np = np.asarray(w1), np.asarray(w2)
    s1, s2 = np.asarray(scale1), np.asarray(scale2)
    sh1, sh2 = np.asarray(shift1), np.asarray(shift2)
    b1_np, b2_np = np.asarray(b1), np.asarray(b2)

    f_pad = max(OUT_PAD, _round_up(fc1_neurons, 128))

    # Layer A: (B,1,28,28) -> (B, 10*12*12)   Layer B: 1440 -> (B, 20*4*4)=320
    wa = _conv_to_dense(_pool_fold(w1_np, s1), in_hw=28, out_hw=12)   # (784, 1440)
    wb = _conv_to_dense(_pool_fold(w2_np, s2), in_hw=12, out_hw=4)    # (1440, 320)

    # Zero-pad every GEMM dim to a multiple of 128 (exactness: pad weights = 0,
    # pad biases = 0, relu(0) = 0, fc2 pad bias = -1e30 kept in f32).
    wa_p = np.zeros((IN_PAD, C1_PAD), np.float32)
    wa_p[:IN_FEATS, :C1_FEATS] = wa
    ba_p = np.zeros((1, C1_PAD), np.float32)
    ba_p[0, :C1_FEATS] = np.repeat(s1 * b1_np + sh1, 12 * 12)

    wb_p = np.zeros((C1_PAD, C2_PAD), np.float32)
    wb_p[:C1_FEATS, :C2_FEATS] = wb
    bb_p = np.zeros((1, C2_PAD), np.float32)
    bb_p[0, :C2_FEATS] = np.repeat(s2 * b2_np + sh2, 4 * 4)

    w1_p = np.zeros((C2_PAD, f_pad), np.float32)
    w1_p[:320, :fc1_neurons] = np.asarray(fcw1)
    b1_p = np.zeros((1, f_pad), np.float32)
    b1_p[0, :fc1_neurons] = np.asarray(fcb1)

    w2_p = np.zeros((f_pad, OUT_PAD), np.float32)
    w2_p[:fc1_neurons, :OUT_CLASSES] = np.asarray(fcw2)
    b2_p = np.full((1, OUT_PAD), NEG_INF, np.float32)
    b2_p[0, :OUT_CLASSES] = np.asarray(fcb2)

    return {
        # kernel operands: matmul weights in bf16, biases/softmax inputs in f32
        "wa": jnp.asarray(wa_p, dtype=jnp.bfloat16),
        "ba": jnp.asarray(ba_p),
        "wb": jnp.asarray(wb_p, dtype=jnp.bfloat16),
        "bb": jnp.asarray(bb_p),
        "fcw1": jnp.asarray(w1_p, dtype=jnp.bfloat16),
        "fcb1": jnp.asarray(b1_p),
        "fcw2": jnp.asarray(w2_p, dtype=jnp.bfloat16),
        "fcb2": jnp.asarray(b2_p),
        # raw parameters (pure-JAX f32 reference only)
        "raw_w1": w1, "raw_b1": b1, "raw_scale1": scale1, "raw_shift1": shift1,
        "raw_w2": w2, "raw_b2": b2, "raw_scale2": scale2, "raw_shift2": shift2,
        "raw_fcw1": fcw1, "raw_fcb1": fcb1, "raw_fcw2": fcw2, "raw_fcb2": fcb2,
    }


# --------------------------------------------------------------------------
# Forward pass (single fused Pallas kernel)
# --------------------------------------------------------------------------
def cnn_forward(params, x, *, batch_tile=256):
    # x: (B, 1, 28, 28) float32 (PyTorch NCHW)
    B = x.shape[0]
    k1, n1 = params["wa"].shape
    n2 = params["wb"].shape[1]
    f_pad = params["fcw1"].shape[1]

    x_flat = x.reshape(B, IN_FEATS).astype(jnp.float32)

    bt = batch_tile if B >= batch_tile else _round_up(B, 8)
    b_pad = _round_up(B, bt)
    x_flat = jnp.pad(x_flat, ((0, b_pad - B), (0, k1 - IN_FEATS)))
    x_flat = x_flat.astype(jnp.bfloat16)

    # Advisory cost estimate so XLA schedules neighbours around the custom call.
    gemm_macs = k1 * n1 + n1 * n2 + n2 * f_pad + f_pad * OUT_PAD
    weight_bytes = 2 * gemm_macs + 4 * (n1 + n2 + f_pad + OUT_PAD)
    cost = pl.CostEstimate(
        flops=2 * b_pad * gemm_macs,
        transcendentals=b_pad * (OUT_PAD + 1),
        bytes_accessed=b_pad * k1 * 2 + weight_bytes + b_pad * OUT_PAD * 4)

    out_pad = pl.pallas_call(
        _fused_cnn_kernel,
        out_shape=jax.ShapeDtypeStruct((b_pad, OUT_PAD), jnp.float32),
        grid=(b_pad // bt,),
        in_specs=[
            pl.BlockSpec((bt, k1), lambda i: (i, 0)),        # x tile (bf16)
            pl.BlockSpec((k1, n1), lambda i: (0, 0)),        # wa (resident)
            pl.BlockSpec((1, n1), lambda i: (0, 0)),         # ba
            pl.BlockSpec((n1, n2), lambda i: (0, 0)),        # wb
            pl.BlockSpec((1, n2), lambda i: (0, 0)),         # bb
            pl.BlockSpec((n2, f_pad), lambda i: (0, 0)),     # fc1 w
            pl.BlockSpec((1, f_pad), lambda i: (0, 0)),      # fc1 b
            pl.BlockSpec((f_pad, OUT_PAD), lambda i: (0, 0)),  # fc2 w (padded)
            pl.BlockSpec((1, OUT_PAD), lambda i: (0, 0)),    # fc2 b (padded)
        ],
        out_specs=pl.BlockSpec((bt, OUT_PAD), lambda i: (i, 0)),
        compiler_params=pltpu.CompilerParams(
            dimension_semantics=("parallel",),          # batch tiles -> v7x 2 TCs
            vmem_limit_bytes=32 * 1024 * 1024),         # fits v5e/v6e/v7x budgets
        cost_estimate=cost,
    )(x_flat, params["wa"], params["ba"], params["wb"], params["bb"],
      params["fcw1"], params["fcb1"], params["fcw2"], params["fcb2"])

    return out_pad[:B, :OUT_CLASSES]


# --------------------------------------------------------------------------
# Pure-JAX f32 reference (verification only)
# --------------------------------------------------------------------------
def _avg_pool_nchw(y):
    b, c, h, w = y.shape
    return y.reshape(b, c, h // 2, 2, w // 2, 2).mean(axis=(3, 5))


def cnn_reference(params, x):
    y = lax.conv_general_dilated(x, params["raw_w1"], (1, 1), "VALID",
                                 dimension_numbers=("NCHW", "OIHW", "NCHW"))
    y = y + params["raw_b1"].reshape(1, 10, 1, 1)
    y = y * params["raw_scale1"].reshape(1, 10, 1, 1) + params["raw_shift1"].reshape(1, 10, 1, 1)
    y = jnp.maximum(_avg_pool_nchw(y), 0.0)

    y = lax.conv_general_dilated(y, params["raw_w2"], (1, 1), "VALID",
                                 dimension_numbers=("NCHW", "OIHW", "NCHW"))
    y = y + params["raw_b2"].reshape(1, 20, 1, 1)
    y = y * params["raw_scale2"].reshape(1, 20, 1, 1) + params["raw_shift2"].reshape(1, 20, 1, 1)
    y = jnp.maximum(_avg_pool_nchw(y), 0.0)

    feat = y.reshape(y.shape[0], 320)
    h = jnp.maximum(feat @ params["raw_fcw1"] + params["raw_fcb1"].reshape(1, -1), 0.0)
    logits = h @ params["raw_fcw2"] + params["raw_fcb2"].reshape(1, OUT_CLASSES)
    return jax.nn.log_softmax(logits, axis=1)


if __name__ == "__main__":
    key = jax.random.PRNGKey(0)
    pkey, xkey = jax.random.split(key)
    params = init_params(pkey, fc1_neurons=FC1_NEURONS)
    x = jax.random.normal(xkey, (2, 1, 28, 28), jnp.float32)

    out = jax.block_until_ready(jax.jit(cnn_forward)(params, x))
    ref = jax.block_until_ready(cnn_reference(params, x))

    assert out.shape == (2, OUT_CLASSES), out.shape
    assert bool(jnp.all(jnp.isfinite(out)))
    # bf16 matmul operands (f32 accumulation) -> expected max abs error ~1e-2.
    max_err = float(jnp.max(jnp.abs(out - ref)))
    assert max_err < 5e-2, f"mismatch vs reference: {max_err}"
    print("KERNEL_OK")
</pallas_src>

<mosaic_0001>
module attributes {stable_mosaic.version = 11 : i64} {
  func.func @_fused_cnn_kernel(%arg0: i32, %arg1: memref<8x896xbf16, #tpu.memory_space<vmem>>, %arg2: memref<896x1536xbf16, #tpu.memory_space<vmem>>, %arg3: memref<1x1536xf32, #tpu.memory_space<vmem>>, %arg4: memref<1536x384xbf16, #tpu.memory_space<vmem>>, %arg5: memref<1x384xf32, #tpu.memory_space<vmem>>, %arg6: memref<384x128xbf16, #tpu.memory_space<vmem>>, %arg7: memref<1x128xf32, #tpu.memory_space<vmem>>, %arg8: memref<128x128xbf16, #tpu.memory_space<vmem>>, %arg9: memref<1x128xf32, #tpu.memory_space<vmem>>, %arg10: memref<8x128xf32, #tpu.memory_space<vmem>>) attributes {dimension_semantics = [#tpu.dimension_semantics<parallel>], iteration_bounds = array<i64: 1>, scalar_prefetch = 0 : i64, scratch_operands = 0 : i64, tpu.core_type = #tpu.core_type<tc>, window_params = [{transform_indices = @transform_0, window_bounds = array<i64: 8, 896>}, {pipeline_mode = #tpu.pipeline_mode<synchronous>, transform_indices = @transform_1, window_bounds = array<i64: 896, 1536>}, {pipeline_mode = #tpu.pipeline_mode<synchronous>, transform_indices = @transform_2, window_bounds = array<i64: 1, 1536>}, {pipeline_mode = #tpu.pipeline_mode<synchronous>, transform_indices = @transform_3, window_bounds = array<i64: 1536, 384>}, {pipeline_mode = #tpu.pipeline_mode<synchronous>, transform_indices = @transform_4, window_bounds = array<i64: 1, 384>}, {pipeline_mode = #tpu.pipeline_mode<synchronous>, transform_indices = @transform_5, window_bounds = array<i64: 384, 128>}, {pipeline_mode = #tpu.pipeline_mode<synchronous>, transform_indices = @transform_6, window_bounds = array<i64: 1, 128>}, {pipeline_mode = #tpu.pipeline_mode<synchronous>, transform_indices = @transform_7, window_bounds = array<i64: 128, 128>}, {pipeline_mode = #tpu.pipeline_mode<synchronous>, transform_indices = @transform_8, window_bounds = array<i64: 1, 128>}, {transform_indices = @transform_9, window_bounds = array<i64: 8, 128>}]} {
    %c0 = arith.constant 0 : index
    %c0_0 = arith.constant 0 : index
    %0 = vector.load %arg1[%c0, %c0_0] : memref<8x896xbf16, #tpu.memory_space<vmem>>, vector<8x896xbf16>
    %c0_1 = arith.constant 0 : index
    %c0_2 = arith.constant 0 : index
    %1 = vector.load %arg2[%c0_1, %c0_2] : memref<896x1536xbf16, #tpu.memory_space<vmem>>, vector<896x1536xbf16>
    %cst = arith.constant dense<0.000000e+00> : vector<8x1536xf32>
    %2 = tpu.matmul %0, %1, %cst {dimension_numbers = #tpu.dot_dimension_numbers<[1], [0], [0], [1], [0, 0, 1, 1], [], []>} : vector<8x896xbf16>, vector<896x1536xbf16>, vector<8x1536xf32> -> vector<8x1536xf32>
    %c0_3 = arith.constant 0 : index
    %c0_4 = arith.constant 0 : index
    %3 = vector.load %arg3[%c0_3, %c0_4] : memref<1x1536xf32, #tpu.memory_space<vmem>>, vector<1x1536xf32>
    %4 = vector.broadcast %3 : vector<1x1536xf32> to vector<8x1536xf32>
    %5 = arith.addf %2, %4 : vector<8x1536xf32>
    %cst_5 = arith.constant 0.000000e+00 : f32
    %6 = vector.broadcast %cst_5 : f32 to vector<8x1536xf32>
    %7 = arith.maximumf %5, %6 : vector<8x1536xf32>
    %8 = arith.truncf %7 : vector<8x1536xf32> to vector<8x1536xbf16>
    %c0_6 = arith.constant 0 : index
    %c0_7 = arith.constant 0 : index
    %9 = vector.load %arg4[%c0_6, %c0_7] : memref<1536x384xbf16, #tpu.memory_space<vmem>>, vector<1536x384xbf16>
    %cst_8 = arith.constant dense<0.000000e+00> : vector<8x384xf32>
    %10 = tpu.matmul %8, %9, %cst_8 {dimension_numbers = #tpu.dot_dimension_numbers<[1], [0], [0], [1], [0, 0, 1, 1], [], []>} : vector<8x1536xbf16>, vector<1536x384xbf16>, vector<8x384xf32> -> vector<8x384xf32>
    %c0_9 = arith.constant 0 : index
    %c0_10 = arith.constant 0 : index
    %11 = vector.load %arg5[%c0_9, %c0_10] : memref<1x384xf32, #tpu.memory_space<vmem>>, vector<1x384xf32>
    %12 = vector.broadcast %11 : vector<1x384xf32> to vector<8x384xf32>
    %13 = arith.addf %10, %12 : vector<8x384xf32>
    %cst_11 = arith.constant 0.000000e+00 : f32
    %14 = vector.broadcast %cst_11 : f32 to vector<8x384xf32>
    %15 = arith.maximumf %13, %14 : vector<8x384xf32>
    %16 = arith.truncf %15 : vector<8x384xf32> to vector<8x384xbf16>
    %c0_12 = arith.constant 0 : index
    %c0_13 = arith.constant 0 : index
    %17 = vector.load %arg6[%c0_12, %c0_13] : memref<384x128xbf16, #tpu.memory_space<vmem>>, vector<384x128xbf16>
    %cst_14 = arith.constant dense<0.000000e+00> : vector<8x128xf32>
    %18 = tpu.matmul %16, %17, %cst_14 {dimension_numbers = #tpu.dot_dimension_numbers<[1], [0], [0], [1], [0, 0, 1, 1], [], []>} : vector<8x384xbf16>, vector<384x128xbf16>, vector<8x128xf32> -> vector<8x128xf32>
    %c0_15 = arith.constant 0 : index
    %c0_16 = arith.constant 0 : index
    %19 = vector.load %arg7[%c0_15, %c0_16] : memref<1x128xf32, #tpu.memory_space<vmem>>, vector<1x128xf32>
    %20 = vector.broadcast %19 : vector<1x128xf32> to vector<8x128xf32>
    %21 = arith.addf %18, %20 : vector<8x128xf32>
    %cst_17 = arith.constant 0.000000e+00 : f32
    %22 = vector.broadcast %cst_17 : f32 to vector<8x128xf32>
    %23 = arith.maximumf %21, %22 : vector<8x128xf32>
    %24 = arith.truncf %23 : vector<8x128xf32> to vector<8x128xbf16>
    %c0_18 = arith.constant 0 : index
    %c0_19 = arith.constant 0 : index
    %25 = vector.load %arg8[%c0_18, %c0_19] : memref<128x128xbf16, #tpu.memory_space<vmem>>, vector<128x128xbf16>
    %cst_20 = arith.constant dense<0.000000e+00> : vector<8x128xf32>
    %26 = tpu.matmul %24, %25, %cst_20 {dimension_numbers = #tpu.dot_dimension_numbers<[1], [0], [0], [1], [0, 0, 1, 1], [], []>} : vector<8x128xbf16>, vector<128x128xbf16>, vector<8x128xf32> -> vector<8x128xf32>
    %c0_21 = arith.constant 0 : index
    %c0_22 = arith.constant 0 : index
    %27 = vector.load %arg9[%c0_21, %c0_22] : memref<1x128xf32, #tpu.memory_space<vmem>>, vector<1x128xf32>
    %28 = vector.broadcast %27 : vector<1x128xf32> to vector<8x128xf32>
    %29 = arith.addf %26, %28 : vector<8x128xf32>
    %cst_23 = arith.constant dense<0xFF800000> : vector<8xf32>
    %30 = vector.multi_reduction <maximumf>, %29, %cst_23 [1] : vector<8x128xf32> to vector<8xf32>
    %31 = vector.shape_cast %30 : vector<8xf32> to vector<8x1xf32>
    %32 = vector.broadcast %31 : vector<8x1xf32> to vector<8x128xf32>
    %33 = arith.subf %29, %32 : vector<8x128xf32>
    %34 = math.exp %33 : vector<8x128xf32>
    %cst_24 = arith.constant dense<0.000000e+00> : vector<8xf32>
    %35 = vector.multi_reduction <add>, %34, %cst_24 [1] : vector<8x128xf32> to vector<8xf32>
    %36 = vector.shape_cast %35 : vector<8xf32> to vector<8x1xf32>
    %37 = math.log %36 : vector<8x1xf32>
    %38 = vector.broadcast %37 : vector<8x1xf32> to vector<8x128xf32>
    %39 = arith.subf %33, %38 : vector<8x128xf32>
    %c0_25 = arith.constant 0 : index
    %c0_26 = arith.constant 0 : index
    %40 = vector.load %arg10[%c0_25, %c0_26] : memref<8x128xf32, #tpu.memory_space<vmem>>, vector<8x128xf32>
    tpu.vector_store %arg10[%c0_25, %c0_26], %39 {strides = array<i32>} : memref<8x128xf32, #tpu.memory_space<vmem>>, vector<8x128xf32>,
    return
  }
  func.func @transform_0(%arg0: i32) -> (i32, i32) {
    %c0_i32 = arith.constant 0 : i32
    %c0_i32_0 = arith.constant 0 : i32
    return %arg0, %c0_i32 : i32, i32
  }
  func.func @transform_1(%arg0: i32) -> (i32, i32) {
    %c0_i32 = arith.constant 0 : i32
    %c0_i32_0 = arith.constant 0 : i32
    %c0_i32_1 = arith.constant 0 : i32
    return %c0_i32, %c0_i32_0 : i32, i32
  }
  func.func @transform_2(%arg0: i32) -> (i32, i32) {
    %c0_i32 = arith.constant 0 : i32
    %c0_i32_0 = arith.constant 0 : i32
    %c0_i32_1 = arith.constant 0 : i32
    return %c0_i32, %c0_i32_0 : i32, i32
  }
  func.func @transform_3(%arg0: i32) -> (i32, i32) {
    %c0_i32 = arith.constant 0 : i32
    %c0_i32_0 = arith.constant 0 : i32
    %c0_i32_1 = arith.constant 0 : i32
    return %c0_i32, %c0_i32_0 : i32, i32
  }
  func.func @transform_4(%arg0: i32) -> (i32, i32) {
    %c0_i32 = arith.constant 0 : i32
    %c0_i32_0 = arith.constant 0 : i32
    %c0_i32_1 = arith.constant 0 : i32
    return %c0_i32, %c0_i32_0 : i32, i32
  }
  func.func @transform_5(%arg0: i32) -> (i32, i32) {
    %c0_i32 = arith.constant 0 : i32
    %c0_i32_0 = arith.constant 0 : i32
    %c0_i32_1 = arith.constant 0 : i32
    return %c0_i32, %c0_i32_0 : i32, i32
  }
  func.func @transform_6(%arg0: i32) -> (i32, i32) {
    %c0_i32 = arith.constant 0 : i32
    %c0_i32_0 = arith.constant 0 : i32
    %c0_i32_1 = arith.constant 0 : i32
    return %c0_i32, %c0_i32_0 : i32, i32
  }
  func.func @transform_7(%arg0: i32) -> (i32, i32) {
    %c0_i32 = arith.constant 0 : i32
    %c0_i32_0 = arith.constant 0 : i32
    %c0_i32_1 = arith.constant 0 : i32
    return %c0_i32, %c0_i32_0 : i32, i32
  }
  func.func @transform_8(%arg0: i32) -> (i32, i32) {
    %c0_i32 = arith.constant 0 : i32
    %c0_i32_0 = arith.constant 0 : i32
    %c0_i32_1 = arith.constant 0 : i32
    return %c0_i32, %c0_i32_0 : i32, i32
  }
  func.func @transform_9(%arg0: i32) -> (i32, i32) {
    %c0_i32 = arith.constant 0 : i32
    %c0_i32_0 = arith.constant 0 : i32
    return %arg0, %c0_i32 : i32, i32
  }
}

</mosaic_0001>

<bundles_post_ra>
// kernel: cnn_forward.1
= control target key start
LH: loop header
LB: loop body
LE: loop exit
PB: predicated region body
PF: predicated region fallthrough
CT: control target
= control target key end

     0   :  { %14 = vsyncpa [#allocation3], 0  ;;  %s11350_s0 = inlined_call_operand.vmem [shape: bf16[8,896], index: 0, kind: input, shape index: {}]   ;;  %s11351_s1 = inlined_call_operand.hbm [shape: bf16[896,1536], index: 1, kind: input, shape index: {}]   ;;  %s11352_s2 = inlined_call_operand.hbm [shape: f32[1,1536], index: 2, kind: input, shape index: {}]   ;;  %s11353_s3 = inlined_call_operand.hbm [shape: bf16[1536,384], index: 3, kind: input, shape index: {}]   ;;  %s11354_s4 = inlined_call_operand.hbm [shape: f32[1,384], index: 4, kind: input, shape index: {}]   ;;  %s11355_s5 = inlined_call_operand.hbm [shape: bf16[384,128], index: 5, kind: input, shape index: {}]   ;;  %s11356_s6 = inlined_call_operand.hbm [shape: f32[1,128], index: 6, kind: input, shape index: {}]   ;;  %s11357_s7 = inlined_call_operand.hbm [shape: bf16[128,128], index: 7, kind: input, shape index: {}]   ;;  %s11358_s8 = inlined_call_operand.hbm [shape: f32[1,128], index: 8, kind: input, shape index: {}]   ;;  %s11359_s9 = inlined_call_operand.vmem [shape: f32[8,128], index: 9, kind: output, shape index: {}]  }
   0x1   :  { %15 = vsyncpa [#allocation5], 0 }
   0x2   :  { %16 = vsyncpa [#allocation8], 0 }
   0x3   :  { %17 = vsyncpa [#allocation11], 0 }
   0x4   :  { %18 = vsyncpa [#allocation14], 0  ;;  %s10948_s30 = smov [#allocation4]   ;;  %s10949_s11 = smov [#allocation7]  }
   0x5   :  { %s39_s10 = sshll.u32 %s10948_s30, 4  ;;  %s61_s12 = sshll.u32 %s10949_s11, 4  ;;  %s40_s10 = int_to_ptr.vmem [resolvable:$true] %s39_s10  ;;  %s62_s12 = int_to_ptr.vmem [resolvable:$true] %s61_s12 }
   0x6   :  { %s10786_s13 = scalar_lea.vmem %s40_s10, 192  ;;  %p10791_p1 = scmp.lt.s32.totalorder %s40_s10, %s40_s10 }
   0x7   :  { %p10787_p0 = scmp.ne.s32.totalorder %s40_s10, %s10786_s13  ;;  %p10792_p2 = scmp.lt.s32.totalorder %s10786_s13, %s10786_s13 }
   0x9   :  { %p10793_p3 = por %p10792_p2, %p10791_p1 }
   0xb   :  { %p10794_p4 = pnand %p10793_p3, %p10787_p0 }
   0xd   :  { %10797 = shalt.err (!%p10794_p4)
}
   0xe   :  { %42 = dma.hbm_to_vmem [thread:$0]  %s11352_s2, 192, %s40_s10, [#allocation5]  }
   0xf   :  { %s10806_s16 = scalar_lea.vmem %s62_s12, 48  ;;  %s10810_s17 = scalar_lea.vmem %s62_s12, 64 }
  0x10   :  { %p10807_p5 = scmp.ne.s32.totalorder %s62_s12, %s10806_s16  ;;  %p10811_p6 = scmp.lt.s32.totalorder %s62_s12, %s62_s12 }
  0x11   :  { %p10812_p7 = scmp.lt.s32.totalorder %s10810_s17, %s10806_s16 }
  0x13   :  { %p10813_p8 = por %p10812_p7, %p10811_p6 }
  0x15   :  { %p10814_p9 = pnand %p10813_p8, %p10807_p5 }
  0x17   :  { %10817 = shalt.err (!%p10814_p9)
}
  0x18   :  { %64 = dma.hbm_to_vmem [thread:$0]  %s11354_s4, 48, %s62_s12, [#allocation8]  }
  0x19   :  { %s10950_s20 = smov [#allocation10]   ;;  %s10951_s22 = smov [#allocation2]  }
  0x1a   :  { %s83_s21 = sshll.u32 %s10950_s20, 4  ;;  %s26_s23 = sshll.u32 %s10951_s22, 4  ;;  %s84_s21 = int_to_ptr.vmem [resolvable:$true] %s83_s21  ;;  %s27_s23 = int_to_ptr.vmem [resolvable:$true] %s26_s23 }
  0x1b   :  { %s10826_s24 = scalar_lea.vmem %s84_s21, 16  ;;  %s10830_s2 = scalar_lea.vmem %s84_s21, 32 }
  0x1c   :  { %p10827_p10 = scmp.ne.s32.totalorder %s84_s21, %s10826_s24  ;;  %p10831_p11 = scmp.lt.s32.totalorder %s84_s21, %s84_s21 }
  0x1d   :  { %p10832_p12 = scmp.lt.s32.totalorder %s10830_s2, %s10826_s24 }
  0x1f   :  { %p10833_p13 = por %p10832_p12, %p10831_p11 }
  0x21   :  { %p10834_p0 = pnand %p10833_p13, %p10827_p10 }
  0x23   :  { %10837 = shalt.err (!%p10834_p0)
}
  0x24   :  { %86 = dma.hbm_to_vmem [thread:$0]  %s11356_s6, 16, %s84_s21, [#allocation11]  }
  0x25   :  { %s10846_s27 = scalar_lea.vmem %s27_s23, 86016  ;;  %p10851_p2 = scmp.lt.s32.totalorder %s27_s23, %s27_s23 }
  0x26   :  { %p10847_p1 = scmp.ne.s32.totalorder %s27_s23, %s10846_s27  ;;  %p10852_p3 = scmp.lt.s32.totalorder %s10846_s27, %s10846_s27 }
  0x28   :  { %p10853_p4 = por %p10852_p3, %p10851_p2 }
  0x2a   :  { %p10854_p5 = pnand %p10853_p4, %p10847_p1 }
  0x2c   :  { %10857 = shalt.err (!%p10854_p5)
}
  0x2d   :  { %s10952_s4 = smov 768   ;;  %s10953_s28 = smov 48  }
  0x2e   :  { %32 = dma.hbm_to_vmem [thread:$0]  %s11351_s1, 86016, %s27_s23, [#allocation3], %s10952_s4, %s10952_s4, %s10953_s28  }
  0x2f   :  { %s10954_s10 = smov [#allocation6]  }
  0x30   :  { %s48_s11 = sshll.u32 %s10954_s10, 4  ;;  %s49_s11 = int_to_ptr.vmem [resolvable:$true] %s48_s11 }
  0x31   :  { %s10866_s12 = scalar_lea.vmem %s49_s11, 36864  ;;  %p10871_p7 = scmp.lt.s32.totalorder %s49_s11, %s49_s11 }
  0x32   :  { %p10867_p6 = scmp.ne.s32.totalorder %s49_s11, %s10866_s12  ;;  %p10872_p8 = scmp.lt.s32.totalorder %s10866_s12, %s10866_s12 }
  0x34   :  { %p10873_p9 = por %p10872_p8, %p10871_p7 }
  0x36   :  { %p10874_p10 = pnand %p10873_p9, %p10867_p6 }
  0x38   :  { %10877 = shalt.err (!%p10874_p10)
}
  0x39   :  { %s10955_s6 = smov 192   ;;  %s10956_s13 = smov 12  }
  0x3a   :  { %54 = dma.hbm_to_vmem [thread:$0]  %s11353_s3, 36864, %s49_s11, [#allocation5], %s10955_s6, %s10955_s6, %s10956_s13  }
  0x3b   :  { %s10957_s16 = smov [#allocation9]  }
  0x3c   :  { %s70_s17 = sshll.u32 %s10957_s16, 4  ;;  %s71_s17 = int_to_ptr.vmem [resolvable:$true] %s70_s17 }
  0x3d   :  { %s10886_s1 = scalar_lea.vmem %s71_s17, 3072  ;;  %p10891_p12 = scmp.lt.s32.totalorder %s71_s17, %s71_s17 }
  0x3e   :  { %p10887_p11 = scmp.ne.s32.totalorder %s71_s17, %s10886_s1  ;;  %p10892_p13 = scmp.lt.s32.totalorder %s10886_s1, %s10886_s1 }
  0x40   :  { %p10893_p0 = por %p10892_p13, %p10891_p12 }
  0x42   :  { %p10894_p1 = pnand %p10893_p0, %p10887_p11 }
  0x44   :  { %10897 = shalt.err (!%p10894_p1)
}
  0x45   :  { %s10958_s18 = smov 64   ;;  %s10959_s19 = smov 4  }
  0x46   :  { %76 = dma.hbm_to_vmem [thread:$0]  %s11355_s5, 3072, %s71_s17, [#allocation8], %s10958_s18, %s10958_s18, %s10959_s19  }
  0x47   :  { %s10960_s22 = smov [#allocation12]   ;;  %s10961_s24 = smov [#allocation13]  }
  0x48   :  { %s92_s23 = sshll.u32 %s10960_s22, 4  ;;  %s105_s3 = sshll.u32 %s10961_s24, 4  ;;  %s93_s23 = int_to_ptr.vmem [resolvable:$true] %s92_s23  ;;  %s106_s3 = int_to_ptr.vmem [resolvable:$true] %s105_s3 }
  0x49   :  { %s10906_s2 = scalar_lea.vmem %s93_s23, 1024  ;;  %p10911_p3 = scmp.lt.s32.totalorder %s93_s23, %s93_s23 }
  0x4a   :  { %p10907_p2 = scmp.ne.s32.totalorder %s93_s23, %s10906_s2  ;;  %p10912_p4 = scmp.lt.s32.totalorder %s10906_s2, %s10906_s2 }
  0x4c   :  { %p10913_p5 = por %p10912_p4, %p10911_p3 }
  0x4e   :  { %p10914_p6 = pnand %p10913_p5, %p10907_p2 }
  0x50   :  { %10917 = shalt.err (!%p10914_p6)
}
  0x51   :  { %98 = dma.hbm_to_vmem [thread:$0]  %s11357_s7, 1024, %s93_s23, [#allocation11], %s10958_s18, %s10958_s18, %s10959_s19  }
  0x52   :  { %s10926_s27 = scalar_lea.vmem %s106_s3, 16  ;;  %s10930_s5 = scalar_lea.vmem %s106_s3, 32 }
  0x53   :  { %p10927_p7 = scmp.ne.s32.totalorder %s106_s3, %s10926_s27  ;;  %p10931_p8 = scmp.lt.s32.totalorder %s106_s3, %s106_s3 }
  0x54   :  { %p10932_p9 = scmp.lt.s32.totalorder %s10930_s5, %s10926_s27 }
  0x56   :  { %p10933_p10 = por %p10932_p9, %p10931_p8 }
  0x58   :  { %p10934_p11 = pnand %p10933_p10, %p10927_p7 }
  0x5a   :  { %10937 = shalt.err (!%p10934_p11)
}
  0x5b   :  { %108 = dma.hbm_to_vmem [thread:$0]  %s11358_s8, 16, %s106_s3, [#allocation14]  }
  0x5c   :  { %10938 = dma.done.wait [#allocation3], 86016  }
  0x5d   :  { %10939 = vsyncadd [#allocation3], 4294881280 }
  0x5e   :  { %10940 = dma.done.wait [#allocation5], 37056  }
  0x5f   :  { %10941 = vsyncadd [#allocation5], 4294930240 }
  0x60   :  { %10942 = dma.done.wait [#allocation8], 3120  }
  0x61   :  { %10943 = vsyncadd [#allocation8], 4294964176 }
  0x62   :  { %10944 = dma.done.wait [#allocation11], 1040  }
  0x63   :  { %10945 = vsyncadd [#allocation11], 4294966256 }
  0x64   :  { %10946 = dma.done.wait [#allocation14], 16  }
  0x65   :  { %10947 = vsyncadd [#allocation14], 4294967280  ;;  %v9338_v0 = vld [vmem:[#allocation2 + $0x2a4] ss:$48 sps:$4 sm:$0xff]   ;;  %v9342_v2 = vld [vmem:[#allocation2 + $0x2a0] ss:$48 sps:$4 sm:$0xff]  }
  0x66   :  { %v9340_v1 = vld [vmem:[#allocation2 + $0x8a4] ss:$48 sps:$4 sm:$0xff]   ;;  %4259 = vmatprep.subr.bf16.mxu0 %v9338_v0  ;;  %v9343_v3 = vld [vmem:[#allocation2 + $0x8a0] ss:$48 sps:$4 sm:$0xff]   ;;  %v135_v48 = vld [vmem:[%s11350_s0 + $0x8] sm:$0xff]  ;;  %vm10964_vm0 = vmmov 0  }
  0x67   :  { %4300 = vmatprep.subr.bf16.mxu1 %v9340_v1  ;;  %v9344_v4 = vld [vmem:[#allocation2 + $0x244] ss:$48 sps:$4 sm:$0xff]   ;;  %4260 = vmatpush1.bf16.msra.mxu0 %v9342_v2  ;;  %v9348_v6 = vld [vmem:[#allocation2 + $0x240] ss:$48 sps:$4 sm:$0xff]   ;;  %v11047_v51 = vcombine.high %v135_v48, %v135_v48 }
  0x68   :  { %4301 = vmatpush1.bf16.msra.mxu1 %v9343_v3  ;;  %v9346_v5 = vld [vmem:[#allocation2 + $0x844] ss:$48 sps:$4 sm:$0xff]   ;;  %4261 = vmatprep.subr.bf16.mxu0 %v9344_v4  ;;  %v9349_v7 = vld [vmem:[#allocation2 + $0x840] ss:$48 sps:$4 sm:$0xff]  }
  0x69   :  { %4302 = vmatprep.subr.bf16.mxu1 %v9346_v5  ;;  %v9350_v8 = vld [vmem:[#allocation2 + $0x1e4] ss:$48 sps:$4 sm:$0xff]   ;;  %v9354_v10 = vld [vmem:[#allocation2 + $0x1e0] ss:$48 sps:$4 sm:$0xff]   ;;  %4332 = vmatprep.mubr.bf16.mxu1 %v11047_v51 }
  0x6a   :  { %v9352_v9 = vld [vmem:[#allocation2 + $0x7e4] ss:$48 sps:$4 sm:$0xff]   ;;  %v9355_v11 = vld [vmem:[#allocation2 + $0x7e0] ss:$48 sps:$4 sm:$0xff]  }
  0x6b   :  { %4262 = vmatpush1.bf16.msra.mxu0 %v9348_v6  ;;  %v9356_v12 = vld [vmem:[#allocation2 + $0x184] ss:$48 sps:$4 sm:$0xff]   ;;  %v9360_v14 = vld [vmem:[#allocation2 + $0x180] ss:$48 sps:$4 sm:$0xff]  }
  0x6c   :  { %4303 = vmatpush1.bf16.msra.mxu1 %v9349_v7  ;;  %4263 = vmatprep.subr.bf16.mxu0 %v9350_v8  ;;  %v9358_v13 = vld [vmem:[#allocation2 + $0x784] ss:$48 sps:$4 sm:$0xff]   ;;  %v9361_v15 = vld [vmem:[#allocation2 + $0x780] ss:$48 sps:$4 sm:$0xff]   ;;  %v11053_v7 = vcombine.low %v135_v48, %v135_v48  ;;  %v9498_v48 = vld [vmem:[#allocation2 + $0x24c] ss:$48 sps:$4 sm:$0xff]  }
  0x6d   :  { %4304 = vmatprep.subr.bf16.mxu1 %v9352_v9  ;;  %v9362_v16 = vld [vmem:[#allocation2 + $0x124] ss:$48 sps:$4 sm:$0xff]   ;;  %v9366_v18 = vld [vmem:[#allocation2 + $0x120] ss:$48 sps:$4 sm:$0xff]  }
  0x6e   :  { %v9364_v17 = vld [vmem:[#allocation2 + $0x724] ss:$48 sps:$4 sm:$0xff]   ;;  %v9367_v19 = vld [vmem:[#allocation2 + $0x720] ss:$48 sps:$4 sm:$0xff]  }
  0x6f   :  { %4264 = vmatpush1.bf16.msra.mxu0 %v9354_v10  ;;  %v9368_v20 = vld [vmem:[#allocation2 + $0xc4] ss:$48 sps:$4 sm:$0xff]   ;;  %v9372_v22 = vld [vmem:[#allocation2 + $0xc0] ss:$48 sps:$4 sm:$0xff]  }
  0x70   :  { %4305 = vmatpush1.bf16.msra.mxu1 %v9355_v11  ;;  %4265 = vmatprep.subr.bf16.mxu0 %v9356_v12  ;;  %v9370_v21 = vld [vmem:[#allocation2 + $0x6c4] ss:$48 sps:$4 sm:$0xff]   ;;  %v9373_v23 = vld [vmem:[#allocation2 + $0x6c0] ss:$48 sps:$4 sm:$0xff]  }
  0x71   :  { %4306 = vmatprep.subr.bf16.mxu1 %v9358_v13  ;;  %v9374_v24 = vld [vmem:[#allocation2 + $0x64] ss:$48 sps:$4 sm:$0xff]   ;;  %v9378_v26 = vld [vmem:[#allocation2 + $0x60] ss:$48 sps:$4 sm:$0xff]  }
  0x72   :  { %v9376_v25 = vld [vmem:[#allocation2 + $0x664] ss:$48 sps:$4 sm:$0xff]   ;;  %v9379_v27 = vld [vmem:[#allocation2 + $0x660] ss:$48 sps:$4 sm:$0xff]  }
  0x73   :  { %4266 = vmatpush1.bf16.msra.mxu0 %v9360_v14  ;;  %v9380_v28 = vld [vmem:[#allocation2 + $0x4] ss:$48 sps:$4 sm:$0xff]   ;;  %v9384_v30 = vld [vmem:[#allocation2] ss:$48 sps:$4 sm:$0xff]  }
  0x74   :  { %4307 = vmatpush1.bf16.msra.mxu1 %v9361_v15  ;;  %4267 = vmatprep.subr.bf16.mxu0 %v9362_v16  ;;  %v9382_v29 = vld [vmem:[#allocation2 + $0x604] ss:$48 sps:$4 sm:$0xff]   ;;  %v9385_v31 = vld [vmem:[#allocation2 + $0x600] ss:$48 sps:$4 sm:$0xff]   ;;  %v10962_v16 = vmov 0  }
  0x75   :  { %4308 = vmatprep.subr.bf16.mxu1 %v9364_v17  ;;  %v9386_v32 = vld [vmem:[#allocation2 + $0x5a4] ss:$48 sps:$4 sm:$0xff]   ;;  %v9390_v34 = vld [vmem:[#allocation2 + $0x5a0] ss:$48 sps:$4 sm:$0xff]  }
  0x76   :  { %v9388_v33 = vld [vmem:[#allocation2 + $0xba4] ss:$48 sps:$4 sm:$0xff]   ;;  %v9391_v35 = vld [vmem:[#allocation2 + $0xba0] ss:$48 sps:$4 sm:$0xff]  }
  0x77   :  { %4268 = vmatpush1.bf16.msra.mxu0 %v9366_v18  ;;  %v9392_v36 = vld [vmem:[#allocation2 + $0x544] ss:$48 sps:$4 sm:$0xff]   ;;  %v9396_v38 = vld [vmem:[#allocation2 + $0x540] ss:$48 sps:$4 sm:$0xff]  }
  0x78   :  { %4309 = vmatpush1.bf16.msra.mxu1 %v9367_v19  ;;  %4269 = vmatprep.subr.bf16.mxu0 %v9368_v20  ;;  %v9394_v37 = vld [vmem:[#allocation2 + $0xb44] ss:$48 sps:$4 sm:$0xff]   ;;  %v9397_v39 = vld [vmem:[#allocation2 + $0xb40] ss:$48 sps:$4 sm:$0xff]  }
  0x79   :  { %4310 = vmatprep.subr.bf16.mxu1 %v9370_v21  ;;  %v9398_v40 = vld [vmem:[#allocation2 + $0x4e4] ss:$48 sps:$4 sm:$0xff]   ;;  %v9402_v42 = vld [vmem:[#allocation2 + $0x4e0] ss:$48 sps:$4 sm:$0xff]  }
  0x7a   :  { %v9400_v41 = vld [vmem:[#allocation2 + $0xae4] ss:$48 sps:$4 sm:$0xff]   ;;  %v9403_v43 = vld [vmem:[#allocation2 + $0xae0] ss:$48 sps:$4 sm:$0xff]  }
  0x7b   :  { %4270 = vmatpush1.bf16.msra.mxu0 %v9372_v22  ;;  %v9404_v44 = vld [vmem:[#allocation2 + $0x484] ss:$48 sps:$4 sm:$0xff]   ;;  %v9408_v49 = vld [vmem:[#allocation2 + $0x480] ss:$48 sps:$4 sm:$0xff]  }
  0x7c   :  { %4311 = vmatpush1.bf16.msra.mxu1 %v9373_v23  ;;  %4271 = vmatprep.subr.bf16.mxu0 %v9374_v24  ;;  %v9406_v45 = vld [vmem:[#allocation2 + $0xa84] ss:$48 sps:$4 sm:$0xff]   ;;  %v9409_v50 = vld [vmem:[#allocation2 + $0xa80] ss:$48 sps:$4 sm:$0xff]  }
  0x7d   :  { %4312 = vmatprep.subr.bf16.mxu1 %v9376_v25  ;;  %v134_v46 = vld [vmem:[%s11350_s0] sm:$0xff] }
  0x7e   :  { %v11042_v47 = vcombine.high %v134_v46, %v134_v46  ;;  %v9410_v52 = vld [vmem:[#allocation2 + $0x424] ss:$48 sps:$4 sm:$0xff]   ;;  %v9414_v54 = vld [vmem:[#allocation2 + $0x420] ss:$48 sps:$4 sm:$0xff]   ;;  %v11051_v6 = vcombine.low %v134_v46, %v134_v46 }
  0x7f   :  { %4272 = vmatpush1.bf16.msra.mxu0 %v9378_v26  ;;  %v9412_v53 = vld [vmem:[#allocation2 + $0xa24] ss:$48 sps:$4 sm:$0xff]   ;;  %v9415_v55 = vld [vmem:[#allocation2 + $0xa20] ss:$48 sps:$4 sm:$0xff]  }
  0x80   :  { %4313 = vmatpush1.bf16.msra.mxu1 %v9379_v27  ;;  %4273 = vmatprep.subr.bf16.mxu0 %v9380_v28  ;;  %v9416_v56 = vld [vmem:[#allocation2 + $0x3c4] ss:$48 sps:$4 sm:$0xff]   ;;  %v9420_v58 = vld [vmem:[#allocation2 + $0x3c0] ss:$48 sps:$4 sm:$0xff]  }
  0x81   :  { %4314 = vmatprep.subr.bf16.mxu1 %v9382_v29  ;;  %4291 = vmatprep.mubr.bf16.mxu0 %v11042_v47  ;;  %v9418_v57 = vld [vmem:[#allocation2 + $0x9c4] ss:$48 sps:$4 sm:$0xff]   ;;  %v9421_v59 = vld [vmem:[#allocation2 + $0x9c0] ss:$48 sps:$4 sm:$0xff]  }
  0x82   :  { %v9422_v60 = vld [vmem:[#allocation2 + $0x364] ss:$48 sps:$4 sm:$0xff]   ;;  %v9426_v62 = vld [vmem:[#allocation2 + $0x360] ss:$48 sps:$4 sm:$0xff]  }
  0x83   :  { %4274 = vmatpush1.bf16.msra.mxu0 %v9384_v30  ;;  %v9424_v61 = vld [vmem:[#allocation2 + $0x964] ss:$48 sps:$4 sm:$0xff]   ;;  %v9427_v63 = vld [vmem:[#allocation2 + $0x960] ss:$48 sps:$4 sm:$0xff]  }
  0x84   :  { %4315 = vmatpush1.bf16.msra.mxu1 %v9385_v31  ;;  %4275 = vmatprep.subr.bf16.mxu0 %v9386_v32  ;;  %v9428_v0 = vld [vmem:[#allocation2 + $0x304] ss:$48 sps:$4 sm:$0xff]   ;;  %v9432_v2 = vld [vmem:[#allocation2 + $0x300] ss:$48 sps:$4 sm:$0xff]  }
  0x85   :  { %4316 = vmatprep.subr.bf16.mxu1 %v9388_v33  ;;  %v9430_v1 = vld [vmem:[#allocation2 + $0x904] ss:$48 sps:$4 sm:$0xff]   ;;  %v9433_v3 = vld [vmem:[#allocation2 + $0x900] ss:$48 sps:$4 sm:$0xff]  }
  0x86   :  { %v9440_v4 = vld [vmem:[#allocation2 + $0xea4] ss:$48 sps:$4 sm:$0xff]   ;;  %v9438_v8 = vld [vmem:[#allocation2 + $0xea0] ss:$48 sps:$4 sm:$0xff]  }
  0x87   :  { %4276 = vmatpush2.bf16.msra.mxu0 %v9390_v34  ;;  %v9443_v5 = vld [vmem:[#allocation2 + $0x14a4] ss:$48 sps:$4 sm:$0xff]   ;;  %v9441_v9 = vld [vmem:[#allocation2 + $0x14a0] ss:$48 sps:$4 sm:$0xff]  }
  0x88   :  { %4317 = vmatpush2.bf16.msra.mxu1 %v9391_v35  ;;  %4277 = vmatprep.subr.bf16.mxu0 %v9392_v36  ;;  %v9446_v10 = vld [vmem:[#allocation2 + $0xe44] ss:$48 sps:$4 sm:$0xff]   ;;  %v9444_v12 = vld [vmem:[#allocation2 + $0xe40] ss:$48 sps:$4 sm:$0xff]  }
  0x89   :  { %4318 = vmatprep.subr.bf16.mxu1 %v9394_v37  ;;  %v9449_v11 = vld [vmem:[#allocation2 + $0x1444] ss:$48 sps:$4 sm:$0xff]   ;;  %v9447_v13 = vld [vmem:[#allocation2 + $0x1440] ss:$48 sps:$4 sm:$0xff]  }
  0x8a   :  { %v9452_v14 = vld [vmem:[#allocation2 + $0xde4] ss:$48 sps:$4 sm:$0xff]   ;;  %v9450_v17 = vld [vmem:[#allocation2 + $0xde0] ss:$48 sps:$4 sm:$0xff]  }
  0x8b   :  { %4278 = vmatpush2.bf16.msra.mxu0 %v9396_v38  ;;  %v9455_v15 = vld [vmem:[#allocation2 + $0x13e4] ss:$48 sps:$4 sm:$0xff]   ;;  %v9453_v18 = vld [vmem:[#allocation2 + $0x13e0] ss:$48 sps:$4 sm:$0xff]  }
  0x8c   :  { %4319 = vmatpush2.bf16.msra.mxu1 %v9397_v39  ;;  %4279 = vmatprep.subr.bf16.mxu0 %v9398_v40  ;;  %v9458_v19 = vld [vmem:[#allocation2 + $0xd84] ss:$48 sps:$4 sm:$0xff]   ;;  %v9456_v21 = vld [vmem:[#allocation2 + $0xd80] ss:$48 sps:$4 sm:$0xff]  }
  0x8d   :  { %4320 = vmatprep.subr.bf16.mxu1 %v9400_v41  ;;  %v9461_v20 = vld [vmem:[#allocation2 + $0x1384] ss:$48 sps:$4 sm:$0xff]   ;;  %v9459_v22 = vld [vmem:[#allocation2 + $0x1380] ss:$48 sps:$4 sm:$0xff]  }
  0x8e   :  { %v9464_v23 = vld [vmem:[#allocation2 + $0xd24] ss:$48 sps:$4 sm:$0xff]   ;;  %v9462_v25 = vld [vmem:[#allocation2 + $0xd20] ss:$48 sps:$4 sm:$0xff]  }
  0x8f   :  { %4280 = vmatpush2.bf16.msra.mxu0 %v9402_v42  ;;  %v9467_v24 = vld [vmem:[#allocation2 + $0x1324] ss:$48 sps:$4 sm:$0xff]   ;;  %v9465_v26 = vld [vmem:[#allocation2 + $0x1320] ss:$48 sps:$4 sm:$0xff]   ;;  %v9492_v42 = vld [vmem:[#allocation2 + $0x2ac] ss:$48 sps:$4 sm:$0xff]  }
  0x90   :  { %4321 = vmatpush2.bf16.msra.mxu1 %v9403_v43  ;;  %4281 = vmatprep.subr.bf16.mxu0 %v9404_v44  ;;  %v9470_v27 = vld [vmem:[#allocation2 + $0xcc4] ss:$48 sps:$4 sm:$0xff]   ;;  %v9468_v29 = vld [vmem:[#allocation2 + $0xcc0] ss:$48 sps:$4 sm:$0xff]   ;;  %v11071_v44 = vld [vmem:[%s11350_s0 + $0x18] ss:$0 sps:$4 sm:$0xff]  }
  0x91   :  { %4322 = vmatprep.subr.bf16.mxu1 %v9406_v45  ;;  %v9473_v28 = vld [vmem:[#allocation2 + $0x12c4] ss:$48 sps:$4 sm:$0xff]   ;;  %v9471_v30 = vld [vmem:[#allocation2 + $0x12c0] ss:$48 sps:$4 sm:$0xff]   ;;  %v9490_v45 = vld [vmem:[#allocation2 + $0x2a8] ss:$48 sps:$4 sm:$0xff]  }
  0x92   :  { %v9476_v31 = vld [vmem:[#allocation2 + $0xc64] ss:$48 sps:$4 sm:$0xff]   ;;  %v9474_v34 = vld [vmem:[#allocation2 + $0xc60] ss:$48 sps:$4 sm:$0xff]  }
  0x93   :  { %4282 = vmatpush2.bf16.msra.mxu0 %v9408_v49  ;;  %v9479_v32 = vld [vmem:[#allocation2 + $0x1264] ss:$48 sps:$4 sm:$0xff]   ;;  %v9477_v36 = vld [vmem:[#allocation2 + $0x1260] ss:$48 sps:$4 sm:$0xff]  }
  0x94   :  { %4323 = vmatpush2.bf16.msra.mxu1 %v9409_v50  ;;  %4283 = vmatprep.subr.bf16.mxu0 %v9410_v52  ;;  %v11061_v33 = vld [vmem:[%s11350_s0 + $0x10] sm:$0xff]  ;;  %v9496_v50 = vld [vmem:[#allocation2 + $0x248] ss:$48 sps:$4 sm:$0xff]  }
  0x95   :  { %4324 = vmatprep.subr.bf16.mxu1 %v9412_v53  ;;  %v11065_v35 = vcombine.high %v11061_v33, %v11061_v33  ;;  %v9482_v37 = vld [vmem:[#allocation2 + $0xc04] ss:$48 sps:$4 sm:$0xff]   ;;  %v9480_v39 = vld [vmem:[#allocation2 + $0xc00] ss:$48 sps:$4 sm:$0xff]   ;;  %v9504_v53 = vld [vmem:[#allocation2 + $0x1ec] ss:$48 sps:$4 sm:$0xff]  }
  0x96   :  { %v9485_v38 = vld [vmem:[#allocation2 + $0x1204] ss:$48 sps:$4 sm:$0xff]   ;;  %v9483_v40 = vld [vmem:[#allocation2 + $0x1200] ss:$48 sps:$4 sm:$0xff]  }
  0x97   :  { %4284 = vmatpush2.bf16.msra.mxu0 %v9414_v54  ;;  %v9488_v41 = vld [vmem:[#allocation2 + $0x11a4] ss:$48 sps:$4 sm:$0xff]   ;;  %v9486_v43 = vld [vmem:[#allocation2 + $0x11a0] ss:$48 sps:$4 sm:$0xff]  }
  0x98   :  { %4325 = vmatpush2.bf16.msra.mxu1 %v9415_v55  ;;  %4285 = vmatprep.subr.bf16.mxu0 %v9416_v56  ;;  %v9495_v46 = vld [vmem:[#allocation2 + $0x1144] ss:$48 sps:$4 sm:$0xff]   ;;  %v9493_v49 = vld [vmem:[#allocation2 + $0x1140] ss:$48 sps:$4 sm:$0xff]   ;;  %v9502_v55 = vld [vmem:[#allocation2 + $0x1e8] ss:$48 sps:$4 sm:$0xff]  }
  0x99   :  { %4326 = vmatprep.subr.bf16.mxu1 %v9418_v57  ;;  %v9501_v52 = vld [vmem:[#allocation2 + $0x10e4] ss:$48 sps:$4 sm:$0xff]   ;;  %v9499_v54 = vld [vmem:[#allocation2 + $0x10e0] ss:$48 sps:$4 sm:$0xff]   ;;  %v9510_v57 = vld [vmem:[#allocation2 + $0x18c] ss:$48 sps:$4 sm:$0xff]  }
  0x9a   :  { %v9507_v56 = vld [vmem:[#allocation2 + $0x1084] ss:$48 sps:$4 sm:$0xff]  }
  0x9b   :  { %4286 = vmatpush2.bf16.msra.mxu0 %v9420_v58  ;;  %v9505_v58 = vld [vmem:[#allocation2 + $0x1080] ss:$48 sps:$4 sm:$0xff]  }
  0x9c   :  { %4327 = vmatpush2.bf16.msra.mxu1 %v9421_v59  ;;  %4287 = vmatprep.subr.bf16.mxu0 %v9422_v60  ;;  %v9508_v59 = vld [vmem:[#allocation2 + $0x188] ss:$48 sps:$4 sm:$0xff]   ;;  %v9513_v60 = vld [vmem:[#allocation2 + $0x1024] ss:$48 sps:$4 sm:$0xff]  }
  0x9d   :  { %4328 = vmatprep.subr.bf16.mxu1 %v9424_v61  ;;  %v9516_v61 = vld [vmem:[#allocation2 + $0x12c] ss:$48 sps:$4 sm:$0xff]  }
  0x9f   :  { %4288 = vmatpush2.bf16.msra.mxu0 %v9426_v62  ;;  %v9511_v62 = vld [vmem:[#allocation2 + $0x1020] ss:$48 sps:$4 sm:$0xff]  }
  0xa0   :  { %4329 = vmatpush2.bf16.msra.mxu1 %v9427_v63  ;;  %4289 = vmatprep.subr.bf16.mxu0 %v9428_v0  ;;  %v9514_v63 = vld [vmem:[#allocation2 + $0x128] ss:$48 sps:$4 sm:$0xff]   ;;  %v9519_v0 = vld [vmem:[#allocation2 + $0xfc4] ss:$48 sps:$4 sm:$0xff]  }
  0xa1   :  { %4330 = vmatprep.subr.bf16.mxu1 %v9430_v1  ;;  %v9522_v1 = vld [vmem:[#allocation2 + $0xcc] ss:$48 sps:$4 sm:$0xff]  }
  0xa3   :  { %4290 = vmatpush2.bf16.msra.mxu0 %v9432_v2  ;;  %v9517_v2 = vld [vmem:[#allocation2 + $0xfc0] ss:$48 sps:$4 sm:$0xff]  }
  0xa4   :  { %4331 = vmatpush2.bf16.msra.mxu1 %v9433_v3  ;;  %4341 = vmatprep.subr.bf16.mxu0 %v9440_v4  ;;  %v9520_v3 = vld [vmem:[#allocation2 + $0xc8] ss:$48 sps:$4 sm:$0xff]   ;;  %v9525_v4 = vld [vmem:[#allocation2 + $0xf64] ss:$48 sps:$4 sm:$0xff]  }
  0xa5   :  { %4382 = vmatprep.subr.bf16.mxu1 %v9443_v5  ;;  %v9528_v5 = vld [vmem:[#allocation2 + $0x6c] ss:$48 sps:$4 sm:$0xff]  }
  0xa6   :  { %4292 = vmatmul.mubr.bf16.vlgmr.msra.gmra.mxu0 %v11051_v6 }
  0xa7   :  { %4333 = vmatmul.mubr.bf16.vlgmr.msra.gmra.mxu1 %v11053_v7  ;;  %4342 = vmatpush1.bf16.msra.mxu0 %v9438_v8  ;;  %v9523_v8 = vld [vmem:[#allocation2 + $0xf60] ss:$48 sps:$4 sm:$0xff]  }
  0xa8   :  { %4383 = vmatpush1.bf16.msra.mxu1 %v9441_v9  ;;  %4343 = vmatprep.subr.bf16.mxu0 %v9446_v10  ;;  %v9526_v9 = vld [vmem:[#allocation2 + $0x68] ss:$48 sps:$4 sm:$0xff]   ;;  %v9531_v10 = vld [vmem:[#allocation2 + $0xf04] ss:$48 sps:$4 sm:$0xff]  }
  0xa9   :  { %4384 = vmatprep.subr.bf16.mxu1 %v9449_v11  ;;  %4414 = vmatprep.mubr.bf16.mxu1 %v10962_v16  ;;  %v9534_v11 = vld [vmem:[#allocation2 + $0xc] ss:$48 sps:$4 sm:$0xff]  }
  0xaa   :  { %4373 = vmatprep.mubr.bf16.mxu0 %v11065_v35 }
  0xab   :  { %4344 = vmatpush1.bf16.msra.mxu0 %v9444_v12  ;;  %v9529_v12 = vld [vmem:[#allocation2 + $0xf00] ss:$48 sps:$4 sm:$0xff]  }
  0xac   :  { %4385 = vmatpush1.bf16.msra.mxu1 %v9447_v13  ;;  %4345 = vmatprep.subr.bf16.mxu0 %v9452_v14  ;;  %v9532_v13 = vld [vmem:[#allocation2 + $0x8] ss:$48 sps:$4 sm:$0xff]   ;;  %v9539_v14 = vld [vmem:[#allocation2 + $0x5ac] ss:$48 sps:$4 sm:$0xff]  }
  0xad   :  { %4386 = vmatprep.subr.bf16.mxu1 %v9455_v15  ;;  %v9542_v15 = vld [vmem:[#allocation2 + $0x8ac] ss:$48 sps:$4 sm:$0xff]  }
  0xaf   :  { %4346 = vmatpush1.bf16.msra.mxu0 %v9450_v17  ;;  %v11077_v17 = vcombine.low %v11061_v33, %v11061_v33  ;;  %v9566_v33 = vld [vmem:[#allocation2 + $0x72c] ss:$48 sps:$4 sm:$0xff]  }
  0xb0   :  { %4387 = vmatpush1.bf16.msra.mxu1 %v9453_v18  ;;  %4347 = vmatprep.subr.bf16.mxu0 %v9458_v19  ;;  %v9537_v18 = vld [vmem:[#allocation2 + $0x5a8] ss:$48 sps:$4 sm:$0xff]  }
  0xb1   :  { %4388 = vmatprep.subr.bf16.mxu1 %v9461_v20  ;;  %v9540_v19 = vld [vmem:[#allocation2 + $0x8a8] ss:$48 sps:$4 sm:$0xff]   ;;  %v9545_v20 = vld [vmem:[#allocation2 + $0x54c] ss:$48 sps:$4 sm:$0xff]  }
  0xb3   :  { %4348 = vmatpush1.bf16.msra.mxu0 %v9456_v21  ;;  %v9548_v21 = vld [vmem:[#allocation2 + $0x84c] ss:$48 sps:$4 sm:$0xff]  }
  0xb4   :  { %4389 = vmatpush1.bf16.msra.mxu1 %v9459_v22  ;;  %4349 = vmatprep.subr.bf16.mxu0 %v9464_v23  ;;  %v9543_v22 = vld [vmem:[#allocation2 + $0x548] ss:$48 sps:$4 sm:$0xff]  }
  0xb5   :  { %4390 = vmatprep.subr.bf16.mxu1 %v9467_v24  ;;  %v9546_v23 = vld [vmem:[#allocation2 + $0x848] ss:$48 sps:$4 sm:$0xff]   ;;  %v9551_v24 = vld [vmem:[#allocation2 + $0x4ec] ss:$48 sps:$4 sm:$0xff]  }
  0xb7   :  { %4350 = vmatpush1.bf16.msra.mxu0 %v9462_v25  ;;  %v9554_v25 = vld [vmem:[#allocation2 + $0x7ec] ss:$48 sps:$4 sm:$0xff]  }
  0xb8   :  { %4391 = vmatpush1.bf16.msra.mxu1 %v9465_v26  ;;  %4351 = vmatprep.subr.bf16.mxu0 %v9470_v27  ;;  %v9549_v26 = vld [vmem:[#allocation2 + $0x4e8] ss:$48 sps:$4 sm:$0xff]  }
  0xb9   :  { %4392 = vmatprep.subr.bf16.mxu1 %v9473_v28  ;;  %v9552_v27 = vld [vmem:[#allocation2 + $0x7e8] ss:$48 sps:$4 sm:$0xff]   ;;  %v9557_v28 = vld [vmem:[#allocation2 + $0x48c] ss:$48 sps:$4 sm:$0xff]  }
  0xbb   :  { %4352 = vmatpush1.bf16.msra.mxu0 %v9468_v29  ;;  %v9560_v29 = vld [vmem:[#allocation2 + $0x78c] ss:$48 sps:$4 sm:$0xff]  }
  0xbc   :  { %4393 = vmatpush1.bf16.msra.mxu1 %v9471_v30  ;;  %4353 = vmatprep.subr.bf16.mxu0 %v9476_v31  ;;  %v9555_v30 = vld [vmem:[#allocation2 + $0x488] ss:$48 sps:$4 sm:$0xff]  }
  0xbd   :  { %4394 = vmatprep.subr.bf16.mxu1 %v9479_v32  ;;  %v9558_v31 = vld [vmem:[#allocation2 + $0x788] ss:$48 sps:$4 sm:$0xff]   ;;  %v9563_v32 = vld [vmem:[#allocation2 + $0x42c] ss:$48 sps:$4 sm:$0xff]  }
  0xbf   :  { %4354 = vmatpush1.bf16.msra.mxu0 %v9474_v34  ;;  %v9561_v34 = vld [vmem:[#allocation2 + $0x428] ss:$48 sps:$4 sm:$0xff]  }
  0xc0   :  { %4395 = vmatpush1.bf16.msra.mxu1 %v9477_v36  ;;  %4355 = vmatprep.subr.bf16.mxu0 %v9482_v37  ;;  %v9564_v36 = vld [vmem:[#allocation2 + $0x728] ss:$48 sps:$4 sm:$0xff]   ;;  %v9569_v37 = vld [vmem:[#allocation2 + $0x3cc] ss:$48 sps:$4 sm:$0xff]  }
  0xc1   :  { %4396 = vmatprep.subr.bf16.mxu1 %v9485_v38  ;;  %v9572_v38 = vld [vmem:[#allocation2 + $0x6cc] ss:$48 sps:$4 sm:$0xff]  }
  0xc3   :  { %4356 = vmatpush1.bf16.msra.mxu0 %v9480_v39  ;;  %v9567_v39 = vld [vmem:[#allocation2 + $0x3c8] ss:$48 sps:$4 sm:$0xff]  }
  0xc4   :  { %4397 = vmatpush1.bf16.msra.mxu1 %v9483_v40  ;;  %4357 = vmatprep.subr.bf16.mxu0 %v9488_v41  ;;  %v9570_v40 = vld [vmem:[#allocation2 + $0x6c8] ss:$48 sps:$4 sm:$0xff]   ;;  %v9575_v41 = vld [vmem:[#allocation2 + $0x36c] ss:$48 sps:$4 sm:$0xff]  }
  0xc5   :  { %4423 = vmatprep.subr.bf16.mxu1 %v9492_v42  ;;  %v9578_v42 = vld [vmem:[#allocation2 + $0x66c] ss:$48 sps:$4 sm:$0xff]  }
  0xc7   :  { %4415 = vmatmul.mubr.bf16.vlgmr.msra.gmra.mxu1 %v11071_v44  ;;  %4358 = vmatpush2.bf16.msra.mxu0 %v9486_v43  ;;  %v9573_v43 = vld [vmem:[#allocation2 + $0x368] ss:$48 sps:$4 sm:$0xff]  }
  0xc8   :  { %4424 = vmatpush1.bf16.msra.mxu1 %v9490_v45  ;;  %4359 = vmatprep.subr.bf16.mxu0 %v9495_v46  ;;  %v9576_v45 = vld [vmem:[#allocation2 + $0x668] ss:$48 sps:$4 sm:$0xff]   ;;  %v9581_v46 = vld [vmem:[#allocation2 + $0x30c] ss:$48 sps:$4 sm:$0xff]  }
  0xc9   :  { %4425 = vmatprep.subr.bf16.mxu1 %v9498_v48  ;;  %4455 = vmatprep.mubr.bf16.mxu1 %v11042_v47  ;;  %v9584_v48 = vld [vmem:[#allocation2 + $0x60c] ss:$48 sps:$4 sm:$0xff]  }
  0xcb   :  { %4360 = vmatpush2.bf16.msra.mxu0 %v9493_v49  ;;  %v9579_v49 = vld [vmem:[#allocation2 + $0x308] ss:$48 sps:$4 sm:$0xff]  }
  0xcc   :  { %4426 = vmatpush1.bf16.msra.mxu1 %v9496_v50  ;;  %4361 = vmatprep.subr.bf16.mxu0 %v9501_v52  ;;  %v9582_v50 = vld [vmem:[#allocation2 + $0x608] ss:$48 sps:$4 sm:$0xff]   ;;  %v9587_v52 = vld [vmem:[#allocation2 + $0xbac] ss:$48 sps:$4 sm:$0xff]  }
  0xcd   :  { %4427 = vmatprep.subr.bf16.mxu1 %v9504_v53  ;;  %v9590_v53 = vld [vmem:[#allocation2 + $0xeac] ss:$48 sps:$4 sm:$0xff]  }
  0xcf   :  { %4362 = vmatpush2.bf16.msra.mxu0 %v9499_v54  ;;  %v9585_v54 = vld [vmem:[#allocation2 + $0xba8] ss:$48 sps:$4 sm:$0xff]  }
  0xd0   :  { %4428 = vmatpush1.bf16.msra.mxu1 %v9502_v55  ;;  %4363 = vmatprep.subr.bf16.mxu0 %v9507_v56  ;;  %v9588_v55 = vld [vmem:[#allocation2 + $0xea8] ss:$48 sps:$4 sm:$0xff]   ;;  %v9593_v56 = vld [vmem:[#allocation2 + $0xb4c] ss:$48 sps:$4 sm:$0xff]  }
  0xd1   :  { %4429 = vmatprep.subr.bf16.mxu1 %v9510_v57  ;;  %v9596_v57 = vld [vmem:[#allocation2 + $0xe4c] ss:$48 sps:$4 sm:$0xff]  }
  0xd3   :  { %4364 = vmatpush2.bf16.msra.mxu0 %v9505_v58  ;;  %v9591_v58 = vld [vmem:[#allocation2 + $0xb48] ss:$48 sps:$4 sm:$0xff]  }
  0xd4   :  { %4430 = vmatpush1.bf16.msra.mxu1 %v9508_v59  ;;  %4365 = vmatprep.subr.bf16.mxu0 %v9513_v60  ;;  %v9594_v59 = vld [vmem:[#allocation2 + $0xe48] ss:$48 sps:$4 sm:$0xff]   ;;  %v9599_v60 = vld [vmem:[#allocation2 + $0xaec] ss:$48 sps:$4 sm:$0xff]  }
  0xd5   :  { %4431 = vmatprep.subr.bf16.mxu1 %v9516_v61  ;;  %v9602_v61 = vld [vmem:[#allocation2 + $0xdec] ss:$48 sps:$4 sm:$0xff]  }
  0xd7   :  { %4366 = vmatpush2.bf16.msra.mxu0 %v9511_v62  ;;  %v9597_v62 = vld [vmem:[#allocation2 + $0xae8] ss:$48 sps:$4 sm:$0xff]  }
  0xd8   :  { %4432 = vmatpush1.bf16.msra.mxu1 %v9514_v63  ;;  %4367 = vmatprep.subr.bf16.mxu0 %v9519_v0  ;;  %v9600_v63 = vld [vmem:[#allocation2 + $0xde8] ss:$48 sps:$4 sm:$0xff]   ;;  %v9605_v0 = vld [vmem:[#allocation2 + $0xa8c] ss:$48 sps:$4 sm:$0xff]  }
  0xd9   :  { %4433 = vmatprep.subr.bf16.mxu1 %v9522_v1  ;;  %v9608_v1 = vld [vmem:[#allocation2 + $0xd8c] ss:$48 sps:$4 sm:$0xff]  }
  0xdb   :  { %4368 = vmatpush2.bf16.msra.mxu0 %v9517_v2  ;;  %v9603_v2 = vld [vmem:[#allocation2 + $0xa88] ss:$48 sps:$4 sm:$0xff]  }
  0xdc   :  { %4434 = vmatpush1.bf16.msra.mxu1 %v9520_v3  ;;  %4369 = vmatprep.subr.bf16.mxu0 %v9525_v4  ;;  %v9606_v3 = vld [vmem:[#allocation2 + $0xd88] ss:$48 sps:$4 sm:$0xff]   ;;  %v9611_v4 = vld [vmem:[#allocation2 + $0xa2c] ss:$48 sps:$4 sm:$0xff]  }
  0xdd   :  { %4435 = vmatprep.subr.bf16.mxu1 %v9528_v5  ;;  %v9614_v5 = vld [vmem:[#allocation2 + $0xd2c] ss:$48 sps:$4 sm:$0xff]  }
  0xdf   :  { %4370 = vmatpush2.bf16.msra.mxu0 %v9523_v8  ;;  %v9609_v8 = vld [vmem:[#allocation2 + $0xa28] ss:$48 sps:$4 sm:$0xff]  }
  0xe0   :  { %4436 = vmatpush1.bf16.msra.mxu1 %v9526_v9  ;;  %4371 = vmatprep.subr.bf16.mxu0 %v9531_v10  ;;  %v9612_v9 = vld [vmem:[#allocation2 + $0xd28] ss:$48 sps:$4 sm:$0xff]   ;;  %v9617_v10 = vld [vmem:[#allocation2 + $0x9cc] ss:$48 sps:$4 sm:$0xff]  }
  0xe1   :  { %4437 = vmatprep.subr.bf16.mxu1 %v9534_v11  ;;  %v9620_v11 = vld [vmem:[#allocation2 + $0xccc] ss:$48 sps:$4 sm:$0xff]  }
  0xe3   :  { %4372 = vmatpush2.bf16.msra.mxu0 %v9529_v12  ;;  %v9615_v12 = vld [vmem:[#allocation2 + $0x9c8] ss:$48 sps:$4 sm:$0xff]  }
  0xe4   :  { %4438 = vmatpush1.bf16.msra.mxu1 %v9532_v13  ;;  %4464 = vmatprep.subr.bf16.mxu0 %v9542_v15  ;;  %v9618_v13 = vld [vmem:[#allocation2 + $0xcc8] ss:$48 sps:$4 sm:$0xff]   ;;  %v9626_v15 = vld [vmem:[#allocation2 + $0xc6c] ss:$48 sps:$4 sm:$0xff]  }
  0xe5   :  { %4439 = vmatprep.subr.bf16.mxu1 %v9539_v14  ;;  %v9623_v14 = vld [vmem:[#allocation2 + $0x96c] ss:$48 sps:$4 sm:$0xff]  }
  0xe6   :  { %4374 = vmatmul.mubr.bf16.vlgmr.msra.gmra.mxu0 %v11077_v17 }
  0xe7   :  { %4465 = vmatpush1.bf16.msra.mxu0 %v9540_v19  ;;  %4496 = vmatprep.mubr.bf16.mxu0 %v11047_v51  ;;  %v9624_v19 = vld [vmem:[#allocation2 + $0xc68] ss:$48 sps:$4 sm:$0xff]  }
  0xe8   :  { %4440 = vmatpush2.bf16.msra.mxu1 %v9537_v18  ;;  %4466 = vmatprep.subr.bf16.mxu0 %v9548_v21  ;;  %v9621_v18 = vld [vmem:[#allocation2 + $0x968] ss:$48 sps:$4 sm:$0xff]   ;;  %v9632_v21 = vld [vmem:[#allocation2 + $0xc0c] ss:$48 sps:$4 sm:$0xff]  }
  0xe9   :  { %4441 = vmatprep.subr.bf16.mxu1 %v9545_v20  ;;  %v9629_v20 = vld [vmem:[#allocation2 + $0x90c] ss:$48 sps:$4 sm:$0xff]  }
  0xeb   :  { %4467 = vmatpush1.bf16.msra.mxu0 %v9546_v23  ;;  %v9630_v23 = vld [vmem:[#allocation2 + $0xc08] ss:$48 sps:$4 sm:$0xff]  }
  0xec   :  { %4442 = vmatpush2.bf16.msra.mxu1 %v9543_v22  ;;  %4468 = vmatprep.subr.bf16.mxu0 %v9554_v25  ;;  %v9627_v22 = vld [vmem:[#allocation2 + $0x908] ss:$48 sps:$4 sm:$0xff]   ;;  %v9638_v25 = vld [vmem:[#allocation2 + $0x14ac] ss:$48 sps:$4 sm:$0xff]  }
  0xed   :  { %4443 = vmatprep.subr.bf16.mxu1 %v9551_v24  ;;  %v9635_v24 = vld [vmem:[#allocation2 + $0x11ac] ss:$48 sps:$4 sm:$0xff]  }
  0xef   :  { %4469 = vmatpush1.bf16.msra.mxu0 %v9552_v27  ;;  %v9636_v27 = vld [vmem:[#allocation2 + $0x14a8] ss:$48 sps:$4 sm:$0xff]  }
  0xf0   :  { %4444 = vmatpush2.bf16.msra.mxu1 %v9549_v26  ;;  %4470 = vmatprep.subr.bf16.mxu0 %v9560_v29  ;;  %v9633_v26 = vld [vmem:[#allocation2 + $0x11a8] ss:$48 sps:$4 sm:$0xff]   ;;  %v9644_v29 = vld [vmem:[#allocation2 + $0x144c] ss:$48 sps:$4 sm:$0xff]  }
  0xf1   :  { %4445 = vmatprep.subr.bf16.mxu1 %v9557_v28  ;;  %v9641_v28 = vld [vmem:[#allocation2 + $0x114c] ss:$48 sps:$4 sm:$0xff]  }
  0xf3   :  { %4471 = vmatpush1.bf16.msra.mxu0 %v9558_v31  ;;  %v9642_v31 = vld [vmem:[#allocation2 + $0x1448] ss:$48 sps:$4 sm:$0xff]  }
  0xf4   :  { %4446 = vmatpush2.bf16.msra.mxu1 %v9555_v30  ;;  %4472 = vmatprep.subr.bf16.mxu0 %v9566_v33  ;;  %v9639_v30 = vld [vmem:[#allocation2 + $0x1148] ss:$48 sps:$4 sm:$0xff]   ;;  %v9650_v33 = vld [vmem:[#allocation2 + $0x13ec] ss:$48 sps:$4 sm:$0xff]  }
  0xf5   :  { %4447 = vmatprep.subr.bf16.mxu1 %v9563_v32  ;;  %v9647_v32 = vld [vmem:[#allocation2 + $0x10ec] ss:$48 sps:$4 sm:$0xff]  }
  0xf7   :  { %4473 = vmatpush1.bf16.msra.mxu0 %v9564_v36  ;;  %v9648_v36 = vld [vmem:[#allocation2 + $0x13e8] ss:$48 sps:$4 sm:$0xff]  }
  0xf8   :  { %4448 = vmatpush2.bf16.msra.mxu1 %v9561_v34  ;;  %4474 = vmatprep.subr.bf16.mxu0 %v9572_v38  ;;  %v9645_v34 = vld [vmem:[#allocation2 + $0x10e8] ss:$48 sps:$4 sm:$0xff]   ;;  %v9656_v38 = vld [vmem:[#allocation2 + $0x138c] ss:$48 sps:$4 sm:$0xff]  }
  0xf9   :  { %4449 = vmatprep.subr.bf16.mxu1 %v9569_v37  ;;  %v9653_v37 = vld [vmem:[#allocation2 + $0x108c] ss:$48 sps:$4 sm:$0xff]  }
  0xfb   :  { %4475 = vmatpush1.bf16.msra.mxu0 %v9570_v40  ;;  %v9654_v40 = vld [vmem:[#allocation2 + $0x1388] ss:$48 sps:$4 sm:$0xff]  }
  0xfc   :  { %4450 = vmatpush2.bf16.msra.mxu1 %v9567_v39  ;;  %4476 = vmatprep.subr.bf16.mxu0 %v9578_v42  ;;  %v9651_v39 = vld [vmem:[#allocation2 + $0x1088] ss:$48 sps:$4 sm:$0xff]   ;;  %v9662_v42 = vld [vmem:[#allocation2 + $0x132c] ss:$48 sps:$4 sm:$0xff]  }
  0xfd   :  { %4451 = vmatprep.subr.bf16.mxu1 %v9575_v41  ;;  %v9659_v41 = vld [vmem:[#allocation2 + $0x102c] ss:$48 sps:$4 sm:$0xff]  }
  0xff   :  { %4477 = vmatpush1.bf16.msra.mxu0 %v9576_v45  ;;  %v9660_v45 = vld [vmem:[#allocation2 + $0x1328] ss:$48 sps:$4 sm:$0xff]  }
 0x100   :  { %4452 = vmatpush2.bf16.msra.mxu1 %v9573_v43  ;;  %4478 = vmatprep.subr.bf16.mxu0 %v9584_v48  ;;  %v9657_v43 = vld [vmem:[#allocation2 + $0x1028] ss:$48 sps:$4 sm:$0xff]   ;;  %v9668_v48 = vld [vmem:[#allocation2 + $0x12cc] ss:$48 sps:$4 sm:$0xff]  }
 0x101   :  { %4453 = vmatprep.subr.bf16.mxu1 %v9581_v46  ;;  %v9665_v46 = vld [vmem:[#allocation2 + $0xfcc] ss:$48 sps:$4 sm:$0xff]  }
 0x103   :  { %4479 = vmatpush1.bf16.msra.mxu0 %v9582_v50  ;;  %v9666_v50 = vld [vmem:[#allocation2 + $0x12c8] ss:$48 sps:$4 sm:$0xff]  }
 0x104   :  { %4454 = vmatpush2.bf16.msra.mxu1 %v9579_v49  ;;  %4480 = vmatprep.subr.bf16.mxu0 %v9587_v52  ;;  %v9663_v49 = vld [vmem:[#allocation2 + $0xfc8] ss:$48 sps:$4 sm:$0xff]   ;;  %v9671_v52 = vld [vmem:[#allocation2 + $0xf6c] ss:$48 sps:$4 sm:$0xff]  }
 0x105   :  { %4505 = vmatprep.subr.bf16.mxu1 %v9590_v53  ;;  %v9674_v53 = vld [vmem:[#allocation2 + $0x126c] ss:$48 sps:$4 sm:$0xff]  }
 0x107   :  { %4456 = vmatmul.mubr.bf16.vlgmr.msra.gmra.mxu1 %v11051_v6  ;;  %4481 = vmatpush2.bf16.msra.mxu0 %v9585_v54  ;;  %v9669_v54 = vld [vmem:[#allocation2 + $0xf68] ss:$48 sps:$4 sm:$0xff]  }
 0x108   :  { %4506 = vmatpush1.bf16.msra.mxu1 %v9588_v55  ;;  %4482 = vmatprep.subr.bf16.mxu0 %v9593_v56  ;;  %v9672_v55 = vld [vmem:[#allocation2 + $0x1268] ss:$48 sps:$4 sm:$0xff]   ;;  %v9677_v56 = vld [vmem:[#allocation2 + $0xf0c] ss:$48 sps:$4 sm:$0xff]  }
 0x109   :  { %4507 = vmatprep.subr.bf16.mxu1 %v9596_v57  ;;  %4537 = vmatprep.mubr.bf16.mxu1 %v11065_v35  ;;  %v9680_v57 = vld [vmem:[#allocation2 + $0x120c] ss:$48 sps:$4 sm:$0xff]  }
 0x10b   :  { %4483 = vmatpush2.bf16.msra.mxu0 %v9591_v58  ;;  %v9675_v58 = vld [vmem:[#allocation2 + $0xf08] ss:$48 sps:$4 sm:$0xff]  }
 0x10c   :  { %4508 = vmatpush1.bf16.msra.mxu1 %v9594_v59  ;;  %4484 = vmatprep.subr.bf16.mxu0 %v9599_v60  ;;  %v9678_v59 = vld [vmem:[#allocation2 + $0x1208] ss:$48 sps:$4 sm:$0xff]   ;;  %v9683_v60 = vld [vmem:[#allocation2 + $0x2b4] ss:$48 sps:$4 sm:$0xff]  }
 0x10d   :  { %4509 = vmatprep.subr.bf16.mxu1 %v9602_v61  ;;  %v9686_v61 = vld [vmem:[#allocation2 + $0x8b4] ss:$48 sps:$4 sm:$0xff]  }
 0x10f   :  { %4485 = vmatpush2.bf16.msra.mxu0 %v9597_v62  ;;  %v9681_v62 = vld [vmem:[#allocation2 + $0x2b0] ss:$48 sps:$4 sm:$0xff]  }
 0x110   :  { %4510 = vmatpush1.bf16.msra.mxu1 %v9600_v63  ;;  %4486 = vmatprep.subr.bf16.mxu0 %v9605_v0  ;;  %v9684_v63 = vld [vmem:[#allocation2 + $0x8b0] ss:$48 sps:$4 sm:$0xff]   ;;  %v9689_v0 = vld [vmem:[#allocation2 + $0x254] ss:$48 sps:$4 sm:$0xff]  }
 0x111   :  { %4511 = vmatprep.subr.bf16.mxu1 %v9608_v1  ;;  %v9692_v1 = vld [vmem:[#allocation2 + $0x854] ss:$48 sps:$4 sm:$0xff]  }
 0x113   :  { %4487 = vmatpush2.bf16.msra.mxu0 %v9603_v2  ;;  %v9687_v2 = vld [vmem:[#allocation2 + $0x250] ss:$48 sps:$4 sm:$0xff]  }
 0x114   :  { %4512 = vmatpush1.bf16.msra.mxu1 %v9606_v3  ;;  %4488 = vmatprep.subr.bf16.mxu0 %v9611_v4  ;;  %v9690_v3 = vld [vmem:[#allocation2 + $0x850] ss:$48 sps:$4 sm:$0xff]   ;;  %v9695_v4 = vld [vmem:[#allocation2 + $0x1f4] ss:$48 sps:$4 sm:$0xff]  }
 0x115   :  { %4513 = vmatprep.subr.bf16.mxu1 %v9614_v5  ;;  %v9698_v5 = vld [vmem:[#allocation2 + $0x7f4] ss:$48 sps:$4 sm:$0xff]  }
 0x117   :  { %4489 = vmatpush2.bf16.msra.mxu0 %v9609_v8  ;;  %v9693_v8 = vld [vmem:[#allocation2 + $0x1f0] ss:$48 sps:$4 sm:$0xff]  }
 0x118   :  { %4514 = vmatpush1.bf16.msra.mxu1 %v9612_v9  ;;  %4490 = vmatprep.subr.bf16.mxu0 %v9617_v10  ;;  %v9696_v9 = vld [vmem:[#allocation2 + $0x7f0] ss:$48 sps:$4 sm:$0xff]   ;;  %v9701_v10 = vld [vmem:[#allocation2 + $0x194] ss:$48 sps:$4 sm:$0xff]  }
 0x119   :  { %4515 = vmatprep.subr.bf16.mxu1 %v9620_v11  ;;  %v9699_v11 = vld [vmem:[#allocation2 + $0x190] ss:$48 sps:$4 sm:$0xff]  }
 0x11b   :  { %4491 = vmatpush2.bf16.msra.mxu0 %v9615_v12  ;;  %v9702_v12 = vld [vmem:[#allocation2 + $0x790] ss:$48 sps:$4 sm:$0xff]  }
 0x11c   :  { %4516 = vmatpush1.bf16.msra.mxu1 %v9618_v13  ;;  %4492 = vmatprep.subr.bf16.mxu0 %v9623_v14  ;;  %v9707_v13 = vld [vmem:[#allocation2 + $0x134] ss:$48 sps:$4 sm:$0xff]  }
 0x11d   :  { %4517 = vmatprep.subr.bf16.mxu1 %v9626_v15  ;;  %v9710_v14 = vld [vmem:[#allocation2 + $0x734] ss:$48 sps:$4 sm:$0xff]   ;;  %v9705_v15 = vld [vmem:[#allocation2 + $0x130] ss:$48 sps:$4 sm:$0xff]  }
 0x11f   :  { %4493 = vmatpush2.bf16.msra.mxu0 %v9621_v18  ;;  %v9708_v18 = vld [vmem:[#allocation2 + $0x730] ss:$48 sps:$4 sm:$0xff]  }
 0x120   :  { %4518 = vmatpush1.bf16.msra.mxu1 %v9624_v19  ;;  %4494 = vmatprep.subr.bf16.mxu0 %v9629_v20  ;;  %v9713_v19 = vld [vmem:[#allocation2 + $0xd4] ss:$48 sps:$4 sm:$0xff]  }
 0x121   :  { %4519 = vmatprep.subr.bf16.mxu1 %v9632_v21  ;;  %v9716_v20 = vld [vmem:[#allocation2 + $0x6d4] ss:$48 sps:$4 sm:$0xff]   ;;  %v9711_v21 = vld [vmem:[#allocation2 + $0xd0] ss:$48 sps:$4 sm:$0xff]  }
 0x123   :  { %4495 = vmatpush2.bf16.msra.mxu0 %v9627_v22  ;;  %v9714_v22 = vld [vmem:[#allocation2 + $0x6d0] ss:$48 sps:$4 sm:$0xff]  }
 0x124   :  { %4520 = vmatpush1.bf16.msra.mxu1 %v9630_v23  ;;  %4546 = vmatprep.subr.bf16.mxu0 %v9638_v25  ;;  %v814_v23 = vlaneseq  ;;  %v9722_v25 = vld [vmem:[#allocation2 + $0x674] ss:$48 sps:$4 sm:$0xff]  }
 0x125   :  { %4521 = vmatprep.subr.bf16.mxu1 %v9635_v24  ;;  %v9719_v24 = vld [vmem:[#allocation2 + $0x74] ss:$48 sps:$4 sm:$0xff]  }
 0x126   :  { %4497 = vmatmul.mubr.bf16.vlgmr.msra.gmra.mxu0 %v11053_v7 }
 0x127   :  { %4547 = vmatpush1.bf16.msra.mxu0 %v9636_v27  ;;  %4578 = vmatprep.mubr.bf16.mxu0 %v10962_v16  ;;  %v9720_v27 = vld [vmem:[#allocation2 + $0x670] ss:$48 sps:$4 sm:$0xff]  }
 0x128   :  { %4522 = vmatpush2.bf16.msra.mxu1 %v9633_v26  ;;  %4548 = vmatprep.subr.bf16.mxu0 %v9644_v29  ;;  %v9717_v26 = vld [vmem:[#allocation2 + $0x70] ss:$48 sps:$4 sm:$0xff]   ;;  %v9725_v29 = vld [vmem:[#allocation2 + $0x14] ss:$48 sps:$4 sm:$0xff]  }
 0x129   :  { %4523 = vmatprep.subr.bf16.mxu1 %v9641_v28  ;;  %v11089_v28 = vshrl.u32 %v814_v23, 7  ;;  %v9771_v23 = vld [vmem:[#allocation2 + $0x310] ss:$48 sps:$4 sm:$0xff]  }
 0x12b   :  { %4549 = vmatpush1.bf16.msra.mxu0 %v9642_v31  ;;  %v9723_v31 = vld [vmem:[#allocation2 + $0x10] ss:$48 sps:$4 sm:$0xff]  }
 0x12c   :  { %4524 = vmatpush2.bf16.msra.mxu1 %v9639_v30  ;;  %4550 = vmatprep.subr.bf16.mxu0 %v9650_v33  ;;  %v9728_v30 = vld [vmem:[#allocation2 + $0x614] ss:$48 sps:$4 sm:$0xff]  }
 0x12d   :  { %4525 = vmatprep.subr.bf16.mxu1 %v9647_v32  ;;  %v9726_v32 = vld [vmem:[#allocation2 + $0x610] ss:$48 sps:$4 sm:$0xff]  }
 0x12e   :  { %v810_v33 = vld [vmem:[#allocation4] sm:$0xff] }
 0x12f   :  { %4551 = vmatpush1.bf16.msra.mxu0 %v9648_v36  ;;  %v9731_v36 = vld [vmem:[#allocation2 + $0x5b4] ss:$48 sps:$4 sm:$0xff]  }
 0x130   :  { %4526 = vmatpush2.bf16.msra.mxu1 %v9645_v34  ;;  %4552 = vmatprep.subr.bf16.mxu0 %v9656_v38  ;;  %v11092_v34 = vsub.s32 0, %v11089_v28  ;;  %v11095_v38 = vsub.s32 1, %v11089_v28 }
 0x131   :  { %4527 = vmatprep.subr.bf16.mxu1 %v9653_v37  ;;  %v9734_v37 = vld [vmem:[#allocation2 + $0xbb4] ss:$48 sps:$4 sm:$0xff]  }
 0x133   :  { %4553 = vmatpush1.bf16.msra.mxu0 %v9654_v40  ;;  %v9729_v40 = vld [vmem:[#allocation2 + $0x5b0] ss:$48 sps:$4 sm:$0xff]  }
 0x134   :  { %4528 = vmatpush2.bf16.msra.mxu1 %v9651_v39  ;;  %4554 = vmatprep.subr.bf16.mxu0 %v9662_v42  ;;  %v817_v39 = vrot.slane %v810_v33, %v11092_v34  ;;  %v9737_v42 = vld [vmem:[#allocation2 + $0x554] ss:$48 sps:$4 sm:$0xff]  }
 0x135   :  { %4529 = vmatprep.subr.bf16.mxu1 %v9659_v41  ;;  %v9732_v41 = vld [vmem:[#allocation2 + $0xbb0] ss:$48 sps:$4 sm:$0xff]  }
 0x137   :  { %4555 = vmatpush1.bf16.msra.mxu0 %v9660_v45  ;;  %v821_v45 = vrot.slane %v810_v33, %v11095_v38  ;;  %v9786_v33 = vld [vmem:[#allocation2 + $0x1450] ss:$48 sps:$4 sm:$0xff]  }
 0x138   :  { %4530 = vmatpush2.bf16.msra.mxu1 %v9657_v43  ;;  %4556 = vmatprep.subr.bf16.mxu0 %v9668_v48  ;;  %v9740_v43 = vld [vmem:[#allocation2 + $0xb54] ss:$48 sps:$4 sm:$0xff]  }
 0x139   :  { %4531 = vmatprep.subr.bf16.mxu1 %v9665_v46 }
 0x13b   :  { %4557 = vmatpush1.bf16.msra.mxu0 %v9666_v50 }
 0x13c   :  { %4532 = vmatpush2.bf16.msra.mxu1 %v9663_v49  ;;  %4558 = vmatprep.subr.bf16.mxu0 %v9674_v53  ;;  %v9735_v49 = vld [vmem:[#allocation2 + $0x550] ss:$48 sps:$4 sm:$0xff]   ;;  %v9743_v53 = vld [vmem:[#allocation2 + $0x4f4] ss:$48 sps:$4 sm:$0xff]  }
 0x13d   :  { %4533 = vmatprep.subr.bf16.mxu1 %v9671_v52  ;;  %v9738_v52 = vld [vmem:[#allocation2 + $0xb50] ss:$48 sps:$4 sm:$0xff]  }
 0x13f   :  { %4559 = vmatpush1.bf16.msra.mxu0 %v9672_v55 }
 0x140   :  { %4534 = vmatpush2.bf16.msra.mxu1 %v9669_v54  ;;  %4560 = vmatprep.subr.bf16.mxu0 %v9680_v57 }
 0x141   :  { %4535 = vmatprep.subr.bf16.mxu1 %v9677_v56  ;;  %v9746_v56 = vld [vmem:[#allocation2 + $0xaf4] ss:$48 sps:$4 sm:$0xff]  }
 0x143   :  { %4561 = vmatpush1.bf16.msra.mxu0 %v9678_v59  ;;  %v9741_v59 = vld [vmem:[#allocation2 + $0x4f0] ss:$48 sps:$4 sm:$0xff]  }
 0x144   :  { %4536 = vmatpush2.bf16.msra.mxu1 %v9675_v58  ;;  %4587 = vmatprep.subr.bf16.mxu0 %v9683_v60 }
 0x145   :  { %4628 = vmatprep.subr.bf16.mxu1 %v9686_v61 }
 0x146   :  { %4579 = vmatmul.mubr.bf16.vlgmr.msra.gmra.mxu0 %v11071_v44  ;;  %v9704_v44 = vld [vmem:[#allocation2 + $0x794] ss:$48 sps:$4 sm:$0xff]  }
 0x147   :  { %4538 = vmatmul.mubr.bf16.vlgmr.msra.gmra.mxu1 %v11077_v17  ;;  %4588 = vmatpush1.bf16.msra.mxu0 %v9681_v62  ;;  %v9744_v62 = vld [vmem:[#allocation2 + $0xaf0] ss:$48 sps:$4 sm:$0xff]  }
 0x148   :  { %4629 = vmatpush1.bf16.msra.mxu1 %v9684_v63  ;;  %4589 = vmatprep.subr.bf16.mxu0 %v9689_v0 }
 0x149   :  { %4630 = vmatprep.subr.bf16.mxu1 %v9692_v1  ;;  %4619 = vmatprep.mubr.bf16.mxu0 %v11042_v47 }
 0x14a   :  { %4660 = vmatprep.mubr.bf16.mxu1 %v11047_v51 }
 0x14b   :  { %4590 = vmatpush1.bf16.msra.mxu0 %v9687_v2  ;;  %v9749_v2 = vld [vmem:[#allocation2 + $0x494] ss:$48 sps:$4 sm:$0xff]  }
 0x14c   :  { %4631 = vmatpush1.bf16.msra.mxu1 %v9690_v3  ;;  %4591 = vmatprep.subr.bf16.mxu0 %v9695_v4  ;;  %v9752_v3 = vld [vmem:[#allocation2 + $0xa94] ss:$48 sps:$4 sm:$0xff]   ;;  %v9747_v4 = vld [vmem:[#allocation2 + $0x490] ss:$48 sps:$4 sm:$0xff]  }
 0x14d   :  { %4632 = vmatprep.subr.bf16.mxu1 %v9698_v5  ;;  %v9750_v5 = vld [vmem:[#allocation2 + $0xa90] ss:$48 sps:$4 sm:$0xff]  }
 0x14f   :  { %4592 = vmatpush1.bf16.msra.mxu0 %v9693_v8  ;;  %v9755_v8 = vld [vmem:[#allocation2 + $0x434] ss:$48 sps:$4 sm:$0xff]  }
 0x150   :  { %4633 = vmatpush1.bf16.msra.mxu1 %v9696_v9  ;;  %4593 = vmatprep.subr.bf16.mxu0 %v9701_v10  ;;  %v9758_v9 = vld [vmem:[#allocation2 + $0xa34] ss:$48 sps:$4 sm:$0xff]   ;;  %v9753_v10 = vld [vmem:[#allocation2 + $0x430] ss:$48 sps:$4 sm:$0xff]  }
 0x151   :  { %4634 = vmatprep.subr.bf16.mxu1 %v9704_v44  ;;  %v9756_v44 = vld [vmem:[#allocation2 + $0xa30] ss:$48 sps:$4 sm:$0xff]  }
 0x153   :  { %4594 = vmatpush1.bf16.msra.mxu0 %v9699_v11  ;;  %v9761_v11 = vld [vmem:[#allocation2 + $0x3d4] ss:$48 sps:$4 sm:$0xff]  }
 0x154   :  { %4635 = vmatpush1.bf16.msra.mxu1 %v9702_v12  ;;  %4595 = vmatprep.subr.bf16.mxu0 %v9707_v13  ;;  %v9764_v12 = vld [vmem:[#allocation2 + $0x9d4] ss:$48 sps:$4 sm:$0xff]   ;;  %v9759_v13 = vld [vmem:[#allocation2 + $0x3d0] ss:$48 sps:$4 sm:$0xff]  }
 0x155   :  { %4636 = vmatprep.subr.bf16.mxu1 %v9710_v14  ;;  %v9762_v14 = vld [vmem:[#allocation2 + $0x9d0] ss:$48 sps:$4 sm:$0xff]  }
 0x157   :  { %4596 = vmatpush1.bf16.msra.mxu0 %v9705_v15  ;;  %v9767_v15 = vld [vmem:[#allocation2 + $0x374] ss:$48 sps:$4 sm:$0xff]  }
 0x158   :  { %4637 = vmatpush1.bf16.msra.mxu1 %v9708_v18  ;;  %4597 = vmatprep.subr.bf16.mxu0 %v9713_v19  ;;  %v9770_v18 = vld [vmem:[#allocation2 + $0x974] ss:$48 sps:$4 sm:$0xff]   ;;  %v9765_v19 = vld [vmem:[#allocation2 + $0x370] ss:$48 sps:$4 sm:$0xff]  }
 0x159   :  { %4638 = vmatprep.subr.bf16.mxu1 %v9716_v20  ;;  %v9768_v20 = vld [vmem:[#allocation2 + $0x970] ss:$48 sps:$4 sm:$0xff]  }
 0x15b   :  { %4598 = vmatpush1.bf16.msra.mxu0 %v9711_v21  ;;  %v9773_v21 = vld [vmem:[#allocation2 + $0x314] ss:$48 sps:$4 sm:$0xff]  }
 0x15c   :  { %4639 = vmatpush1.bf16.msra.mxu1 %v9714_v22  ;;  %4599 = vmatprep.subr.bf16.mxu0 %v9719_v24  ;;  %v9776_v22 = vld [vmem:[#allocation2 + $0x914] ss:$48 sps:$4 sm:$0xff]   ;;  %v9774_v24 = vld [vmem:[#allocation2 + $0x910] ss:$48 sps:$4 sm:$0xff]  }
 0x15d   :  { %4640 = vmatprep.subr.bf16.mxu1 %v9722_v25  ;;  %v9779_v25 = vld [vmem:[#allocation2 + $0xeb4] ss:$48 sps:$4 sm:$0xff]  }
 0x15f   :  { %4600 = vmatpush1.bf16.msra.mxu0 %v9717_v26  ;;  %v9782_v26 = vld [vmem:[#allocation2 + $0x14b4] ss:$48 sps:$4 sm:$0xff]  }
 0x160   :  { %4641 = vmatpush1.bf16.msra.mxu1 %v9720_v27  ;;  %4601 = vmatprep.subr.bf16.mxu0 %v9725_v29  ;;  %v9777_v27 = vld [vmem:[#allocation2 + $0xeb0] ss:$48 sps:$4 sm:$0xff]  }
 0x161   :  { %4642 = vmatprep.subr.bf16.mxu1 %v9728_v30  ;;  %v9780_v29 = vld [vmem:[#allocation2 + $0x14b0] ss:$48 sps:$4 sm:$0xff]   ;;  %v9785_v30 = vld [vmem:[#allocation2 + $0xe54] ss:$48 sps:$4 sm:$0xff]  }
 0x163   :  { %4602 = vmatpush1.bf16.msra.mxu0 %v9723_v31  ;;  %v9788_v31 = vld [vmem:[#allocation2 + $0x1454] ss:$48 sps:$4 sm:$0xff]  }
 0x164   :  { %4643 = vmatpush1.bf16.msra.mxu1 %v9726_v32  ;;  %4603 = vmatprep.subr.bf16.mxu0 %v9731_v36  ;;  %v9783_v32 = vld [vmem:[#allocation2 + $0xe50] ss:$48 sps:$4 sm:$0xff]  }
 0x165   :  { %4644 = vmatprep.subr.bf16.mxu1 %v9734_v37 }
 0x166   :  { %v4293_v46 = vpop.f32.mrf.mxu0 }
 0x167   :  { %v4334_v48 = vpop.f32.mrf.mxu1  ;;  %v4294_v50 = vadd.f32 %v4293_v46, %v817_v39  ;;  %4604 = vmatpush2.bf16.msra.mxu0 %v9729_v40  ;;  %v9791_v39 = vld [vmem:[#allocation2 + $0xdf4] ss:$48 sps:$4 sm:$0xff]  }
 0x168   :  { %4645 = vmatpush2.bf16.msra.mxu1 %v9732_v41  ;;  %v4295_v54 = vpop.f32.mrf.mxu0  ;;  %4605 = vmatprep.subr.bf16.mxu0 %v9737_v42  ;;  %v9794_v40 = vld [vmem:[#allocation2 + $0x13f4] ss:$48 sps:$4 sm:$0xff]   ;;  %v9789_v41 = vld [vmem:[#allocation2 + $0xdf0] ss:$48 sps:$4 sm:$0xff]  }
 0x169   :  { %v4336_v55 = vpop.f32.mrf.mxu1  ;;  %4646 = vmatprep.subr.bf16.mxu1 %v9740_v43  ;;  %v11099_v57 = vadd.f32 %v4334_v48, %v4294_v50  ;;  %v4296_v58 = vadd.f32 %v4295_v54, %v821_v45  ;;  %v9792_v42 = vld [vmem:[#allocation2 + $0x13f0] ss:$48 sps:$4 sm:$0xff]   ;;  %v9797_v46 = vld [vmem:[#allocation2 + $0xd94] ss:$48 sps:$4 sm:$0xff]  }
 0x16a   :  { %v4297_v60 = vpop.f32.mrf.mxu0  ;;  %v9800_v48 = vld [vmem:[#allocation2 + $0x1394] ss:$48 sps:$4 sm:$0xff]   ;;  %v9798_v50 = vld [vmem:[#allocation2 + $0x1390] ss:$48 sps:$4 sm:$0xff]  }
 0x16b   :  { %v4338_v61 = vpop.f32.mrf.mxu1  ;;  %v11101_v63 = vadd.f32 %v4336_v55, %v4296_v58  ;;  %4606 = vmatpush2.bf16.msra.mxu0 %v9735_v49  ;;  %v9795_v49 = vld [vmem:[#allocation2 + $0xd90] ss:$48 sps:$4 sm:$0xff]   ;;  %v9812_v58 = vld [vmem:[#allocation2 + $0x12d4] ss:$48 sps:$4 sm:$0xff]  }
 0x16c   :  { %4647 = vmatpush2.bf16.msra.mxu1 %v9738_v52  ;;  %v4298_v0 = vpop.f32.mrf.mxu0  ;;  %4607 = vmatprep.subr.bf16.mxu0 %v9743_v53  ;;  %v9803_v52 = vld [vmem:[#allocation2 + $0xd34] ss:$48 sps:$4 sm:$0xff]   ;;  %v9801_v54 = vld [vmem:[#allocation2 + $0xd30] ss:$48 sps:$4 sm:$0xff]  }
 0x16d   :  { %v4339_v1 = vpop.f32.mrf.mxu1  ;;  %4648 = vmatprep.subr.bf16.mxu1 %v9746_v56  ;;  %v9806_v53 = vld [vmem:[#allocation2 + $0x1334] ss:$48 sps:$4 sm:$0xff]   ;;  %v9804_v55 = vld [vmem:[#allocation2 + $0x1330] ss:$48 sps:$4 sm:$0xff]  }
 0x16e   :  { %v9809_v56 = vld [vmem:[#allocation2 + $0xcd4] ss:$48 sps:$4 sm:$0xff]   ;;  %v9810_v60 = vld [vmem:[#allocation2 + $0x12d0] ss:$48 sps:$4 sm:$0xff]  }
 0x16f   :  { %4608 = vmatpush2.bf16.msra.mxu0 %v9741_v59  ;;  %v9807_v59 = vld [vmem:[#allocation2 + $0xcd0] ss:$48 sps:$4 sm:$0xff]   ;;  %v9815_v61 = vld [vmem:[#allocation2 + $0xc74] ss:$48 sps:$4 sm:$0xff]  }
 0x170   :  { %4649 = vmatpush2.bf16.msra.mxu1 %v9744_v62  ;;  %4609 = vmatprep.subr.bf16.mxu0 %v9749_v2  ;;  %v9818_v62 = vld [vmem:[#allocation2 + $0x1274] ss:$48 sps:$4 sm:$0xff]   ;;  %v9813_v0 = vld [vmem:[#allocation2 + $0xc70] ss:$48 sps:$4 sm:$0xff]  }
 0x171   :  { %4650 = vmatprep.subr.bf16.mxu1 %v9752_v3  ;;  %v9816_v1 = vld [vmem:[#allocation2 + $0x1270] ss:$48 sps:$4 sm:$0xff]   ;;  %v9821_v2 = vld [vmem:[#allocation2 + $0xc14] ss:$48 sps:$4 sm:$0xff]  }
 0x172   :  { %v9824_v3 = vld [vmem:[#allocation2 + $0x1214] ss:$48 sps:$4 sm:$0xff]  }
 0x173   :  { %4610 = vmatpush2.bf16.msra.mxu0 %v9747_v4  ;;  %v9819_v4 = vld [vmem:[#allocation2 + $0xc10] ss:$48 sps:$4 sm:$0xff]  }
 0x174   :  { %4651 = vmatpush2.bf16.msra.mxu1 %v9750_v5  ;;  %4611 = vmatprep.subr.bf16.mxu0 %v9755_v8  ;;  %v9822_v5 = vld [vmem:[#allocation2 + $0x1210] ss:$48 sps:$4 sm:$0xff]   ;;  %v9827_v8 = vld [vmem:[#allocation2 + $0x11b4] ss:$48 sps:$4 sm:$0xff]  }
 0x175   :  { %4652 = vmatprep.subr.bf16.mxu1 %v9758_v9  ;;  %v9830_v9 = vld [vmem:[#allocation2 + $0x2bc] ss:$48 sps:$4 sm:$0xff]  }
 0x177   :  { %4612 = vmatpush2.bf16.msra.mxu0 %v9753_v10  ;;  %v9825_v10 = vld [vmem:[#allocation2 + $0x11b0] ss:$48 sps:$4 sm:$0xff]  }
 0x178   :  { %4653 = vmatpush2.bf16.msra.mxu1 %v9756_v44  ;;  %4613 = vmatprep.subr.bf16.mxu0 %v9761_v11  ;;  %v9828_v44 = vld [vmem:[#allocation2 + $0x2b8] ss:$48 sps:$4 sm:$0xff]   ;;  %v9833_v11 = vld [vmem:[#allocation2 + $0x1154] ss:$48 sps:$4 sm:$0xff]  }
 0x179   :  { %4654 = vmatprep.subr.bf16.mxu1 %v9764_v12  ;;  %v9836_v12 = vld [vmem:[#allocation2 + $0x25c] ss:$48 sps:$4 sm:$0xff]  }
 0x17b   :  { %4614 = vmatpush2.bf16.msra.mxu0 %v9759_v13 }
 0x17c   :  { %4655 = vmatpush2.bf16.msra.mxu1 %v9762_v14  ;;  %4615 = vmatprep.subr.bf16.mxu0 %v9767_v15  ;;  %v10773_v14 = vld [vmem:[%s11350_s0 + $0x18] ss:$0 sps:$4 sm:$0xff]  }
 0x17d   :  { %4656 = vmatprep.subr.bf16.mxu1 %v9770_v18  ;;  %v9831_v18 = vld [vmem:[#allocation2 + $0x1150] ss:$48 sps:$4 sm:$0xff]  }
 0x17f   :  { %4616 = vmatpush2.bf16.msra.mxu0 %v9765_v19  ;;  %v9834_v19 = vld [vmem:[#allocation2 + $0x258] ss:$48 sps:$4 sm:$0xff]  }
 0x180   :  { %4657 = vmatpush2.bf16.msra.mxu1 %v9768_v20  ;;  %4617 = vmatprep.subr.bf16.mxu0 %v9773_v21  ;;  %v9839_v21 = vld [vmem:[#allocation2 + $0x10f4] ss:$48 sps:$4 sm:$0xff]  }
 0x181   :  { %4658 = vmatprep.subr.bf16.mxu1 %v9776_v22  ;;  %v9842_v22 = vld [vmem:[#allocation2 + $0x1fc] ss:$48 sps:$4 sm:$0xff]  }
 0x183   :  { %4618 = vmatpush2.bf16.msra.mxu0 %v9771_v23 }
 0x184   :  { %4659 = vmatpush2.bf16.msra.mxu1 %v9774_v24  ;;  %4669 = vmatprep.subr.bf16.mxu0 %v9779_v25 }
 0x185   :  { %4710 = vmatprep.subr.bf16.mxu1 %v9782_v26 }
 0x186   :  { %4620 = vmatmul.mubr.bf16.vlgmr.msra.gmra.mxu0 %v11051_v6 }
 0x187   :  { %v11103_v36 = vpop.f32.mrf.mxu1  ;;  %4661 = vmatmul.mubr.bf16.vlgmr.msra.gmra.mxu1 %v11053_v7  ;;  %4670 = vmatpush1.bf16.msra.mxu0 %v9777_v27  ;;  %v9840_v27 = vld [vmem:[#allocation2 + $0x1f8] ss:$48 sps:$4 sm:$0xff]  }
 0x188   :  { %4711 = vmatpush1.bf16.msra.mxu1 %v9780_v29  ;;  %4671 = vmatprep.subr.bf16.mxu0 %v9785_v30  ;;  %v9845_v30 = vld [vmem:[#allocation2 + $0x1094] ss:$48 sps:$4 sm:$0xff]  }
 0x189   :  { %v11107_v37 = vpop.f32.mrf.mxu1  ;;  %4712 = vmatprep.subr.bf16.mxu1 %v9788_v31  ;;  %4742 = vmatprep.mubr.bf16.mxu1 %v10962_v16  ;;  %v9848_v31 = vld [vmem:[#allocation2 + $0x19c] ss:$48 sps:$4 sm:$0xff]  }
 0x18a   :  { %4701 = vmatprep.mubr.bf16.mxu0 %v11065_v35 }
 0x18b   :  { %v4420_v43 = vpop.f32.mrf.mxu1  ;;  %4672 = vmatpush1.bf16.msra.mxu0 %v9783_v32  ;;  %v9843_v32 = vld [vmem:[#allocation2 + $0x1090] ss:$48 sps:$4 sm:$0xff]  }
 0x18c   :  { %4713 = vmatpush1.bf16.msra.mxu1 %v9786_v33  ;;  %4673 = vmatprep.subr.bf16.mxu0 %v9791_v39  ;;  %v9846_v33 = vld [vmem:[#allocation2 + $0x198] ss:$48 sps:$4 sm:$0xff]  }
 0x18d   :  { %v4421_v45 = vpop.f32.mrf.mxu1  ;;  %4714 = vmatprep.subr.bf16.mxu1 %v9794_v40  ;;  %v9852_v39 = vld [vmem:[#allocation2 + $0x138] ss:$48 sps:$4 sm:$0xff]   ;;  %v9857_v40 = vld [vmem:[#allocation2 + $0xfd4] ss:$48 sps:$4 sm:$0xff]  }
 0x18e   :  { %v9858_v43 = vld [vmem:[#allocation2 + $0xd8] ss:$48 sps:$4 sm:$0xff]   ;;  %v9863_v45 = vld [vmem:[#allocation2 + $0xf74] ss:$48 sps:$4 sm:$0xff]  }
 0x18f   :  { %4674 = vmatpush1.bf16.msra.mxu0 %v9789_v41  ;;  %v9860_v41 = vld [vmem:[#allocation2 + $0xdc] ss:$48 sps:$4 sm:$0xff]  }
 0x190   :  { %4715 = vmatpush1.bf16.msra.mxu1 %v9792_v42  ;;  %4675 = vmatprep.subr.bf16.mxu0 %v9797_v46  ;;  %v9855_v42 = vld [vmem:[#allocation2 + $0xfd0] ss:$48 sps:$4 sm:$0xff]   ;;  %v9866_v46 = vld [vmem:[#allocation2 + $0x7c] ss:$48 sps:$4 sm:$0xff]  }
 0x191   :  { %4716 = vmatprep.subr.bf16.mxu1 %v9800_v48  ;;  %v9861_v48 = vld [vmem:[#allocation2 + $0xf70] ss:$48 sps:$4 sm:$0xff]  }
 0x193   :  { %4676 = vmatpush1.bf16.msra.mxu0 %v9795_v49  ;;  %v9864_v49 = vld [vmem:[#allocation2 + $0x78] ss:$48 sps:$4 sm:$0xff]  }
 0x194   :  { %4717 = vmatpush1.bf16.msra.mxu1 %v9798_v50  ;;  %4677 = vmatprep.subr.bf16.mxu0 %v9803_v52  ;;  %v9869_v50 = vld [vmem:[#allocation2 + $0xf14] ss:$48 sps:$4 sm:$0xff]   ;;  %v9872_v52 = vld [vmem:[#allocation2 + $0x1c] ss:$48 sps:$4 sm:$0xff]  }
 0x195   :  { %4718 = vmatprep.subr.bf16.mxu1 %v9806_v53  ;;  %v9867_v53 = vld [vmem:[#allocation2 + $0xf10] ss:$48 sps:$4 sm:$0xff]  }
 0x197   :  { %4678 = vmatpush1.bf16.msra.mxu0 %v9801_v54  ;;  %v9870_v54 = vld [vmem:[#allocation2 + $0x18] ss:$48 sps:$4 sm:$0xff]  }
 0x198   :  { %4719 = vmatpush1.bf16.msra.mxu1 %v9804_v55  ;;  %4679 = vmatprep.subr.bf16.mxu0 %v9809_v56  ;;  %v9875_v55 = vld [vmem:[#allocation2 + $0x5bc] ss:$48 sps:$4 sm:$0xff]  }
 0x199   :  { %4720 = vmatprep.subr.bf16.mxu1 %v9812_v58  ;;  %v9878_v56 = vld [vmem:[#allocation2 + $0x8bc] ss:$48 sps:$4 sm:$0xff]   ;;  %v9873_v58 = vld [vmem:[#allocation2 + $0x5b8] ss:$48 sps:$4 sm:$0xff]  }
 0x19b   :  { %4680 = vmatpush1.bf16.msra.mxu0 %v9807_v59  ;;  %v9876_v59 = vld [vmem:[#allocation2 + $0x8b8] ss:$48 sps:$4 sm:$0xff]  }
 0x19c   :  { %4721 = vmatpush1.bf16.msra.mxu1 %v9810_v60  ;;  %4681 = vmatprep.subr.bf16.mxu0 %v9815_v61  ;;  %v9881_v60 = vld [vmem:[#allocation2 + $0x55c] ss:$48 sps:$4 sm:$0xff]  }
 0x19d   :  { %4722 = vmatprep.subr.bf16.mxu1 %v9818_v62  ;;  %v9884_v61 = vld [vmem:[#allocation2 + $0x85c] ss:$48 sps:$4 sm:$0xff]   ;;  %v9879_v62 = vld [vmem:[#allocation2 + $0x558] ss:$48 sps:$4 sm:$0xff]  }
 0x19f   :  { %4682 = vmatpush1.bf16.msra.mxu0 %v9813_v0  ;;  %v9882_v0 = vld [vmem:[#allocation2 + $0x858] ss:$48 sps:$4 sm:$0xff]  }
 0x1a0   :  { %4723 = vmatpush1.bf16.msra.mxu1 %v9816_v1  ;;  %4683 = vmatprep.subr.bf16.mxu0 %v9821_v2 }
 0x1a1   :  { %4724 = vmatprep.subr.bf16.mxu1 %v9824_v3  ;;  %v9887_v3 = vld [vmem:[#allocation2 + $0x4fc] ss:$48 sps:$4 sm:$0xff]  }
 0x1a3   :  { %4684 = vmatpush1.bf16.msra.mxu0 %v9819_v4  ;;  %v9890_v4 = vld [vmem:[#allocation2 + $0x7fc] ss:$48 sps:$4 sm:$0xff]  }
 0x1a4   :  { %4725 = vmatpush1.bf16.msra.mxu1 %v9822_v5  ;;  %4685 = vmatprep.subr.bf16.mxu0 %v9827_v8  ;;  %v9885_v5 = vld [vmem:[#allocation2 + $0x4f8] ss:$48 sps:$4 sm:$0xff]  }
 0x1a5   :  { %4751 = vmatprep.subr.bf16.mxu1 %v9830_v9  ;;  %v9888_v8 = vld [vmem:[#allocation2 + $0x7f8] ss:$48 sps:$4 sm:$0xff]  }
 0x1a6   :  { %v4375_v13 = vpop.f32.mrf.mxu0 }
 0x1a7   :  { %4743 = vmatmul.mubr.bf16.vlgmr.msra.gmra.mxu1 %v10773_v14  ;;  %v4376_v15 = vadd.f32 %v4375_v13, %v11099_v57  ;;  %4686 = vmatpush2.bf16.msra.mxu0 %v9825_v10  ;;  %v9837_v57 = vld [vmem:[#allocation2 + $0x10f0] ss:$48 sps:$4 sm:$0xff]   ;;  %v9894_v13 = vld [vmem:[#allocation2 + $0x798] ss:$48 sps:$4 sm:$0xff]   ;;  %v9899_v14 = vld [vmem:[#allocation2 + $0x43c] ss:$48 sps:$4 sm:$0xff]  }
 0x1a8   :  { %4752 = vmatpush1.bf16.msra.mxu1 %v9828_v44  ;;  %v4377_v20 = vpop.f32.mrf.mxu0  ;;  %4687 = vmatprep.subr.bf16.mxu0 %v9833_v11  ;;  %v9893_v44 = vld [vmem:[#allocation2 + $0x49c] ss:$48 sps:$4 sm:$0xff]  }
 0x1a9   :  { %4753 = vmatprep.subr.bf16.mxu1 %v9836_v12  ;;  %v11116_v23 = vadd.f32 %v11103_v36, %v4376_v15  ;;  %v4378_v24 = vadd.f32 %v4377_v20, %v11101_v63  ;;  %4783 = vmatprep.mubr.bf16.mxu1 %v11042_v47  ;;  %v9851_v63 = vld [vmem:[#allocation2 + $0x1034] ss:$48 sps:$4 sm:$0xff]   ;;  %v9854_v36 = vld [vmem:[#allocation2 + $0x13c] ss:$48 sps:$4 sm:$0xff]   ;;  %v9891_v12 = vld [vmem:[#allocation2 + $0x498] ss:$48 sps:$4 sm:$0xff]  }
 0x1aa   :  { %v4379_v25 = vpop.f32.mrf.mxu0  ;;  %v9896_v11 = vld [vmem:[#allocation2 + $0x79c] ss:$48 sps:$4 sm:$0xff]  }
 0x1ab   :  { %v11121_v26 = vadd.f32 %v11107_v37, %v4378_v24  ;;  %4688 = vmatpush2.bf16.msra.mxu0 %v9831_v18  ;;  %v9849_v37 = vld [vmem:[#allocation2 + $0x1030] ss:$48 sps:$4 sm:$0xff]   ;;  %v9902_v15 = vld [vmem:[#allocation2 + $0x73c] ss:$48 sps:$4 sm:$0xff]   ;;  %v9897_v18 = vld [vmem:[#allocation2 + $0x438] ss:$48 sps:$4 sm:$0xff]  }
 0x1ac   :  { %4754 = vmatpush1.bf16.msra.mxu1 %v9834_v19  ;;  %v4380_v29 = vpop.f32.mrf.mxu0  ;;  %4689 = vmatprep.subr.bf16.mxu0 %v9839_v21  ;;  %v9900_v19 = vld [vmem:[#allocation2 + $0x738] ss:$48 sps:$4 sm:$0xff]   ;;  %v9905_v20 = vld [vmem:[#allocation2 + $0x3dc] ss:$48 sps:$4 sm:$0xff]  }
 0x1ad   :  { %4755 = vmatprep.subr.bf16.mxu1 %v9842_v22  ;;  %v9908_v21 = vld [vmem:[#allocation2 + $0x6dc] ss:$48 sps:$4 sm:$0xff]   ;;  %v9903_v22 = vld [vmem:[#allocation2 + $0x3d8] ss:$48 sps:$4 sm:$0xff]  }
 0x1ae   :  { %v9906_v24 = vld [vmem:[#allocation2 + $0x6d8] ss:$48 sps:$4 sm:$0xff]   ;;  %v9911_v25 = vld [vmem:[#allocation2 + $0x37c] ss:$48 sps:$4 sm:$0xff]  }
 0x1af   :  { %4690 = vmatpush2.bf16.msra.mxu0 %v9837_v57  ;;  %v9914_v57 = vld [vmem:[#allocation2 + $0x67c] ss:$48 sps:$4 sm:$0xff]   ;;  %v9912_v29 = vld [vmem:[#allocation2 + $0x678] ss:$48 sps:$4 sm:$0xff]  }
 0x1b0   :  { %4756 = vmatpush1.bf16.msra.mxu1 %v9840_v27  ;;  %4691 = vmatprep.subr.bf16.mxu0 %v9845_v30  ;;  %v9909_v27 = vld [vmem:[#allocation2 + $0x378] ss:$48 sps:$4 sm:$0xff]   ;;  %v9917_v30 = vld [vmem:[#allocation2 + $0x31c] ss:$48 sps:$4 sm:$0xff]  }
 0x1b1   :  { %4757 = vmatprep.subr.bf16.mxu1 %v9848_v31  ;;  %v9920_v31 = vld [vmem:[#allocation2 + $0x61c] ss:$48 sps:$4 sm:$0xff]  }
 0x1b3   :  { %4692 = vmatpush2.bf16.msra.mxu0 %v9843_v32  ;;  %v11130_v32 = vsub.s32 2, %v11089_v28 }
 0x1b4   :  { %4758 = vmatpush1.bf16.msra.mxu1 %v9846_v33  ;;  %4693 = vmatprep.subr.bf16.mxu0 %v9851_v63  ;;  %v828_v33 = vsub.s32 3, %v11089_v28  ;;  %v9915_v63 = vld [vmem:[#allocation2 + $0x318] ss:$48 sps:$4 sm:$0xff]  }
 0x1b5   :  { %4759 = vmatprep.subr.bf16.mxu1 %v9854_v36  ;;  %v9918_v36 = vld [vmem:[#allocation2 + $0x618] ss:$48 sps:$4 sm:$0xff]  }
 0x1b7   :  { %4694 = vmatpush2.bf16.msra.mxu0 %v9849_v37  ;;  %v9923_v37 = vld [vmem:[#allocation2 + $0xbbc] ss:$48 sps:$4 sm:$0xff]  }
 0x1b8   :  { %4760 = vmatpush1.bf16.msra.mxu1 %v9852_v39  ;;  %4695 = vmatprep.subr.bf16.mxu0 %v9857_v40  ;;  %v9926_v39 = vld [vmem:[#allocation2 + $0xebc] ss:$48 sps:$4 sm:$0xff]   ;;  %v11133_v40 = vld [vmem:[#allocation4] sm:$0xff] }
 0x1b9   :  { %4761 = vmatprep.subr.bf16.mxu1 %v9860_v41  ;;  %v825_v41 = vrot.slane %v11133_v40, %v11130_v32 }
 0x1bb   :  { %4696 = vmatpush2.bf16.msra.mxu0 %v9855_v42  ;;  %v9921_v42 = vld [vmem:[#allocation2 + $0xbb8] ss:$48 sps:$4 sm:$0xff]  }
 0x1bc   :  { %4762 = vmatpush1.bf16.msra.mxu1 %v9858_v43  ;;  %4697 = vmatprep.subr.bf16.mxu0 %v9863_v45  ;;  %v9924_v43 = vld [vmem:[#allocation2 + $0xeb8] ss:$48 sps:$4 sm:$0xff]   ;;  %v829_v45 = vrot.slane %v11133_v40, %v828_v33 }
 0x1bd   :  { %4763 = vmatprep.subr.bf16.mxu1 %v9866_v46  ;;  %v9929_v46 = vld [vmem:[#allocation2 + $0xb5c] ss:$48 sps:$4 sm:$0xff]  }
 0x1bf   :  { %4698 = vmatpush2.bf16.msra.mxu0 %v9861_v48  ;;  %v9932_v48 = vld [vmem:[#allocation2 + $0xe5c] ss:$48 sps:$4 sm:$0xff]  }
 0x1c0   :  { %4764 = vmatpush1.bf16.msra.mxu1 %v9864_v49  ;;  %4699 = vmatprep.subr.bf16.mxu0 %v9869_v50  ;;  %v9927_v50 = vld [vmem:[#allocation2 + $0xb58] ss:$48 sps:$4 sm:$0xff]  }
 0x1c1   :  { %4765 = vmatprep.subr.bf16.mxu1 %v9872_v52  ;;  %v9930_v52 = vld [vmem:[#allocation2 + $0xe58] ss:$48 sps:$4 sm:$0xff]  }
 0x1c3   :  { %4700 = vmatpush2.bf16.msra.mxu0 %v9867_v53 }
 0x1c4   :  { %4766 = vmatpush1.bf16.msra.mxu1 %v9870_v54  ;;  %4792 = vmatprep.subr.bf16.mxu0 %v9878_v56 }
 0x1c5   :  { %4767 = vmatprep.subr.bf16.mxu1 %v9875_v55 }
 0x1c6   :  { %4702 = vmatmul.mubr.bf16.vlgmr.msra.gmra.mxu0 %v11077_v17 }
 0x1c7   :  { %v11123_v1 = vpop.f32.mrf.mxu1  ;;  %4793 = vmatpush1.bf16.msra.mxu0 %v9876_v59  ;;  %4824 = vmatprep.mubr.bf16.mxu0 %v11047_v51  ;;  %v9938_v59 = vld [vmem:[#allocation2 + $0xdfc] ss:$48 sps:$4 sm:$0xff]  }
 0x1c8   :  { %4768 = vmatpush2.bf16.msra.mxu1 %v9873_v58  ;;  %4794 = vmatprep.subr.bf16.mxu0 %v9884_v61  ;;  %v4458_v49 = vadd.f32 %v11123_v1, %v825_v41  ;;  %v9935_v58 = vld [vmem:[#allocation2 + $0xafc] ss:$48 sps:$4 sm:$0xff]   ;;  %v9933_v61 = vld [vmem:[#allocation2 + $0xaf8] ss:$48 sps:$4 sm:$0xff]  }
 0x1c9   :  { %v11126_v2 = vpop.f32.mrf.mxu1  ;;  %4769 = vmatprep.subr.bf16.mxu1 %v9881_v60 }
 0x1ca   :  { %v4460_v54 = vadd.f32 %v11126_v2, %v829_v45  ;;  %v9941_v2 = vld [vmem:[#allocation2 + $0xa9c] ss:$48 sps:$4 sm:$0xff]  }
 0x1cb   :  { %v4461_v9 = vpop.f32.mrf.mxu1  ;;  %4795 = vmatpush1.bf16.msra.mxu0 %v9882_v0 }
 0x1cc   :  { %4770 = vmatpush2.bf16.msra.mxu1 %v9879_v62  ;;  %4796 = vmatprep.subr.bf16.mxu0 %v9890_v4  ;;  %v9936_v62 = vld [vmem:[#allocation2 + $0xdf8] ss:$48 sps:$4 sm:$0xff]   ;;  %v9950_v9 = vld [vmem:[#allocation2 + $0xd3c] ss:$48 sps:$4 sm:$0xff]  }
 0x1cd   :  { %v4462_v10 = vpop.f32.mrf.mxu1  ;;  %4771 = vmatprep.subr.bf16.mxu1 %v9887_v3  ;;  %v9944_v3 = vld [vmem:[#allocation2 + $0xd9c] ss:$48 sps:$4 sm:$0xff]   ;;  %v9939_v4 = vld [vmem:[#allocation2 + $0xa98] ss:$48 sps:$4 sm:$0xff]  }
 0x1ce   :  { %v9945_v10 = vld [vmem:[#allocation2 + $0xa38] ss:$48 sps:$4 sm:$0xff]  }
 0x1cf   :  { %4797 = vmatpush1.bf16.msra.mxu0 %v9888_v8  ;;  %v9947_v8 = vld [vmem:[#allocation2 + $0xa3c] ss:$48 sps:$4 sm:$0xff]  }
 0x1d0   :  { %4772 = vmatpush2.bf16.msra.mxu1 %v9885_v5  ;;  %4798 = vmatprep.subr.bf16.mxu0 %v9896_v11  ;;  %v9942_v5 = vld [vmem:[#allocation2 + $0xd98] ss:$48 sps:$4 sm:$0xff]   ;;  %v9953_v11 = vld [vmem:[#allocation2 + $0x9dc] ss:$48 sps:$4 sm:$0xff]  }
 0x1d1   :  { %4773 = vmatprep.subr.bf16.mxu1 %v9893_v44  ;;  %v9948_v44 = vld [vmem:[#allocation2 + $0xd38] ss:$48 sps:$4 sm:$0xff]  }
 0x1d3   :  { %4799 = vmatpush1.bf16.msra.mxu0 %v9894_v13  ;;  %v9951_v13 = vld [vmem:[#allocation2 + $0x9d8] ss:$48 sps:$4 sm:$0xff]  }
 0x1d4   :  { %4774 = vmatpush2.bf16.msra.mxu1 %v9891_v12  ;;  %4800 = vmatprep.subr.bf16.mxu0 %v9902_v15  ;;  %v9956_v12 = vld [vmem:[#allocation2 + $0xcdc] ss:$48 sps:$4 sm:$0xff]  }
 0x1d5   :  { %4775 = vmatprep.subr.bf16.mxu1 %v9899_v14  ;;  %v9954_v14 = vld [vmem:[#allocation2 + $0xcd8] ss:$48 sps:$4 sm:$0xff]   ;;  %v9959_v15 = vld [vmem:[#allocation2 + $0x97c] ss:$48 sps:$4 sm:$0xff]  }
 0x1d7   :  { %4801 = vmatpush1.bf16.msra.mxu0 %v9900_v19  ;;  %v9957_v19 = vld [vmem:[#allocation2 + $0x978] ss:$48 sps:$4 sm:$0xff]  }
 0x1d8   :  { %4776 = vmatpush2.bf16.msra.mxu1 %v9897_v18  ;;  %4802 = vmatprep.subr.bf16.mxu0 %v9908_v21  ;;  %v9962_v18 = vld [vmem:[#allocation2 + $0xc7c] ss:$48 sps:$4 sm:$0xff]  }
 0x1d9   :  { %4777 = vmatprep.subr.bf16.mxu1 %v9905_v20  ;;  %v9960_v20 = vld [vmem:[#allocation2 + $0xc78] ss:$48 sps:$4 sm:$0xff]   ;;  %v9965_v21 = vld [vmem:[#allocation2 + $0x91c] ss:$48 sps:$4 sm:$0xff]  }
 0x1db   :  { %4803 = vmatpush1.bf16.msra.mxu0 %v9906_v24  ;;  %v9963_v24 = vld [vmem:[#allocation2 + $0x918] ss:$48 sps:$4 sm:$0xff]  }
 0x1dc   :  { %4778 = vmatpush2.bf16.msra.mxu1 %v9903_v22  ;;  %4804 = vmatprep.subr.bf16.mxu0 %v9914_v57  ;;  %v9968_v22 = vld [vmem:[#allocation2 + $0xc1c] ss:$48 sps:$4 sm:$0xff]  }
 0x1dd   :  { %4779 = vmatprep.subr.bf16.mxu1 %v9911_v25  ;;  %v9966_v25 = vld [vmem:[#allocation2 + $0xc18] ss:$48 sps:$4 sm:$0xff]   ;;  %v9971_v57 = vld [vmem:[#allocation2 + $0x11bc] ss:$48 sps:$4 sm:$0xff]  }
 0x1df   :  { %4805 = vmatpush1.bf16.msra.mxu0 %v9912_v29  ;;  %v9969_v29 = vld [vmem:[#allocation2 + $0x11b8] ss:$48 sps:$4 sm:$0xff]  }
 0x1e0   :  { %4780 = vmatpush2.bf16.msra.mxu1 %v9909_v27  ;;  %4806 = vmatprep.subr.bf16.mxu0 %v9920_v31  ;;  %v9974_v27 = vld [vmem:[#allocation2 + $0x14bc] ss:$48 sps:$4 sm:$0xff]  }
 0x1e1   :  { %4781 = vmatprep.subr.bf16.mxu1 %v9917_v30  ;;  %v9972_v30 = vld [vmem:[#allocation2 + $0x14b8] ss:$48 sps:$4 sm:$0xff]   ;;  %v9977_v31 = vld [vmem:[#allocation2 + $0x115c] ss:$48 sps:$4 sm:$0xff]  }
 0x1e3   :  { %4807 = vmatpush1.bf16.msra.mxu0 %v9918_v36  ;;  %v9975_v36 = vld [vmem:[#allocation2 + $0x1158] ss:$48 sps:$4 sm:$0xff]  }
 0x1e4   :  { %4782 = vmatpush2.bf16.msra.mxu1 %v9915_v63  ;;  %4808 = vmatprep.subr.bf16.mxu0 %v9923_v37  ;;  %v9980_v63 = vld [vmem:[#allocation2 + $0x145c] ss:$48 sps:$4 sm:$0xff]   ;;  %v9978_v37 = vld [vmem:[#allocation2 + $0x1458] ss:$48 sps:$4 sm:$0xff]  }
 0x1e5   :  { %4833 = vmatprep.subr.bf16.mxu1 %v9926_v39 }
 0x1e6   :  { %v4498_v53 = vpop.f32.mrf.mxu0 }
 0x1e7   :  { %4784 = vmatmul.mubr.bf16.vlgmr.msra.gmra.mxu1 %v11051_v6  ;;  %v11143_v55 = vadd.f32 %v4498_v53, %v4458_v49  ;;  %4809 = vmatpush2.bf16.msra.mxu0 %v9921_v42  ;;  %v9984_v53 = vld [vmem:[#allocation2 + $0x13f8] ss:$48 sps:$4 sm:$0xff]  }
 0x1e8   :  { %4834 = vmatpush1.bf16.msra.mxu1 %v9924_v43  ;;  %v4500_v56 = vpop.f32.mrf.mxu0  ;;  %4810 = vmatprep.subr.bf16.mxu0 %v9929_v46  ;;  %v9983_v46 = vld [vmem:[#allocation2 + $0x10fc] ss:$48 sps:$4 sm:$0xff]  }
 0x1e9   :  { %4835 = vmatprep.subr.bf16.mxu1 %v9932_v48  ;;  %v11145_v60 = vadd.f32 %v4500_v56, %v4460_v54  ;;  %4865 = vmatprep.mubr.bf16.mxu1 %v11065_v35  ;;  %v9986_v48 = vld [vmem:[#allocation2 + $0x13fc] ss:$48 sps:$4 sm:$0xff]  }
 0x1ea   :  { %v4502_v0 = vpop.f32.mrf.mxu0 }
 0x1eb   :  { %4811 = vmatpush2.bf16.msra.mxu0 %v9927_v50  ;;  %v9987_v0 = vld [vmem:[#allocation2 + $0x1098] ss:$48 sps:$4 sm:$0xff]  }
 0x1ec   :  { %4836 = vmatpush1.bf16.msra.mxu1 %v9930_v52  ;;  %v4503_v1 = vpop.f32.mrf.mxu0  ;;  %4812 = vmatprep.subr.bf16.mxu0 %v9935_v58  ;;  %v9981_v52 = vld [vmem:[#allocation2 + $0x10f8] ss:$48 sps:$4 sm:$0xff]  }
 0x1ed   :  { %4837 = vmatprep.subr.bf16.mxu1 %v9938_v59  ;;  %v9995_v1 = vld [vmem:[#allocation2 + $0x103c] ss:$48 sps:$4 sm:$0xff]  }
 0x1ef   :  { %4813 = vmatpush2.bf16.msra.mxu0 %v9933_v61  ;;  %v9989_v61 = vld [vmem:[#allocation2 + $0x109c] ss:$48 sps:$4 sm:$0xff]  }
 0x1f0   :  { %4838 = vmatpush1.bf16.msra.mxu1 %v9936_v62  ;;  %4814 = vmatprep.subr.bf16.mxu0 %v9941_v2  ;;  %v9992_v62 = vld [vmem:[#allocation2 + $0x139c] ss:$48 sps:$4 sm:$0xff]  }
 0x1f1   :  { %4839 = vmatprep.subr.bf16.mxu1 %v9944_v3  ;;  %v9998_v2 = vld [vmem:[#allocation2 + $0x133c] ss:$48 sps:$4 sm:$0xff]   ;;  %v9993_v3 = vld [vmem:[#allocation2 + $0x1038] ss:$48 sps:$4 sm:$0xff]  }
 0x1f3   :  { %4815 = vmatpush2.bf16.msra.mxu0 %v9939_v4  ;;  %v9996_v4 = vld [vmem:[#allocation2 + $0x1338] ss:$48 sps:$4 sm:$0xff]  }
 0x1f4   :  { %4840 = vmatpush1.bf16.msra.mxu1 %v9942_v5  ;;  %4816 = vmatprep.subr.bf16.mxu0 %v9947_v8  ;;  %v10001_v5 = vld [vmem:[#allocation2 + $0xfdc] ss:$48 sps:$4 sm:$0xff]  }
 0x1f5   :  { %4841 = vmatprep.subr.bf16.mxu1 %v9950_v9  ;;  %v10004_v8 = vld [vmem:[#allocation2 + $0x12dc] ss:$48 sps:$4 sm:$0xff]   ;;  %v9999_v9 = vld [vmem:[#allocation2 + $0xfd8] ss:$48 sps:$4 sm:$0xff]  }
 0x1f7   :  { %4817 = vmatpush2.bf16.msra.mxu0 %v9945_v10  ;;  %v10002_v10 = vld [vmem:[#allocation2 + $0x12d8] ss:$48 sps:$4 sm:$0xff]  }
 0x1f8   :  { %4842 = vmatpush1.bf16.msra.mxu1 %v9948_v44  ;;  %4818 = vmatprep.subr.bf16.mxu0 %v9953_v11  ;;  %v10007_v44 = vld [vmem:[#allocation2 + $0xf7c] ss:$48 sps:$4 sm:$0xff]  }
 0x1f9   :  { %4843 = vmatprep.subr.bf16.mxu1 %v9956_v12  ;;  %v10010_v11 = vld [vmem:[#allocation2 + $0x127c] ss:$48 sps:$4 sm:$0xff]   ;;  %v10005_v12 = vld [vmem:[#allocation2 + $0xf78] ss:$48 sps:$4 sm:$0xff]  }
 0x1fb   :  { %4819 = vmatpush2.bf16.msra.mxu0 %v9951_v13  ;;  %v10008_v13 = vld [vmem:[#allocation2 + $0x1278] ss:$48 sps:$4 sm:$0xff]  }
 0x1fc   :  { %4844 = vmatpush1.bf16.msra.mxu1 %v9954_v14  ;;  %4820 = vmatprep.subr.bf16.mxu0 %v9959_v15  ;;  %v10013_v14 = vld [vmem:[#allocation2 + $0xf1c] ss:$48 sps:$4 sm:$0xff]  }
 0x1fd   :  { %4845 = vmatprep.subr.bf16.mxu1 %v9962_v18  ;;  %v10016_v15 = vld [vmem:[#allocation2 + $0x121c] ss:$48 sps:$4 sm:$0xff]   ;;  %v10011_v18 = vld [vmem:[#allocation2 + $0xf18] ss:$48 sps:$4 sm:$0xff]  }
 0x1ff   :  { %4821 = vmatpush2.bf16.msra.mxu0 %v9957_v19  ;;  %v10014_v19 = vld [vmem:[#allocation2 + $0x1218] ss:$48 sps:$4 sm:$0xff]  }
 0x200   :  { %4846 = vmatpush1.bf16.msra.mxu1 %v9960_v20  ;;  %4822 = vmatprep.subr.bf16.mxu0 %v9965_v21  ;;  %v10019_v20 = vld [vmem:[#allocation2 + $0x2c4] ss:$48 sps:$4 sm:$0xff]  }
 0x201   :  { %4847 = vmatprep.subr.bf16.mxu1 %v9968_v22  ;;  %v10022_v21 = vld [vmem:[#allocation2 + $0x8c4] ss:$48 sps:$4 sm:$0xff]   ;;  %v10017_v22 = vld [vmem:[#allocation2 + $0x2c0] ss:$48 sps:$4 sm:$0xff]  }
 0x203   :  { %4823 = vmatpush2.bf16.msra.mxu0 %v9963_v24  ;;  %v10020_v24 = vld [vmem:[#allocation2 + $0x8c0] ss:$48 sps:$4 sm:$0xff]  }
 0x204   :  { %4848 = vmatpush1.bf16.msra.mxu1 %v9966_v25  ;;  %4874 = vmatprep.subr.bf16.mxu0 %v9974_v27  ;;  %v10025_v25 = vld [vmem:[#allocation2 + $0x264] ss:$48 sps:$4 sm:$0xff]   ;;  %v10023_v27 = vld [vmem:[#allocation2 + $0x260] ss:$48 sps:$4 sm:$0xff]  }
 0x205   :  { %4849 = vmatprep.subr.bf16.mxu1 %v9971_v57  ;;  %v10028_v57 = vld [vmem:[#allocation2 + $0x864] ss:$48 sps:$4 sm:$0xff]  }
 0x206   :  { %v4580_v41 = vpop.f32.mrf.mxu0  ;;  %4825 = vmatmul.mubr.bf16.vlgmr.msra.gmra.mxu0 %v11053_v7 }
 0x207   :  { %v4539_v39 = vpop.f32.mrf.mxu1  ;;  %4875 = vmatpush1.bf16.msra.mxu0 %v9972_v30  ;;  %4906 = vmatprep.mubr.bf16.mxu0 %v10962_v16  ;;  %v11160_v30 = vld [vmem:[%s11350_s0 + $0x18] ss:$0 sps:$4 sm:$0xff]  }
 0x208   :  { %v4540_v42 = vadd.f32 %v4539_v39, %v11143_v55  ;;  %4850 = vmatpush2.bf16.msra.mxu1 %v9969_v29  ;;  %v4582_v45 = vpop.f32.mrf.mxu0  ;;  %4876 = vmatprep.subr.bf16.mxu0 %v9980_v63  ;;  %v10026_v29 = vld [vmem:[#allocation2 + $0x860] ss:$48 sps:$4 sm:$0xff]   ;;  %v10034_v63 = vld [vmem:[#allocation2 + $0x804] ss:$48 sps:$4 sm:$0xff]  }
 0x209   :  { %v4541_v43 = vpop.f32.mrf.mxu1  ;;  %4851 = vmatprep.subr.bf16.mxu1 %v9977_v31  ;;  %v10031_v31 = vld [vmem:[#allocation2 + $0x204] ss:$48 sps:$4 sm:$0xff]  }
 0x20a   :  { %v11150_v49 = vadd.f32 %v4580_v41, %v4540_v42  ;;  %v4542_v50 = vadd.f32 %v4541_v43, %v11145_v60  ;;  %v4584_v56 = vpop.f32.mrf.mxu0  ;;  %v9990_v60 = vld [vmem:[#allocation2 + $0x1398] ss:$48 sps:$4 sm:$0xff]   ;;  %v10037_v39 = vld [vmem:[#allocation2 + $0x1a4] ss:$48 sps:$4 sm:$0xff]   ;;  %v10035_v42 = vld [vmem:[#allocation2 + $0x1a0] ss:$48 sps:$4 sm:$0xff]  }
 0x20b   :  { %v4543_v54 = vpop.f32.mrf.mxu1  ;;  %4877 = vmatpush1.bf16.msra.mxu0 %v9978_v37  ;;  %v10032_v37 = vld [vmem:[#allocation2 + $0x800] ss:$48 sps:$4 sm:$0xff]   ;;  %v10040_v41 = vld [vmem:[#allocation2 + $0x7a4] ss:$48 sps:$4 sm:$0xff]  }
 0x20c   :  { %v11154_v58 = vadd.f32 %v4582_v45, %v4542_v50  ;;  %4852 = vmatpush2.bf16.msra.mxu1 %v9975_v36  ;;  %v4585_v59 = vpop.f32.mrf.mxu0  ;;  %4878 = vmatprep.subr.bf16.mxu0 %v9986_v48  ;;  %v10029_v36 = vld [vmem:[#allocation2 + $0x200] ss:$48 sps:$4 sm:$0xff]   ;;  %v10043_v45 = vld [vmem:[#allocation2 + $0x144] ss:$48 sps:$4 sm:$0xff]  }
 0x20d   :  { %v4544_v55 = vpop.f32.mrf.mxu1  ;;  %4853 = vmatprep.subr.bf16.mxu1 %v9983_v46  ;;  %v10038_v43 = vld [vmem:[#allocation2 + $0x7a0] ss:$48 sps:$4 sm:$0xff]   ;;  %v10046_v46 = vld [vmem:[#allocation2 + $0x744] ss:$48 sps:$4 sm:$0xff]  }
 0x20e   :  { %v10041_v48 = vld [vmem:[#allocation2 + $0x140] ss:$48 sps:$4 sm:$0xff]   ;;  %v10055_v55 = vld [vmem:[#allocation2 + $0x84] ss:$48 sps:$4 sm:$0xff]  }
 0x20f   :  { %4879 = vmatpush1.bf16.msra.mxu0 %v9984_v53  ;;  %v10044_v50 = vld [vmem:[#allocation2 + $0x740] ss:$48 sps:$4 sm:$0xff]   ;;  %v10052_v53 = vld [vmem:[#allocation2 + $0x6e4] ss:$48 sps:$4 sm:$0xff]  }
 0x210   :  { %4854 = vmatpush2.bf16.msra.mxu1 %v9981_v52  ;;  %4880 = vmatprep.subr.bf16.mxu0 %v9992_v62  ;;  %v10049_v52 = vld [vmem:[#allocation2 + $0xe4] ss:$48 sps:$4 sm:$0xff]   ;;  %v10047_v54 = vld [vmem:[#allocation2 + $0xe0] ss:$48 sps:$4 sm:$0xff]  }
 0x211   :  { %4855 = vmatprep.subr.bf16.mxu1 %v9989_v61  ;;  %v10050_v56 = vld [vmem:[#allocation2 + $0x6e0] ss:$48 sps:$4 sm:$0xff]   ;;  %v10058_v59 = vld [vmem:[#allocation2 + $0x684] ss:$48 sps:$4 sm:$0xff]  }
 0x212   :  { %v10053_v61 = vld [vmem:[#allocation2 + $0x80] ss:$48 sps:$4 sm:$0xff]  }
 0x213   :  { %4881 = vmatpush1.bf16.msra.mxu0 %v9990_v60  ;;  %v10056_v62 = vld [vmem:[#allocation2 + $0x680] ss:$48 sps:$4 sm:$0xff]   ;;  %v10064_v60 = vld [vmem:[#allocation2 + $0x624] ss:$48 sps:$4 sm:$0xff]  }
 0x214   :  { %4856 = vmatpush2.bf16.msra.mxu1 %v9987_v0  ;;  %4882 = vmatprep.subr.bf16.mxu0 %v9998_v2  ;;  %v10061_v0 = vld [vmem:[#allocation2 + $0x24] ss:$48 sps:$4 sm:$0xff]   ;;  %v10062_v2 = vld [vmem:[#allocation2 + $0x620] ss:$48 sps:$4 sm:$0xff]  }
 0x215   :  { %4857 = vmatprep.subr.bf16.mxu1 %v9995_v1  ;;  %v10059_v1 = vld [vmem:[#allocation2 + $0x20] ss:$48 sps:$4 sm:$0xff]  }
 0x217   :  { %4883 = vmatpush1.bf16.msra.mxu0 %v9996_v4  ;;  %v10067_v4 = vld [vmem:[#allocation2 + $0x5c4] ss:$48 sps:$4 sm:$0xff]  }
 0x218   :  { %4858 = vmatpush2.bf16.msra.mxu1 %v9993_v3  ;;  %4884 = vmatprep.subr.bf16.mxu0 %v10004_v8  ;;  %v832_v3 = vsub.s32 4, %v11089_v28  ;;  %v10065_v8 = vld [vmem:[#allocation2 + $0x5c0] ss:$48 sps:$4 sm:$0xff]  }
 0x219   :  { %4859 = vmatprep.subr.bf16.mxu1 %v10001_v5  ;;  %v10070_v5 = vld [vmem:[#allocation2 + $0xbc4] ss:$48 sps:$4 sm:$0xff]  }
 0x21b   :  { %4885 = vmatpush1.bf16.msra.mxu0 %v10002_v10  ;;  %v836_v10 = vsub.s32 5, %v11089_v28 }
 0x21c   :  { %4860 = vmatpush2.bf16.msra.mxu1 %v9999_v9  ;;  %4886 = vmatprep.subr.bf16.mxu0 %v10010_v11  ;;  %v10068_v9 = vld [vmem:[#allocation2 + $0xbc0] ss:$48 sps:$4 sm:$0xff]   ;;  %v10073_v11 = vld [vmem:[#allocation2 + $0x564] ss:$48 sps:$4 sm:$0xff]  }
 0x21d   :  { %4861 = vmatprep.subr.bf16.mxu1 %v10007_v44  ;;  %v833_v44 = vrot.slane %v11133_v40, %v832_v3  ;;  %v10110_v3 = vld [vmem:[#allocation2 + $0x920] ss:$48 sps:$4 sm:$0xff]  }
 0x21f   :  { %4887 = vmatpush1.bf16.msra.mxu0 %v10008_v13  ;;  %v837_v13 = vrot.slane %v11133_v40, %v836_v10  ;;  %v10121_v10 = vld [vmem:[#allocation2 + $0xe64] ss:$48 sps:$4 sm:$0xff]  }
 0x220   :  { %4862 = vmatpush2.bf16.msra.mxu1 %v10005_v12  ;;  %4888 = vmatprep.subr.bf16.mxu0 %v10016_v15  ;;  %v10076_v12 = vld [vmem:[#allocation2 + $0xb64] ss:$48 sps:$4 sm:$0xff]   ;;  %v10074_v15 = vld [vmem:[#allocation2 + $0xb60] ss:$48 sps:$4 sm:$0xff]  }
 0x221   :  { %4863 = vmatprep.subr.bf16.mxu1 %v10013_v14  ;;  %v10071_v14 = vld [vmem:[#allocation2 + $0x560] ss:$48 sps:$4 sm:$0xff]  }
 0x223   :  { %4889 = vmatpush1.bf16.msra.mxu0 %v10014_v19 }
 0x224   :  { %4864 = vmatpush2.bf16.msra.mxu1 %v10011_v18  ;;  %4915 = vmatprep.subr.bf16.mxu0 %v10019_v20 }
 0x225   :  { %4956 = vmatprep.subr.bf16.mxu1 %v10022_v21 }
 0x226   :  { %4907 = vmatmul.mubr.bf16.vlgmr.msra.gmra.mxu0 %v11160_v30 }
 0x227   :  { %4866 = vmatmul.mubr.bf16.vlgmr.msra.gmra.mxu1 %v11077_v17  ;;  %4916 = vmatpush1.bf16.msra.mxu0 %v10017_v22 }
 0x228   :  { %4957 = vmatpush1.bf16.msra.mxu1 %v10020_v24  ;;  %4917 = vmatprep.subr.bf16.mxu0 %v10025_v25  ;;  %v10079_v24 = vld [vmem:[#allocation2 + $0x504] ss:$48 sps:$4 sm:$0xff]  }
 0x229   :  { %4958 = vmatprep.subr.bf16.mxu1 %v10028_v57  ;;  %4947 = vmatprep.mubr.bf16.mxu0 %v11042_v47  ;;  %v10082_v25 = vld [vmem:[#allocation2 + $0xb04] ss:$48 sps:$4 sm:$0xff]  }
 0x22a   :  { %4988 = vmatprep.mubr.bf16.mxu1 %v11047_v51 }
 0x22b   :  { %4918 = vmatpush1.bf16.msra.mxu0 %v10023_v27 }
 0x22c   :  { %4959 = vmatpush1.bf16.msra.mxu1 %v10026_v29  ;;  %4919 = vmatprep.subr.bf16.mxu0 %v10031_v31  ;;  %v10077_v29 = vld [vmem:[#allocation2 + $0x500] ss:$48 sps:$4 sm:$0xff]  }
 0x22d   :  { %4960 = vmatprep.subr.bf16.mxu1 %v10034_v63  ;;  %v10080_v31 = vld [vmem:[#allocation2 + $0xb00] ss:$48 sps:$4 sm:$0xff]  }
 0x22f   :  { %4920 = vmatpush1.bf16.msra.mxu0 %v10029_v36 }
 0x230   :  { %4961 = vmatpush1.bf16.msra.mxu1 %v10032_v37  ;;  %4921 = vmatprep.subr.bf16.mxu0 %v10037_v39 }
 0x231   :  { %4962 = vmatprep.subr.bf16.mxu1 %v10040_v41  ;;  %v10085_v41 = vld [vmem:[#allocation2 + $0x4a4] ss:$48 sps:$4 sm:$0xff]  }
 0x233   :  { %4922 = vmatpush1.bf16.msra.mxu0 %v10035_v42  ;;  %v10088_v42 = vld [vmem:[#allocation2 + $0xaa4] ss:$48 sps:$4 sm:$0xff]  }
 0x234   :  { %4963 = vmatpush1.bf16.msra.mxu1 %v10038_v43  ;;  %4923 = vmatprep.subr.bf16.mxu0 %v10043_v45  ;;  %v10083_v43 = vld [vmem:[#allocation2 + $0x4a0] ss:$48 sps:$4 sm:$0xff]  }
 0x235   :  { %4964 = vmatprep.subr.bf16.mxu1 %v10046_v46  ;;  %v10086_v45 = vld [vmem:[#allocation2 + $0xaa0] ss:$48 sps:$4 sm:$0xff]   ;;  %v10091_v46 = vld [vmem:[#allocation2 + $0x444] ss:$48 sps:$4 sm:$0xff]  }
 0x237   :  { %4924 = vmatpush1.bf16.msra.mxu0 %v10041_v48  ;;  %v10094_v48 = vld [vmem:[#allocation2 + $0xa44] ss:$48 sps:$4 sm:$0xff]  }
 0x238   :  { %4965 = vmatpush1.bf16.msra.mxu1 %v10044_v50  ;;  %4925 = vmatprep.subr.bf16.mxu0 %v10049_v52  ;;  %v10089_v50 = vld [vmem:[#allocation2 + $0x440] ss:$48 sps:$4 sm:$0xff]  }
 0x239   :  { %4966 = vmatprep.subr.bf16.mxu1 %v10052_v53  ;;  %v10092_v52 = vld [vmem:[#allocation2 + $0xa40] ss:$48 sps:$4 sm:$0xff]   ;;  %v10097_v53 = vld [vmem:[#allocation2 + $0x3e4] ss:$48 sps:$4 sm:$0xff]  }
 0x23b   :  { %4926 = vmatpush1.bf16.msra.mxu0 %v10047_v54  ;;  %v10100_v54 = vld [vmem:[#allocation2 + $0x9e4] ss:$48 sps:$4 sm:$0xff]  }
 0x23c   :  { %4967 = vmatpush1.bf16.msra.mxu1 %v10050_v56  ;;  %4927 = vmatprep.subr.bf16.mxu0 %v10055_v55  ;;  %v10095_v56 = vld [vmem:[#allocation2 + $0x3e0] ss:$48 sps:$4 sm:$0xff]  }
 0x23d   :  { %4968 = vmatprep.subr.bf16.mxu1 %v10058_v59  ;;  %v10098_v55 = vld [vmem:[#allocation2 + $0x9e0] ss:$48 sps:$4 sm:$0xff]   ;;  %v10103_v59 = vld [vmem:[#allocation2 + $0x384] ss:$48 sps:$4 sm:$0xff]  }
 0x23f   :  { %4928 = vmatpush1.bf16.msra.mxu0 %v10053_v61  ;;  %v10106_v61 = vld [vmem:[#allocation2 + $0x984] ss:$48 sps:$4 sm:$0xff]  }
 0x240   :  { %4969 = vmatpush1.bf16.msra.mxu1 %v10056_v62  ;;  %4929 = vmatprep.subr.bf16.mxu0 %v10061_v0  ;;  %v10101_v62 = vld [vmem:[#allocation2 + $0x380] ss:$48 sps:$4 sm:$0xff]  }
 0x241   :  { %4970 = vmatprep.subr.bf16.mxu1 %v10064_v60  ;;  %v10104_v0 = vld [vmem:[#allocation2 + $0x980] ss:$48 sps:$4 sm:$0xff]   ;;  %v10109_v60 = vld [vmem:[#allocation2 + $0x324] ss:$48 sps:$4 sm:$0xff]  }
 0x243   :  { %4930 = vmatpush1.bf16.msra.mxu0 %v10059_v1  ;;  %v10112_v1 = vld [vmem:[#allocation2 + $0x924] ss:$48 sps:$4 sm:$0xff]  }
 0x244   :  { %4971 = vmatpush1.bf16.msra.mxu1 %v10062_v2  ;;  %4931 = vmatprep.subr.bf16.mxu0 %v10067_v4  ;;  %v10107_v2 = vld [vmem:[#allocation2 + $0x320] ss:$48 sps:$4 sm:$0xff]   ;;  %v10115_v4 = vld [vmem:[#allocation2 + $0xec4] ss:$48 sps:$4 sm:$0xff]  }
 0x245   :  { %4972 = vmatprep.subr.bf16.mxu1 %v10070_v5  ;;  %v10118_v5 = vld [vmem:[#allocation2 + $0x14c4] ss:$48 sps:$4 sm:$0xff]  }
 0x246   :  { %v4621_v18 = vpop.f32.mrf.mxu0 }
 0x247   :  { %v4662_v19 = vpop.f32.mrf.mxu1  ;;  %v4622_v20 = vadd.f32 %v4621_v18, %v833_v44  ;;  %4932 = vmatpush2.bf16.msra.mxu0 %v10065_v8  ;;  %v10113_v8 = vld [vmem:[#allocation2 + $0xec0] ss:$48 sps:$4 sm:$0xff]   ;;  %v10124_v44 = vld [vmem:[#allocation2 + $0x1464] ss:$48 sps:$4 sm:$0xff]  }
 0x248   :  { %4973 = vmatpush2.bf16.msra.mxu1 %v10068_v9  ;;  %v4623_v21 = vpop.f32.mrf.mxu0  ;;  %4933 = vmatprep.subr.bf16.mxu0 %v10073_v11  ;;  %v10116_v9 = vld [vmem:[#allocation2 + $0x14c0] ss:$48 sps:$4 sm:$0xff]   ;;  %v10130_v18 = vld [vmem:[#allocation2 + $0x1404] ss:$48 sps:$4 sm:$0xff]  }
 0x249   :  { %v4664_v22 = vpop.f32.mrf.mxu1  ;;  %4974 = vmatprep.subr.bf16.mxu1 %v10076_v12  ;;  %v11169_v57 = vadd.f32 %v4662_v19, %v4622_v20  ;;  %v4624_v27 = vadd.f32 %v4623_v21, %v837_v13  ;;  %v10119_v11 = vld [vmem:[#allocation2 + $0xe60] ss:$48 sps:$4 sm:$0xff]  }
 0x24a   :  { %v4625_v63 = vpop.f32.mrf.mxu0  ;;  %v10122_v12 = vld [vmem:[#allocation2 + $0x1460] ss:$48 sps:$4 sm:$0xff]  }
 0x24b   :  { %v4666_v40 = vpop.f32.mrf.mxu1  ;;  %v11171_v36 = vadd.f32 %v4664_v22, %v4624_v27  ;;  %4934 = vmatpush2.bf16.msra.mxu0 %v10071_v14  ;;  %v10125_v19 = vld [vmem:[#allocation2 + $0xe00] ss:$48 sps:$4 sm:$0xff]   ;;  %v10142_v63 = vld [vmem:[#allocation2 + $0x1344] ss:$48 sps:$4 sm:$0xff]  }
 0x24c   :  { %4975 = vmatpush2.bf16.msra.mxu1 %v10074_v15  ;;  %v4626_v37 = vpop.f32.mrf.mxu0  ;;  %4935 = vmatprep.subr.bf16.mxu0 %v10079_v24  ;;  %v10127_v15 = vld [vmem:[#allocation2 + $0xe04] ss:$48 sps:$4 sm:$0xff]   ;;  %v10128_v20 = vld [vmem:[#allocation2 + $0x1400] ss:$48 sps:$4 sm:$0xff]  }
 0x24d   :  { %v4667_v39 = vpop.f32.mrf.mxu1  ;;  %4976 = vmatprep.subr.bf16.mxu1 %v10082_v25  ;;  %v10133_v24 = vld [vmem:[#allocation2 + $0xda4] ss:$48 sps:$4 sm:$0xff]   ;;  %v10131_v27 = vld [vmem:[#allocation2 + $0xda0] ss:$48 sps:$4 sm:$0xff]  }
 0x24e   :  { %v10136_v25 = vld [vmem:[#allocation2 + $0x13a4] ss:$48 sps:$4 sm:$0xff]   ;;  %v10137_v40 = vld [vmem:[#allocation2 + $0xd40] ss:$48 sps:$4 sm:$0xff]  }
 0x24f   :  { %4936 = vmatpush2.bf16.msra.mxu0 %v10077_v29  ;;  %v10134_v29 = vld [vmem:[#allocation2 + $0x13a0] ss:$48 sps:$4 sm:$0xff]   ;;  %v10145_v39 = vld [vmem:[#allocation2 + $0xce4] ss:$48 sps:$4 sm:$0xff]  }
 0x250   :  { %4977 = vmatpush2.bf16.msra.mxu1 %v10080_v31  ;;  %4937 = vmatprep.subr.bf16.mxu0 %v10085_v41  ;;  %v10139_v31 = vld [vmem:[#allocation2 + $0xd44] ss:$48 sps:$4 sm:$0xff]   ;;  %v10140_v37 = vld [vmem:[#allocation2 + $0x1340] ss:$48 sps:$4 sm:$0xff]  }
 0x251   :  { %4978 = vmatprep.subr.bf16.mxu1 %v10088_v42  ;;  %v10148_v41 = vld [vmem:[#allocation2 + $0x12e4] ss:$48 sps:$4 sm:$0xff]   ;;  %v10143_v42 = vld [vmem:[#allocation2 + $0xce0] ss:$48 sps:$4 sm:$0xff]  }
 0x253   :  { %4938 = vmatpush2.bf16.msra.mxu0 %v10083_v43  ;;  %v10146_v43 = vld [vmem:[#allocation2 + $0x12e0] ss:$48 sps:$4 sm:$0xff]  }
 0x254   :  { %4979 = vmatpush2.bf16.msra.mxu1 %v10086_v45  ;;  %4939 = vmatprep.subr.bf16.mxu0 %v10091_v46  ;;  %v10151_v45 = vld [vmem:[#allocation2 + $0xc84] ss:$48 sps:$4 sm:$0xff]  }
 0x255   :  { %4980 = vmatprep.subr.bf16.mxu1 %v10094_v48  ;;  %v10154_v46 = vld [vmem:[#allocation2 + $0x1284] ss:$48 sps:$4 sm:$0xff]   ;;  %v10149_v48 = vld [vmem:[#allocation2 + $0xc80] ss:$48 sps:$4 sm:$0xff]  }
 0x257   :  { %4940 = vmatpush2.bf16.msra.mxu0 %v10089_v50  ;;  %v10152_v50 = vld [vmem:[#allocation2 + $0x1280] ss:$48 sps:$4 sm:$0xff]  }
 0x258   :  { %4981 = vmatpush2.bf16.msra.mxu1 %v10092_v52  ;;  %4941 = vmatprep.subr.bf16.mxu0 %v10097_v53  ;;  %v10157_v52 = vld [vmem:[#allocation2 + $0xc24] ss:$48 sps:$4 sm:$0xff]  }
 0x259   :  { %4982 = vmatprep.subr.bf16.mxu1 %v10100_v54  ;;  %v10160_v53 = vld [vmem:[#allocation2 + $0x1224] ss:$48 sps:$4 sm:$0xff]   ;;  %v10155_v54 = vld [vmem:[#allocation2 + $0xc20] ss:$48 sps:$4 sm:$0xff]  }
 0x25b   :  { %4942 = vmatpush2.bf16.msra.mxu0 %v10095_v56  ;;  %v10158_v56 = vld [vmem:[#allocation2 + $0x1220] ss:$48 sps:$4 sm:$0xff]  }
 0x25c   :  { %4983 = vmatpush2.bf16.msra.mxu1 %v10098_v55  ;;  %4943 = vmatprep.subr.bf16.mxu0 %v10103_v59  ;;  %v10163_v55 = vld [vmem:[#allocation2 + $0x11c4] ss:$48 sps:$4 sm:$0xff]   ;;  %v10166_v59 = vld [vmem:[#allocation2 + $0x2cc] ss:$48 sps:$4 sm:$0xff]  }
 0x25d   :  { %4984 = vmatprep.subr.bf16.mxu1 %v10106_v61  ;;  %v10161_v61 = vld [vmem:[#allocation2 + $0x11c0] ss:$48 sps:$4 sm:$0xff]  }
 0x25f   :  { %4944 = vmatpush2.bf16.msra.mxu0 %v10101_v62  ;;  %v10164_v62 = vld [vmem:[#allocation2 + $0x2c8] ss:$48 sps:$4 sm:$0xff]  }
 0x260   :  { %4985 = vmatpush2.bf16.msra.mxu1 %v10104_v0  ;;  %4945 = vmatprep.subr.bf16.mxu0 %v10109_v60  ;;  %v10169_v0 = vld [vmem:[#allocation2 + $0x1164] ss:$48 sps:$4 sm:$0xff]   ;;  %v10172_v60 = vld [vmem:[#allocation2 + $0x26c] ss:$48 sps:$4 sm:$0xff]  }
 0x261   :  { %4986 = vmatprep.subr.bf16.mxu1 %v10112_v1  ;;  %v10167_v1 = vld [vmem:[#allocation2 + $0x1160] ss:$48 sps:$4 sm:$0xff]  }
 0x263   :  { %4946 = vmatpush2.bf16.msra.mxu0 %v10107_v2  ;;  %v10170_v2 = vld [vmem:[#allocation2 + $0x268] ss:$48 sps:$4 sm:$0xff]  }
 0x264   :  { %4987 = vmatpush2.bf16.msra.mxu1 %v10110_v3  ;;  %4997 = vmatprep.subr.bf16.mxu0 %v10115_v4 }
 0x265   :  { %5038 = vmatprep.subr.bf16.mxu1 %v10118_v5 }
 0x266   :  { %4948 = vmatmul.mubr.bf16.vlgmr.msra.gmra.mxu0 %v11051_v6 }
 0x267   :  { %v11173_v13 = vpop.f32.mrf.mxu1  ;;  %4989 = vmatmul.mubr.bf16.vlgmr.msra.gmra.mxu1 %v11053_v7  ;;  %4998 = vmatpush1.bf16.msra.mxu0 %v10113_v8  ;;  %v10175_v8 = vld [vmem:[#allocation2 + $0x1104] ss:$48 sps:$4 sm:$0xff]  }
 0x268   :  { %5039 = vmatpush1.bf16.msra.mxu1 %v10116_v9  ;;  %4999 = vmatprep.subr.bf16.mxu0 %v10121_v10  ;;  %v10178_v9 = vld [vmem:[#allocation2 + $0x20c] ss:$48 sps:$4 sm:$0xff]  }
 0x269   :  { %v11177_v14 = vpop.f32.mrf.mxu1  ;;  %5040 = vmatprep.subr.bf16.mxu1 %v10124_v44  ;;  %5070 = vmatprep.mubr.bf16.mxu1 %v10962_v16 }
 0x26a   :  { %5029 = vmatprep.mubr.bf16.mxu0 %v11065_v35 }
 0x26b   :  { %v4748_v21 = vpop.f32.mrf.mxu1  ;;  %5000 = vmatpush1.bf16.msra.mxu0 %v10119_v11  ;;  %v10173_v11 = vld [vmem:[#allocation2 + $0x1100] ss:$48 sps:$4 sm:$0xff]  }
 0x26c   :  { %5041 = vmatpush1.bf16.msra.mxu1 %v10122_v12  ;;  %5001 = vmatprep.subr.bf16.mxu0 %v10127_v15  ;;  %v10185_v21 = vld [vmem:[#allocation2 + $0x1040] ss:$48 sps:$4 sm:$0xff]  }
 0x26d   :  { %v4749_v22 = vpop.f32.mrf.mxu1  ;;  %5042 = vmatprep.subr.bf16.mxu1 %v10130_v18  ;;  %v10181_v18 = vld [vmem:[#allocation2 + $0x10a4] ss:$48 sps:$4 sm:$0xff]  }
 0x26e   :  { %v10188_v22 = vld [vmem:[#allocation2 + $0x148] ss:$48 sps:$4 sm:$0xff]  }
 0x26f   :  { %5002 = vmatpush1.bf16.msra.mxu0 %v10125_v19  ;;  %v10184_v19 = vld [vmem:[#allocation2 + $0x1ac] ss:$48 sps:$4 sm:$0xff]  }
 0x270   :  { %5043 = vmatpush1.bf16.msra.mxu1 %v10128_v20  ;;  %5003 = vmatprep.subr.bf16.mxu0 %v10133_v24  ;;  %v10179_v20 = vld [vmem:[#allocation2 + $0x10a0] ss:$48 sps:$4 sm:$0xff]   ;;  %v10196_v24 = vld [vmem:[#allocation2 + $0xec] ss:$48 sps:$4 sm:$0xff]  }
 0x271   :  { %5044 = vmatprep.subr.bf16.mxu1 %v10136_v25  ;;  %v10191_v25 = vld [vmem:[#allocation2 + $0xfe0] ss:$48 sps:$4 sm:$0xff]  }
 0x273   :  { %5004 = vmatpush1.bf16.msra.mxu0 %v10131_v27  ;;  %v10194_v27 = vld [vmem:[#allocation2 + $0xe8] ss:$48 sps:$4 sm:$0xff]  }
 0x274   :  { %5045 = vmatpush1.bf16.msra.mxu1 %v10134_v29  ;;  %5005 = vmatprep.subr.bf16.mxu0 %v10139_v31  ;;  %v10199_v29 = vld [vmem:[#allocation2 + $0xf84] ss:$48 sps:$4 sm:$0xff]   ;;  %v10202_v31 = vld [vmem:[#allocation2 + $0x8c] ss:$48 sps:$4 sm:$0xff]  }
 0x275   :  { %5046 = vmatprep.subr.bf16.mxu1 %v10142_v63  ;;  %v10197_v63 = vld [vmem:[#allocation2 + $0xf80] ss:$48 sps:$4 sm:$0xff]  }
 0x277   :  { %5006 = vmatpush1.bf16.msra.mxu0 %v10137_v40  ;;  %v10200_v40 = vld [vmem:[#allocation2 + $0x88] ss:$48 sps:$4 sm:$0xff]  }
 0x278   :  { %5047 = vmatpush1.bf16.msra.mxu1 %v10140_v37  ;;  %5007 = vmatprep.subr.bf16.mxu0 %v10145_v39  ;;  %v10205_v37 = vld [vmem:[#allocation2 + $0xf24] ss:$48 sps:$4 sm:$0xff]   ;;  %v10208_v39 = vld [vmem:[#allocation2 + $0x2c] ss:$48 sps:$4 sm:$0xff]  }
 0x279   :  { %5048 = vmatprep.subr.bf16.mxu1 %v10148_v41  ;;  %v10203_v41 = vld [vmem:[#allocation2 + $0xf20] ss:$48 sps:$4 sm:$0xff]  }
 0x27b   :  { %5008 = vmatpush1.bf16.msra.mxu0 %v10143_v42  ;;  %v10206_v42 = vld [vmem:[#allocation2 + $0x28] ss:$48 sps:$4 sm:$0xff]  }
 0x27c   :  { %5049 = vmatpush1.bf16.msra.mxu1 %v10146_v43  ;;  %5009 = vmatprep.subr.bf16.mxu0 %v10151_v45  ;;  %v10211_v43 = vld [vmem:[#allocation2 + $0x5cc] ss:$48 sps:$4 sm:$0xff]  }
 0x27d   :  { %5050 = vmatprep.subr.bf16.mxu1 %v10154_v46  ;;  %v10214_v45 = vld [vmem:[#allocation2 + $0x8cc] ss:$48 sps:$4 sm:$0xff]   ;;  %v10209_v46 = vld [vmem:[#allocation2 + $0x5c8] ss:$48 sps:$4 sm:$0xff]  }
 0x27f   :  { %5010 = vmatpush1.bf16.msra.mxu0 %v10149_v48  ;;  %v10212_v48 = vld [vmem:[#allocation2 + $0x8c8] ss:$48 sps:$4 sm:$0xff]  }
 0x280   :  { %5051 = vmatpush1.bf16.msra.mxu1 %v10152_v50  ;;  %5011 = vmatprep.subr.bf16.mxu0 %v10157_v52  ;;  %v10217_v50 = vld [vmem:[#allocation2 + $0x56c] ss:$48 sps:$4 sm:$0xff]  }
 0x281   :  { %5052 = vmatprep.subr.bf16.mxu1 %v10160_v53  ;;  %v10220_v52 = vld [vmem:[#allocation2 + $0x86c] ss:$48 sps:$4 sm:$0xff]   ;;  %v10215_v53 = vld [vmem:[#allocation2 + $0x568] ss:$48 sps:$4 sm:$0xff]  }
 0x283   :  { %5012 = vmatpush1.bf16.msra.mxu0 %v10155_v54  ;;  %v10218_v54 = vld [vmem:[#allocation2 + $0x868] ss:$48 sps:$4 sm:$0xff]  }
 0x284   :  { %5053 = vmatpush1.bf16.msra.mxu1 %v10158_v56  ;;  %5013 = vmatprep.subr.bf16.mxu0 %v10163_v55  ;;  %v10223_v55 = vld [vmem:[#allocation2 + $0x50c] ss:$48 sps:$4 sm:$0xff]  }
 0x285   :  { %5079 = vmatprep.subr.bf16.mxu1 %v10166_v59  ;;  %v10226_v59 = vld [vmem:[#allocation2 + $0x80c] ss:$48 sps:$4 sm:$0xff]  }
 0x286   :  { %v4703_v3 = vpop.f32.mrf.mxu0 }
 0x287   :  { %5071 = vmatmul.mubr.bf16.vlgmr.msra.gmra.mxu1 %v11160_v30  ;;  %v4704_v4 = vadd.f32 %v4703_v3, %v11169_v57  ;;  %5014 = vmatpush2.bf16.msra.mxu0 %v10161_v61  ;;  %v10176_v57 = vld [vmem:[#allocation2 + $0x208] ss:$48 sps:$4 sm:$0xff]   ;;  %v10232_v3 = vld [vmem:[#allocation2 + $0x7ac] ss:$48 sps:$4 sm:$0xff]  }
 0x288   :  { %5080 = vmatpush1.bf16.msra.mxu1 %v10164_v62  ;;  %v4705_v5 = vpop.f32.mrf.mxu0  ;;  %5015 = vmatprep.subr.bf16.mxu0 %v10169_v0  ;;  %v10221_v0 = vld [vmem:[#allocation2 + $0x508] ss:$48 sps:$4 sm:$0xff]  }
 0x289   :  { %5081 = vmatprep.subr.bf16.mxu1 %v10172_v60  ;;  %v11184_v10 = vadd.f32 %v11173_v13, %v4704_v4  ;;  %v4706_v44 = vadd.f32 %v4705_v5, %v11171_v36  ;;  %5111 = vmatprep.mubr.bf16.mxu1 %v11042_v47  ;;  %v10182_v13 = vld [vmem:[#allocation2 + $0x1a8] ss:$48 sps:$4 sm:$0xff]   ;;  %v10187_v36 = vld [vmem:[#allocation2 + $0x1044] ss:$48 sps:$4 sm:$0xff]   ;;  %v10190_v47 = vld [vmem:[#allocation2 + $0x14c] ss:$48 sps:$4 sm:$0xff]  }
 0x28a   :  { %v4707_v12 = vpop.f32.mrf.mxu0  ;;  %v10224_v60 = vld [vmem:[#allocation2 + $0x808] ss:$48 sps:$4 sm:$0xff]  }
 0x28b   :  { %v11189_v30 = vadd.f32 %v11177_v14, %v4706_v44  ;;  %5016 = vmatpush2.bf16.msra.mxu0 %v10167_v1  ;;  %v10193_v14 = vld [vmem:[#allocation2 + $0xfe4] ss:$48 sps:$4 sm:$0xff]   ;;  %v10227_v4 = vld [vmem:[#allocation2 + $0x4a8] ss:$48 sps:$4 sm:$0xff]   ;;  %v10244_v12 = vld [vmem:[#allocation2 + $0x6ec] ss:$48 sps:$4 sm:$0xff]  }
 0x28c   :  { %5082 = vmatpush1.bf16.msra.mxu1 %v10170_v2  ;;  %v4708_v15 = vpop.f32.mrf.mxu0  ;;  %5017 = vmatprep.subr.bf16.mxu0 %v10175_v8  ;;  %v10229_v2 = vld [vmem:[#allocation2 + $0x4ac] ss:$48 sps:$4 sm:$0xff]   ;;  %v10230_v5 = vld [vmem:[#allocation2 + $0x7a8] ss:$48 sps:$4 sm:$0xff]  }
 0x28d   :  { %5083 = vmatprep.subr.bf16.mxu1 %v10178_v9  ;;  %v10235_v8 = vld [vmem:[#allocation2 + $0x44c] ss:$48 sps:$4 sm:$0xff]   ;;  %v10233_v44 = vld [vmem:[#allocation2 + $0x448] ss:$48 sps:$4 sm:$0xff]  }
 0x28e   :  { %v10238_v9 = vld [vmem:[#allocation2 + $0x74c] ss:$48 sps:$4 sm:$0xff]   ;;  %v10242_v15 = vld [vmem:[#allocation2 + $0x6e8] ss:$48 sps:$4 sm:$0xff]  }
 0x28f   :  { %5018 = vmatpush2.bf16.msra.mxu0 %v10173_v11  ;;  %v10241_v11 = vld [vmem:[#allocation2 + $0x3ec] ss:$48 sps:$4 sm:$0xff]  }
 0x290   :  { %5084 = vmatpush1.bf16.msra.mxu1 %v10176_v57  ;;  %5019 = vmatprep.subr.bf16.mxu0 %v10181_v18  ;;  %v10239_v57 = vld [vmem:[#allocation2 + $0x3e8] ss:$48 sps:$4 sm:$0xff]   ;;  %v10247_v18 = vld [vmem:[#allocation2 + $0x38c] ss:$48 sps:$4 sm:$0xff]  }
 0x291   :  { %5085 = vmatprep.subr.bf16.mxu1 %v10184_v19  ;;  %v10250_v19 = vld [vmem:[#allocation2 + $0x68c] ss:$48 sps:$4 sm:$0xff]  }
 0x293   :  { %5020 = vmatpush2.bf16.msra.mxu0 %v10179_v20  ;;  %v10245_v20 = vld [vmem:[#allocation2 + $0x388] ss:$48 sps:$4 sm:$0xff]  }
 0x294   :  { %5086 = vmatpush1.bf16.msra.mxu1 %v10182_v13  ;;  %5021 = vmatprep.subr.bf16.mxu0 %v10187_v36  ;;  %v10248_v13 = vld [vmem:[#allocation2 + $0x688] ss:$48 sps:$4 sm:$0xff]   ;;  %v840_v36 = vsub.s32 6, %v11089_v28 }
 0x295   :  { %5087 = vmatprep.subr.bf16.mxu1 %v10190_v47  ;;  %v844_v47 = vsub.s32 7, %v11089_v28 }
 0x297   :  { %5022 = vmatpush2.bf16.msra.mxu0 %v10185_v21  ;;  %v10253_v21 = vld [vmem:[#allocation2 + $0x32c] ss:$48 sps:$4 sm:$0xff]  }
 0x298   :  { %5088 = vmatpush1.bf16.msra.mxu1 %v10188_v22  ;;  %5023 = vmatprep.subr.bf16.mxu0 %v10193_v14  ;;  %v10256_v22 = vld [vmem:[#allocation2 + $0x62c] ss:$48 sps:$4 sm:$0xff]   ;;  %v10251_v14 = vld [vmem:[#allocation2 + $0x328] ss:$48 sps:$4 sm:$0xff]  }
 0x299   :  { %5089 = vmatprep.subr.bf16.mxu1 %v10196_v24  ;;  %v10254_v24 = vld [vmem:[#allocation2 + $0x628] ss:$48 sps:$4 sm:$0xff]  }
 0x29b   :  { %5024 = vmatpush2.bf16.msra.mxu0 %v10191_v25  ;;  %v10259_v25 = vld [vmem:[#allocation2 + $0xbcc] ss:$48 sps:$4 sm:$0xff]  }
 0x29c   :  { %5090 = vmatpush1.bf16.msra.mxu1 %v10194_v27  ;;  %5025 = vmatprep.subr.bf16.mxu0 %v10199_v29  ;;  %v10262_v27 = vld [vmem:[#allocation2 + $0xecc] ss:$48 sps:$4 sm:$0xff]   ;;  %v10776_v29 = vld [vmem:[#allocation4] sm:$0xff] }
 0x29d   :  { %5091 = vmatprep.subr.bf16.mxu1 %v10202_v31  ;;  %v841_v31 = vrot.slane %v10776_v29, %v840_v36  ;;  %v10310_v36 = vld [vmem:[#allocation2 + $0x14cc] ss:$48 sps:$4 sm:$0xff]  }
 0x29f   :  { %5026 = vmatpush2.bf16.msra.mxu0 %v10197_v63  ;;  %v10257_v63 = vld [vmem:[#allocation2 + $0xbc8] ss:$48 sps:$4 sm:$0xff]  }
 0x2a0   :  { %5092 = vmatpush1.bf16.msra.mxu1 %v10200_v40  ;;  %5027 = vmatprep.subr.bf16.mxu0 %v10205_v37  ;;  %v10260_v40 = vld [vmem:[#allocation2 + $0xec8] ss:$48 sps:$4 sm:$0xff]   ;;  %v10265_v37 = vld [vmem:[#allocation2 + $0xb6c] ss:$48 sps:$4 sm:$0xff]  }
 0x2a1   :  { %5093 = vmatprep.subr.bf16.mxu1 %v10208_v39  ;;  %v10268_v39 = vld [vmem:[#allocation2 + $0xe6c] ss:$48 sps:$4 sm:$0xff]  }
 0x2a3   :  { %5028 = vmatpush2.bf16.msra.mxu0 %v10203_v41  ;;  %v845_v41 = vrot.slane %v10776_v29, %v844_v47  ;;  %v10305_v47 = vld [vmem:[#allocation2 + $0x11c8] ss:$48 sps:$4 sm:$0xff]  }
 0x2a4   :  { %5094 = vmatpush1.bf16.msra.mxu1 %v10206_v42  ;;  %5120 = vmatprep.subr.bf16.mxu0 %v10214_v45  ;;  %v10266_v45 = vld [vmem:[#allocation2 + $0xe68] ss:$48 sps:$4 sm:$0xff]  }
 0x2a5   :  { %5095 = vmatprep.subr.bf16.mxu1 %v10211_v43  ;;  %v10263_v43 = vld [vmem:[#allocation2 + $0xb68] ss:$48 sps:$4 sm:$0xff]  }
 0x2a6   :  { %5030 = vmatmul.mubr.bf16.vlgmr.msra.gmra.mxu0 %v11077_v17  ;;  %v10311_v29 = vld [vmem:[#allocation2 + $0x1168] ss:$48 sps:$4 sm:$0xff]  }
 0x2a7   :  { %v11191_v56 = vpop.f32.mrf.mxu1  ;;  %5121 = vmatpush1.bf16.msra.mxu0 %v10212_v48  ;;  %5152 = vmatprep.mubr.bf16.mxu0 %v11047_v51  ;;  %v10236_v51 = vld [vmem:[#allocation2 + $0x748] ss:$48 sps:$4 sm:$0xff]   ;;  %v10271_v48 = vld [vmem:[#allocation2 + $0xb0c] ss:$48 sps:$4 sm:$0xff]  }
 0x2a8   :  { %5096 = vmatpush2.bf16.msra.mxu1 %v10209_v46  ;;  %5122 = vmatprep.subr.bf16.mxu0 %v10220_v52  ;;  %v4786_v42 = vadd.f32 %v11191_v56, %v841_v31  ;;  %v10314_v31 = vld [vmem:[#allocation2 + $0x1468] ss:$48 sps:$4 sm:$0xff]  }
 0x2a9   :  { %v11194_v61 = vpop.f32.mrf.mxu1  ;;  %5097 = vmatprep.subr.bf16.mxu1 %v10217_v50  ;;  %v10274_v50 = vld [vmem:[#allocation2 + $0xe0c] ss:$48 sps:$4 sm:$0xff]  }
 0x2aa   :  { %v4788_v52 = vadd.f32 %v11194_v61, %v845_v41  ;;  %v10277_v61 = vld [vmem:[#allocation2 + $0xaac] ss:$48 sps:$4 sm:$0xff]  }
 0x2ab   :  { %v4789_v62 = vpop.f32.mrf.mxu1  ;;  %5123 = vmatpush1.bf16.msra.mxu0 %v10218_v54 }
 0x2ac   :  { %5098 = vmatpush2.bf16.msra.mxu1 %v10215_v53  ;;  %5124 = vmatprep.subr.bf16.mxu0 %v10226_v59  ;;  %v10269_v59 = vld [vmem:[#allocation2 + $0xb08] ss:$48 sps:$4 sm:$0xff]  }
 0x2ad   :  { %v4790_v1 = vpop.f32.mrf.mxu1  ;;  %5099 = vmatprep.subr.bf16.mxu1 %v10223_v55 }
 0x2ae   :  { %v10278_v1 = vld [vmem:[#allocation2 + $0xda8] ss:$48 sps:$4 sm:$0xff]  }
 0x2af   :  { %5125 = vmatpush1.bf16.msra.mxu0 %v10224_v60  ;;  %v10275_v60 = vld [vmem:[#allocation2 + $0xaa8] ss:$48 sps:$4 sm:$0xff]  }
 0x2b0   :  { %5100 = vmatpush2.bf16.msra.mxu1 %v10221_v0  ;;  %5126 = vmatprep.subr.bf16.mxu0 %v10232_v3  ;;  %v10280_v0 = vld [vmem:[#allocation2 + $0xdac] ss:$48 sps:$4 sm:$0xff]  }
 0x2b1   :  { %5101 = vmatprep.subr.bf16.mxu1 %v10229_v2  ;;  %v10283_v2 = vld [vmem:[#allocation2 + $0xa4c] ss:$48 sps:$4 sm:$0xff]  }
 0x2b2   :  { %v10286_v3 = vld [vmem:[#allocation2 + $0xd4c] ss:$48 sps:$4 sm:$0xff]  }
 0x2b3   :  { %5127 = vmatpush1.bf16.msra.mxu0 %v10230_v5  ;;  %v10289_v5 = vld [vmem:[#allocation2 + $0x9ec] ss:$48 sps:$4 sm:$0xff]  }
 0x2b4   :  { %5102 = vmatpush2.bf16.msra.mxu1 %v10227_v4  ;;  %5128 = vmatprep.subr.bf16.mxu0 %v10238_v9  ;;  %v10281_v4 = vld [vmem:[#allocation2 + $0xa48] ss:$48 sps:$4 sm:$0xff]  }
 0x2b5   :  { %5103 = vmatprep.subr.bf16.mxu1 %v10235_v8  ;;  %v10292_v8 = vld [vmem:[#allocation2 + $0xcec] ss:$48 sps:$4 sm:$0xff]   ;;  %v10287_v9 = vld [vmem:[#allocation2 + $0x9e8] ss:$48 sps:$4 sm:$0xff]  }
 0x2b7   :  { %5129 = vmatpush1.bf16.msra.mxu0 %v10236_v51  ;;  %v10295_v51 = vld [vmem:[#allocation2 + $0x98c] ss:$48 sps:$4 sm:$0xff]  }
 0x2b8   :  { %5104 = vmatpush2.bf16.msra.mxu1 %v10233_v44  ;;  %5130 = vmatprep.subr.bf16.mxu0 %v10244_v12  ;;  %v10290_v44 = vld [vmem:[#allocation2 + $0xce8] ss:$48 sps:$4 sm:$0xff]  }
 0x2b9   :  { %5105 = vmatprep.subr.bf16.mxu1 %v10241_v11  ;;  %v10298_v11 = vld [vmem:[#allocation2 + $0xc8c] ss:$48 sps:$4 sm:$0xff]   ;;  %v10293_v12 = vld [vmem:[#allocation2 + $0x988] ss:$48 sps:$4 sm:$0xff]  }
 0x2bb   :  { %5131 = vmatpush1.bf16.msra.mxu0 %v10242_v15  ;;  %v10301_v15 = vld [vmem:[#allocation2 + $0x92c] ss:$48 sps:$4 sm:$0xff]  }
 0x2bc   :  { %5106 = vmatpush2.bf16.msra.mxu1 %v10239_v57  ;;  %5132 = vmatprep.subr.bf16.mxu0 %v10250_v19  ;;  %v10296_v57 = vld [vmem:[#allocation2 + $0xc88] ss:$48 sps:$4 sm:$0xff]  }
 0x2bd   :  { %5107 = vmatprep.subr.bf16.mxu1 %v10247_v18  ;;  %v10304_v18 = vld [vmem:[#allocation2 + $0xc2c] ss:$48 sps:$4 sm:$0xff]   ;;  %v10299_v19 = vld [vmem:[#allocation2 + $0x928] ss:$48 sps:$4 sm:$0xff]  }
 0x2bf   :  { %5133 = vmatpush1.bf16.msra.mxu0 %v10248_v13  ;;  %v10307_v13 = vld [vmem:[#allocation2 + $0x11cc] ss:$48 sps:$4 sm:$0xff]  }
 0x2c0   :  { %5108 = vmatpush2.bf16.msra.mxu1 %v10245_v20  ;;  %5134 = vmatprep.subr.bf16.mxu0 %v10256_v22  ;;  %v10302_v20 = vld [vmem:[#allocation2 + $0xc28] ss:$48 sps:$4 sm:$0xff]   ;;  %v10313_v22 = vld [vmem:[#allocation2 + $0x116c] ss:$48 sps:$4 sm:$0xff]  }
 0x2c1   :  { %5109 = vmatprep.subr.bf16.mxu1 %v10253_v21  ;;  %v10308_v21 = vld [vmem:[#allocation2 + $0x14c8] ss:$48 sps:$4 sm:$0xff]  }
 0x2c3   :  { %5135 = vmatpush1.bf16.msra.mxu0 %v10254_v24 }
 0x2c4   :  { %5110 = vmatpush2.bf16.msra.mxu1 %v10251_v14  ;;  %5136 = vmatprep.subr.bf16.mxu0 %v10259_v25  ;;  %v10316_v14 = vld [vmem:[#allocation2 + $0x146c] ss:$48 sps:$4 sm:$0xff]  }
 0x2c5   :  { %5161 = vmatprep.subr.bf16.mxu1 %v10262_v27 }
 0x2c6   :  { %v4826_v46 = vpop.f32.mrf.mxu0 }
 0x2c7   :  { %5112 = vmatmul.mubr.bf16.vlgmr.msra.gmra.mxu1 %v11051_v6  ;;  %v11202_v53 = vadd.f32 %v4826_v46, %v4786_v42  ;;  %5137 = vmatpush2.bf16.msra.mxu0 %v10257_v63  ;;  %v10272_v6 = vld [vmem:[#allocation2 + $0xe08] ss:$48 sps:$4 sm:$0xff]  }
 0x2c8   :  { %5162 = vmatpush1.bf16.msra.mxu1 %v10260_v40  ;;  %v4828_v54 = vpop.f32.mrf.mxu0  ;;  %5138 = vmatprep.subr.bf16.mxu0 %v10265_v37  ;;  %v10319_v37 = vld [vmem:[#allocation2 + $0x110c] ss:$48 sps:$4 sm:$0xff]   ;;  %v10317_v46 = vld [vmem:[#allocation2 + $0x1108] ss:$48 sps:$4 sm:$0xff]  }
 0x2c9   :  { %5163 = vmatprep.subr.bf16.mxu1 %v10268_v39  ;;  %v11204_v55 = vadd.f32 %v4828_v54, %v4788_v52  ;;  %5193 = vmatprep.mubr.bf16.mxu1 %v11065_v35  ;;  %v10284_v35 = vld [vmem:[#allocation2 + $0xd48] ss:$48 sps:$4 sm:$0xff]   ;;  %v10322_v39 = vld [vmem:[#allocation2 + $0x140c] ss:$48 sps:$4 sm:$0xff]  }
 0x2ca   :  { %v4830_v56 = vpop.f32.mrf.mxu0  ;;  %v10328_v54 = vld [vmem:[#allocation2 + $0x13ac] ss:$48 sps:$4 sm:$0xff]  }
 0x2cb   :  { %5139 = vmatpush2.bf16.msra.mxu0 %v10263_v43  ;;  %v10323_v56 = vld [vmem:[#allocation2 + $0x10a8] ss:$48 sps:$4 sm:$0xff]  }
 0x2cc   :  { %5164 = vmatpush1.bf16.msra.mxu1 %v10266_v45  ;;  %v4831_v62 = vpop.f32.mrf.mxu0  ;;  %5140 = vmatprep.subr.bf16.mxu0 %v10271_v48  ;;  %v10320_v48 = vld [vmem:[#allocation2 + $0x1408] ss:$48 sps:$4 sm:$0xff]  }
 0x2cd   :  { %5165 = vmatprep.subr.bf16.mxu1 %v10274_v50  ;;  %v10332_v62 = vld [vmem:[#allocation2 + $0x1348] ss:$48 sps:$4 sm:$0xff]  }
 0x2cf   :  { %5141 = vmatpush2.bf16.msra.mxu0 %v10269_v59  ;;  %v10334_v59 = vld [vmem:[#allocation2 + $0x134c] ss:$48 sps:$4 sm:$0xff]  }
 0x2d0   :  { %5166 = vmatpush1.bf16.msra.mxu1 %v10272_v6  ;;  %5142 = vmatprep.subr.bf16.mxu0 %v10277_v61  ;;  %v10329_v6 = vld [vmem:[#allocation2 + $0x1048] ss:$48 sps:$4 sm:$0xff]   ;;  %v10337_v61 = vld [vmem:[#allocation2 + $0xfec] ss:$48 sps:$4 sm:$0xff]  }
 0x2d1   :  { %5167 = vmatprep.subr.bf16.mxu1 %v10280_v0  ;;  %v10340_v0 = vld [vmem:[#allocation2 + $0x12ec] ss:$48 sps:$4 sm:$0xff]  }
 0x2d3   :  { %5143 = vmatpush2.bf16.msra.mxu0 %v10275_v60  ;;  %v10335_v60 = vld [vmem:[#allocation2 + $0xfe8] ss:$48 sps:$4 sm:$0xff]  }
 0x2d4   :  { %5168 = vmatpush1.bf16.msra.mxu1 %v10278_v1  ;;  %5144 = vmatprep.subr.bf16.mxu0 %v10283_v2  ;;  %v10338_v1 = vld [vmem:[#allocation2 + $0x12e8] ss:$48 sps:$4 sm:$0xff]   ;;  %v10343_v2 = vld [vmem:[#allocation2 + $0xf8c] ss:$48 sps:$4 sm:$0xff]  }
 0x2d5   :  { %5169 = vmatprep.subr.bf16.mxu1 %v10286_v3  ;;  %v10346_v3 = vld [vmem:[#allocation2 + $0x128c] ss:$48 sps:$4 sm:$0xff]  }
 0x2d7   :  { %5145 = vmatpush2.bf16.msra.mxu0 %v10281_v4  ;;  %v10341_v4 = vld [vmem:[#allocation2 + $0xf88] ss:$48 sps:$4 sm:$0xff]  }
 0x2d8   :  { %5170 = vmatpush1.bf16.msra.mxu1 %v10284_v35  ;;  %5146 = vmatprep.subr.bf16.mxu0 %v10289_v5  ;;  %v10344_v35 = vld [vmem:[#allocation2 + $0x1288] ss:$48 sps:$4 sm:$0xff]   ;;  %v10349_v5 = vld [vmem:[#allocation2 + $0xf2c] ss:$48 sps:$4 sm:$0xff]  }
 0x2d9   :  { %5171 = vmatprep.subr.bf16.mxu1 %v10292_v8  ;;  %v10352_v8 = vld [vmem:[#allocation2 + $0x122c] ss:$48 sps:$4 sm:$0xff]  }
 0x2db   :  { %5147 = vmatpush2.bf16.msra.mxu0 %v10287_v9  ;;  %v10347_v9 = vld [vmem:[#allocation2 + $0xf28] ss:$48 sps:$4 sm:$0xff]  }
 0x2dc   :  { %5172 = vmatpush1.bf16.msra.mxu1 %v10290_v44  ;;  %5148 = vmatprep.subr.bf16.mxu0 %v10295_v51  ;;  %v10350_v44 = vld [vmem:[#allocation2 + $0x1228] ss:$48 sps:$4 sm:$0xff]  }
 0x2dd   :  { %5173 = vmatprep.subr.bf16.mxu1 %v10298_v11  ;;  %v10355_v51 = vld [vmem:[#allocation6 + $0xac] ss:$12 sps:$4 sm:$0xff]  }
 0x2de   :  { %v10358_v11 = vld [vmem:[#allocation6 + $0x22c] ss:$12 sps:$4 sm:$0xff]  }
 0x2df   :  { %5149 = vmatpush2.bf16.msra.mxu0 %v10293_v12  ;;  %v5244_v12 = vmax.f32 %v11121_v26, 0.0  ;;  %v10777_v26 = vld [vmem:[%s11350_s0 + $0x18] ss:$0 sps:$4 sm:$0xff]  }
 0x2e0   :  { %5174 = vmatpush1.bf16.msra.mxu1 %v10296_v57  ;;  %5150 = vmatprep.subr.bf16.mxu0 %v10301_v15  ;;  %v5246_v57 = vmax.f32 %v11154_v58, 0.0  ;;  %v10353_v15 = vld [vmem:[#allocation6 + $0xa8] ss:$12 sps:$4 sm:$0xff]   ;;  %v10359_v58 = vld [vmem:[#allocation6 + $0x90] ss:$12 sps:$4 sm:$0xff]  }
 0x2e1   :  { %5175 = vmatprep.subr.bf16.mxu1 %v10304_v18  ;;  %v10356_v18 = vld [vmem:[#allocation6 + $0x228] ss:$12 sps:$4 sm:$0xff]  }
 0x2e3   :  { %5151 = vmatpush2.bf16.msra.mxu0 %v10299_v19  ;;  %v11217_v19 = vpack.c.bf16 %v5244_v12, %v5244_v12 }
 0x2e4   :  { %5176 = vmatpush1.bf16.msra.mxu1 %v10302_v20  ;;  %5202 = vmatprep.subr.bf16.mxu0 %v10310_v36  ;;  %v10361_v20 = vld [vmem:[#allocation6 + $0x94] ss:$12 sps:$4 sm:$0xff]   ;;  %v11219_v36 = vpack.c.bf16 %v5246_v57, %v5246_v57  ;;  %v10418_v57 = vld [vmem:[#allocation6 + $0x2bc] ss:$12 sps:$4 sm:$0xff]  }
 0x2e5   :  { %5177 = vmatprep.subr.bf16.mxu1 %v10307_v13  ;;  %v10364_v13 = vld [vmem:[#allocation6 + $0x214] ss:$12 sps:$4 sm:$0xff]  }
 0x2e6   :  { %v4908_v25 = vpop.f32.mrf.mxu0  ;;  %5153 = vmatmul.mubr.bf16.vlgmr.msra.gmra.mxu0 %v11053_v7 }
 0x2e7   :  { %v4867_v24 = vpop.f32.mrf.mxu1  ;;  %5203 = vmatpush1.bf16.msra.mxu0 %v10308_v21  ;;  %5234 = vmatprep.mubr.bf16.mxu0 %v10962_v16  ;;  %v10331_v16 = vld [vmem:[#allocation2 + $0x104c] ss:$48 sps:$4 sm:$0xff]   ;;  %v10367_v21 = vld [vmem:[#allocation6 + $0x7c] ss:$12 sps:$4 sm:$0xff]  }
 0x2e8   :  { %v4868_v27 = vadd.f32 %v4867_v24, %v11202_v53  ;;  %5178 = vmatpush2.bf16.msra.mxu1 %v10305_v47  ;;  %v4910_v40 = vpop.f32.mrf.mxu0  ;;  %5204 = vmatprep.subr.bf16.mxu0 %v10316_v14  ;;  %v10325_v53 = vld [vmem:[#allocation2 + $0x10ac] ss:$48 sps:$4 sm:$0xff]   ;;  %v10365_v14 = vld [vmem:[#allocation6 + $0x78] ss:$12 sps:$4 sm:$0xff]  }
 0x2e9   :  { %v4869_v63 = vpop.f32.mrf.mxu1  ;;  %5179 = vmatprep.subr.bf16.mxu1 %v10313_v22  ;;  %v10362_v47 = vld [vmem:[#allocation6 + $0x210] ss:$12 sps:$4 sm:$0xff]  }
 0x2ea   :  { %v11209_v41 = vadd.f32 %v4908_v25, %v4868_v27  ;;  %v4870_v42 = vadd.f32 %v4869_v63, %v11204_v55  ;;  %v4912_v7 = vpop.f32.mrf.mxu0  ;;  %v10326_v55 = vld [vmem:[#allocation2 + $0x13a8] ss:$48 sps:$4 sm:$0xff]   ;;  %v10373_v24 = vld [vmem:[#allocation6 + $0x64] ss:$12 sps:$4 sm:$0xff]  }
 0x2eb   :  { %v4871_v43 = vpop.f32.mrf.mxu1  ;;  %5205 = vmatpush1.bf16.msra.mxu0 %v10314_v31  ;;  %v10370_v22 = vld [vmem:[#allocation6 + $0x1fc] ss:$12 sps:$4 sm:$0xff]   ;;  %v10376_v25 = vld [vmem:[#allocation6 + $0x1e4] ss:$12 sps:$4 sm:$0xff]   ;;  %v10371_v27 = vld [vmem:[#allocation6 + $0x60] ss:$12 sps:$4 sm:$0xff]  }
 0x2ec   :  { %v11213_v45 = vadd.f32 %v4910_v40, %v4870_v42  ;;  %5180 = vmatpush2.bf16.msra.mxu1 %v10311_v29  ;;  %v4913_v52 = vpop.f32.mrf.mxu0  ;;  %5206 = vmatprep.subr.bf16.mxu0 %v10322_v39  ;;  %v10374_v29 = vld [vmem:[#allocation6 + $0x1e0] ss:$12 sps:$4 sm:$0xff]   ;;  %v10377_v40 = vld [vmem:[#allocation6 + $0x48] ss:$12 sps:$4 sm:$0xff]   ;;  %v10383_v43 = vld [vmem:[#allocation6 + $0x30] ss:$12 sps:$4 sm:$0xff]  }
 0x2ed   :  { %v4872_v50 = vpop.f32.mrf.mxu1  ;;  %5181 = vmatprep.subr.bf16.mxu1 %v10319_v37  ;;  %v10379_v31 = vld [vmem:[#allocation6 + $0x4c] ss:$12 sps:$4 sm:$0xff]   ;;  %v10380_v37 = vld [vmem:[#allocation6 + $0x1c8] ss:$12 sps:$4 sm:$0xff]   ;;  %v10386_v7 = vld [vmem:[#allocation6 + $0x1b0] ss:$12 sps:$4 sm:$0xff]  }
 0x2ee   :  { %v10382_v63 = vld [vmem:[#allocation6 + $0x1cc] ss:$12 sps:$4 sm:$0xff]   ;;  %v10385_v39 = vld [vmem:[#allocation6 + $0x34] ss:$12 sps:$4 sm:$0xff]  }
 0x2ef   :  { %5207 = vmatpush1.bf16.msra.mxu0 %v10320_v48  ;;  %v10388_v42 = vld [vmem:[#allocation6 + $0x1b4] ss:$12 sps:$4 sm:$0xff]   ;;  %v10394_v48 = vld [vmem:[#allocation6 + $0x19c] ss:$12 sps:$4 sm:$0xff]   ;;  %v10389_v50 = vld [vmem:[#allocation6 + $0x18] ss:$12 sps:$4 sm:$0xff]  }
 0x2f0   :  { %5182 = vmatpush2.bf16.msra.mxu1 %v10317_v46  ;;  %5208 = vmatprep.subr.bf16.mxu0 %v10328_v54  ;;  %v10391_v46 = vld [vmem:[#allocation6 + $0x1c] ss:$12 sps:$4 sm:$0xff]   ;;  %v10392_v52 = vld [vmem:[#allocation6 + $0x198] ss:$12 sps:$4 sm:$0xff]  }
 0x2f1   :  { %5183 = vmatprep.subr.bf16.mxu1 %v10325_v53  ;;  %v10397_v53 = vld [vmem:[#allocation6 + $0x4] ss:$12 sps:$4 sm:$0xff]  }
 0x2f2   :  { %v10400_v54 = vld [vmem:[#allocation6 + $0x184] ss:$12 sps:$4 sm:$0xff]  }
 0x2f3   :  { %5209 = vmatpush1.bf16.msra.mxu0 %v10326_v55  ;;  %v10398_v55 = vld [vmem:[#allocation6 + $0x180] ss:$12 sps:$4 sm:$0xff]  }
 0x2f4   :  { %5184 = vmatpush2.bf16.msra.mxu1 %v10323_v56  ;;  %5210 = vmatprep.subr.bf16.mxu0 %v10334_v59  ;;  %v10395_v56 = vld [vmem:[#allocation6] ss:$12 sps:$4 sm:$0xff]  }
 0x2f5   :  { %5185 = vmatprep.subr.bf16.mxu1 %v10331_v16  ;;  %v11227_v16 = vld [vmem:[#allocation4 + $0x8] sm:$0xf]  ;;  %v10403_v59 = vld [vmem:[#allocation6 + $0x16c] ss:$12 sps:$4 sm:$0xff]  }
 0x2f7   :  { %5211 = vmatpush1.bf16.msra.mxu0 %v10332_v62  ;;  %v849_v62 = vrot.slane %v11227_v16, %v11092_v34 }
 0x2f8   :  { %5186 = vmatpush2.bf16.msra.mxu1 %v10329_v6  ;;  %5212 = vmatprep.subr.bf16.mxu0 %v10340_v0  ;;  %v10406_v6 = vld [vmem:[#allocation6 + $0x2ec] ss:$12 sps:$4 sm:$0xff]   ;;  %v10404_v0 = vld [vmem:[#allocation6 + $0x2e8] ss:$12 sps:$4 sm:$0xff]  }
 0x2f9   :  { %5187 = vmatprep.subr.bf16.mxu1 %v10337_v61  ;;  %v10401_v61 = vld [vmem:[#allocation6 + $0x168] ss:$12 sps:$4 sm:$0xff]  }
 0x2fb   :  { %5213 = vmatpush1.bf16.msra.mxu0 %v10338_v1  ;;  %v853_v1 = vrot.slane %v11227_v16, %v11095_v38 }
 0x2fc   :  { %5188 = vmatpush2.bf16.msra.mxu1 %v10335_v60  ;;  %5214 = vmatprep.subr.bf16.mxu0 %v10346_v3  ;;  %v10409_v60 = vld [vmem:[#allocation6 + $0x154] ss:$12 sps:$4 sm:$0xff]  }
 0x2fd   :  { %5189 = vmatprep.subr.bf16.mxu1 %v10343_v2  ;;  %v10412_v2 = vld [vmem:[#allocation6 + $0x2d4] ss:$12 sps:$4 sm:$0xff]  }
 0x2ff   :  { %5215 = vmatpush1.bf16.msra.mxu0 %v10344_v35 }
 0x300   :  { %5190 = vmatpush2.bf16.msra.mxu1 %v10341_v4  ;;  %5216 = vmatprep.subr.bf16.mxu0 %v10352_v8 }
 0x301   :  { %5191 = vmatprep.subr.bf16.mxu1 %v10349_v5  ;;  %v10407_v5 = vld [vmem:[#allocation6 + $0x150] ss:$12 sps:$4 sm:$0xff]  }
 0x303   :  { %5217 = vmatpush1.bf16.msra.mxu0 %v10350_v44  ;;  %v10410_v44 = vld [vmem:[#allocation6 + $0x2d0] ss:$12 sps:$4 sm:$0xff]  }
 0x304   :  { %5192 = vmatpush2.bf16.msra.mxu1 %v10347_v9  ;;  %7204 = vmatprep.subr.bf16.mxu0 %v10355_v51  ;;  %v10415_v51 = vld [vmem:[#allocation6 + $0x13c] ss:$12 sps:$4 sm:$0xff]  }
 0x305   :  { %7245 = vmatprep.subr.bf16.mxu1 %v10358_v11 }
 0x306   :  { %5235 = vmatmul.mubr.bf16.vlgmr.msra.gmra.mxu0 %v10777_v26 }
 0x307   :  { %5194 = vmatmul.mubr.bf16.vlgmr.msra.gmra.mxu1 %v11077_v17  ;;  %7205 = vmatpush1.bf16.msra.mxu0 %v10353_v15  ;;  %v10368_v17 = vld [vmem:[#allocation6 + $0x1f8] ss:$12 sps:$4 sm:$0xff]  }
 0x308   :  { %7236 = vmatprep.mubr.bf16.mxu0 %v11217_v19  ;;  %7246 = vmatpush1.bf16.msra.mxu1 %v10356_v18 }
 0x309   :  { %7277 = vmatprep.mubr.bf16.mxu1 %v11219_v36  ;;  %7206 = vmatprep.subr.bf16.mxu0 %v10361_v20 }
 0x30a   :  { %7247 = vmatprep.subr.bf16.mxu1 %v10364_v13  ;;  %v10413_v13 = vld [vmem:[#allocation6 + $0x138] ss:$12 sps:$4 sm:$0xff]  }
 0x30b   :  { %7207 = vmatpush1.bf16.msra.mxu0 %v10359_v58 }
 0x30c   :  { %7248 = vmatpush1.bf16.msra.mxu1 %v10362_v47  ;;  %7208 = vmatprep.subr.bf16.mxu0 %v10367_v21  ;;  %v10416_v47 = vld [vmem:[#allocation6 + $0x2b8] ss:$12 sps:$4 sm:$0xff]  }
 0x30d   :  { %7249 = vmatprep.subr.bf16.mxu1 %v10370_v22  ;;  %v10421_v21 = vld [vmem:[#allocation6 + $0x124] ss:$12 sps:$4 sm:$0xff]  }
 0x30e   :  { %v10424_v22 = vld [vmem:[#allocation6 + $0x2a4] ss:$12 sps:$4 sm:$0xff]  }
 0x30f   :  { %7209 = vmatpush1.bf16.msra.mxu0 %v10365_v14  ;;  %v10419_v14 = vld [vmem:[#allocation6 + $0x120] ss:$12 sps:$4 sm:$0xff]  }
 0x310   :  { %7250 = vmatpush1.bf16.msra.mxu1 %v10368_v17  ;;  %7210 = vmatprep.subr.bf16.mxu0 %v10373_v24  ;;  %v10422_v17 = vld [vmem:[#allocation6 + $0x2a0] ss:$12 sps:$4 sm:$0xff]  }
 0x311   :  { %7251 = vmatprep.subr.bf16.mxu1 %v10376_v25  ;;  %v10427_v24 = vld [vmem:[#allocation6 + $0x10c] ss:$12 sps:$4 sm:$0xff]  }
 0x312   :  { %v10430_v25 = vld [vmem:[#allocation6 + $0x28c] ss:$12 sps:$4 sm:$0xff]  }
 0x313   :  { %7211 = vmatpush1.bf16.msra.mxu0 %v10371_v27  ;;  %v10425_v27 = vld [vmem:[#allocation6 + $0x108] ss:$12 sps:$4 sm:$0xff]  }
 0x314   :  { %7252 = vmatpush1.bf16.msra.mxu1 %v10374_v29  ;;  %7212 = vmatprep.subr.bf16.mxu0 %v10379_v31  ;;  %v10428_v29 = vld [vmem:[#allocation6 + $0x288] ss:$12 sps:$4 sm:$0xff]  }
 0x315   :  { %7253 = vmatprep.subr.bf16.mxu1 %v10382_v63  ;;  %v10433_v31 = vld [vmem:[#allocation6 + $0xf4] ss:$12 sps:$4 sm:$0xff]  }
 0x316   :  { %v10436_v63 = vld [vmem:[#allocation6 + $0x274] ss:$12 sps:$4 sm:$0xff]  }
 0x317   :  { %7213 = vmatpush1.bf16.msra.mxu0 %v10377_v40  ;;  %v10431_v40 = vld [vmem:[#allocation6 + $0xf0] ss:$12 sps:$4 sm:$0xff]  }
 0x318   :  { %7254 = vmatpush1.bf16.msra.mxu1 %v10380_v37  ;;  %7214 = vmatprep.subr.bf16.mxu0 %v10385_v39  ;;  %v10434_v37 = vld [vmem:[#allocation6 + $0x270] ss:$12 sps:$4 sm:$0xff]  }
 0x319   :  { %7255 = vmatprep.subr.bf16.mxu1 %v10388_v42  ;;  %v10439_v39 = vld [vmem:[#allocation6 + $0xdc] ss:$12 sps:$4 sm:$0xff]  }
 0x31a   :  { %v10442_v42 = vld [vmem:[#allocation6 + $0x25c] ss:$12 sps:$4 sm:$0xff]  }
 0x31b   :  { %7215 = vmatpush1.bf16.msra.mxu0 %v10383_v43  ;;  %v10437_v43 = vld [vmem:[#allocation6 + $0xd8] ss:$12 sps:$4 sm:$0xff]  }
 0x31c   :  { %7256 = vmatpush1.bf16.msra.mxu1 %v10386_v7  ;;  %7216 = vmatprep.subr.bf16.mxu0 %v10391_v46  ;;  %v10440_v7 = vld [vmem:[#allocation6 + $0x258] ss:$12 sps:$4 sm:$0xff]  }
 0x31d   :  { %7257 = vmatprep.subr.bf16.mxu1 %v10394_v48  ;;  %v10445_v46 = vld [vmem:[#allocation6 + $0xc4] ss:$12 sps:$4 sm:$0xff]  }
 0x31e   :  { %v10448_v48 = vld [vmem:[#allocation6 + $0x244] ss:$12 sps:$4 sm:$0xff]  }
 0x31f   :  { %7217 = vmatpush1.bf16.msra.mxu0 %v10389_v50  ;;  %v10443_v50 = vld [vmem:[#allocation6 + $0xc0] ss:$12 sps:$4 sm:$0xff]  }
 0x320   :  { %7258 = vmatpush1.bf16.msra.mxu1 %v10392_v52  ;;  %7218 = vmatprep.subr.bf16.mxu0 %v10397_v53  ;;  %v5243_v52 = vmax.f32 %v11116_v23, 0.0  ;;  %v10446_v53 = vld [vmem:[#allocation6 + $0x240] ss:$12 sps:$4 sm:$0xff]  }
 0x321   :  { %7259 = vmatprep.subr.bf16.mxu1 %v10400_v54  ;;  %v10451_v54 = vld [vmem:[#allocation6 + $0x3ac] ss:$12 sps:$4 sm:$0xff]  }
 0x323   :  { %7219 = vmatpush1.bf16.msra.mxu0 %v10395_v56  ;;  %v5245_v56 = vmax.f32 %v11150_v49, 0.0 }
 0x324   :  { %7260 = vmatpush1.bf16.msra.mxu1 %v10398_v55  ;;  %7220 = vmatprep.subr.bf16.mxu0 %v10403_v59  ;;  %v10454_v55 = vld [vmem:[#allocation6 + $0x52c] ss:$12 sps:$4 sm:$0xff]   ;;  %v5248_v59 = vmax.f32 %v11189_v30, 0.0  ;;  %v10460_v30 = vld [vmem:[#allocation6 + $0x514] ss:$12 sps:$4 sm:$0xff]  }
 0x325   :  { %7261 = vmatprep.subr.bf16.mxu1 %v10406_v6  ;;  %v5250_v6 = vmax.f32 %v11213_v45, 0.0  ;;  %v11243_v23 = vpack.c.bf16 %v5245_v56, %v5245_v56  ;;  %v10455_v45 = vld [vmem:[#allocation6 + $0x390] ss:$12 sps:$4 sm:$0xff]  }
 0x326   :  { %v4949_v3 = vpop.f32.mrf.mxu0  ;;  %v10506_v56 = vld [vmem:[#allocation6 + $0x5d0] ss:$12 sps:$4 sm:$0xff]  }
 0x327   :  { %v4990_v4 = vpop.f32.mrf.mxu1  ;;  %v4950_v35 = vadd.f32 %v4949_v3, %v849_v62  ;;  %7221 = vmatpush2.bf16.msra.mxu0 %v10401_v61  ;;  %v10449_v62 = vld [vmem:[#allocation6 + $0x3a8] ss:$12 sps:$4 sm:$0xff]   ;;  %v11241_v61 = vpack.c.bf16 %v5243_v52, %v5243_v52 }
 0x328   :  { %7262 = vmatpush2.bf16.msra.mxu1 %v10404_v0  ;;  %v4951_v8 = vpop.f32.mrf.mxu0  ;;  %7222 = vmatprep.subr.bf16.mxu0 %v10409_v60  ;;  %v10452_v0 = vld [vmem:[#allocation6 + $0x528] ss:$12 sps:$4 sm:$0xff]  }
 0x329   :  { %v4992_v9 = vpop.f32.mrf.mxu1  ;;  %v11233_v11 = vadd.f32 %v4990_v4, %v4950_v35  ;;  %v4952_v12 = vadd.f32 %v4951_v8, %v853_v1  ;;  %7263 = vmatprep.subr.bf16.mxu1 %v10412_v2  ;;  %v10457_v60 = vld [vmem:[#allocation6 + $0x394] ss:$12 sps:$4 sm:$0xff]   ;;  %v11245_v1 = vpack.c.bf16 %v5248_v59, %v5248_v59  ;;  %v11250_v2 = vpack.c.bf16 %v5250_v6, %v5250_v6  ;;  %v10458_v4 = vld [vmem:[#allocation6 + $0x510] ss:$12 sps:$4 sm:$0xff]  }
 0x32a   :  { %v4953_v15 = vpop.f32.mrf.mxu0  ;;  %v10463_v35 = vld [vmem:[#allocation6 + $0x37c] ss:$12 sps:$4 sm:$0xff]  }
 0x32b   :  { %v4994_v18 = vpop.f32.mrf.mxu1  ;;  %v11235_v20 = vadd.f32 %v4992_v9, %v4952_v12  ;;  %7223 = vmatpush2.bf16.msra.mxu0 %v10407_v5  ;;  %v10466_v5 = vld [vmem:[#allocation6 + $0x4fc] ss:$12 sps:$4 sm:$0xff]   ;;  %v10461_v9 = vld [vmem:[#allocation6 + $0x378] ss:$12 sps:$4 sm:$0xff]   ;;  %v10467_v15 = vld [vmem:[#allocation6 + $0x360] ss:$12 sps:$4 sm:$0xff]  }
 0x32c   :  { %7264 = vmatpush2.bf16.msra.mxu1 %v10410_v44  ;;  %v4954_v26 = vpop.f32.mrf.mxu0  ;;  %7224 = vmatprep.subr.bf16.mxu0 %v10415_v51  ;;  %v10464_v51 = vld [vmem:[#allocation6 + $0x4f8] ss:$12 sps:$4 sm:$0xff]   ;;  %v10470_v18 = vld [vmem:[#allocation6 + $0x4e0] ss:$12 sps:$4 sm:$0xff]   ;;  %v10514_v6 = vld [vmem:[#allocation6 + $0x5bc] ss:$12 sps:$4 sm:$0xff]  }
 0x32d   :  { %v4995_v58 = vpop.f32.mrf.mxu1  ;;  %7265 = vmatprep.subr.bf16.mxu1 %v10418_v57  ;;  %v10469_v12 = vld [vmem:[#allocation6 + $0x364] ss:$12 sps:$4 sm:$0xff]   ;;  %v10478_v26 = vld [vmem:[#allocation6 + $0x4cc] ss:$12 sps:$4 sm:$0xff]  }
 0x32e   :  { %v10472_v57 = vld [vmem:[#allocation6 + $0x4e4] ss:$12 sps:$4 sm:$0xff]   ;;  %v10473_v58 = vld [vmem:[#allocation6 + $0x348] ss:$12 sps:$4 sm:$0xff]  }
 0x32f   :  { %7225 = vmatpush2.bf16.msra.mxu0 %v10413_v13  ;;  %v10475_v13 = vld [vmem:[#allocation6 + $0x34c] ss:$12 sps:$4 sm:$0xff]  }
 0x330   :  { %7266 = vmatpush2.bf16.msra.mxu1 %v10416_v47  ;;  %7226 = vmatprep.subr.bf16.mxu0 %v10421_v21  ;;  %v10476_v47 = vld [vmem:[#allocation6 + $0x4c8] ss:$12 sps:$4 sm:$0xff]  }
 0x331   :  { %7267 = vmatprep.subr.bf16.mxu1 %v10424_v22  ;;  %v10481_v21 = vld [vmem:[#allocation6 + $0x334] ss:$12 sps:$4 sm:$0xff]  }
 0x332   :  { %v10484_v22 = vld [vmem:[#allocation6 + $0x4b4] ss:$12 sps:$4 sm:$0xff]  }
 0x333   :  { %7227 = vmatpush2.bf16.msra.mxu0 %v10419_v14  ;;  %v10479_v14 = vld [vmem:[#allocation6 + $0x330] ss:$12 sps:$4 sm:$0xff]  }
 0x334   :  { %7268 = vmatpush2.bf16.msra.mxu1 %v10422_v17  ;;  %7228 = vmatprep.subr.bf16.mxu0 %v10427_v24  ;;  %v10482_v17 = vld [vmem:[#allocation6 + $0x4b0] ss:$12 sps:$4 sm:$0xff]  }
 0x335   :  { %7269 = vmatprep.subr.bf16.mxu1 %v10430_v25  ;;  %v10487_v24 = vld [vmem:[#allocation6 + $0x31c] ss:$12 sps:$4 sm:$0xff]  }
 0x336   :  { %v10490_v25 = vld [vmem:[#allocation6 + $0x49c] ss:$12 sps:$4 sm:$0xff]  }
 0x337   :  { %7229 = vmatpush2.bf16.msra.mxu0 %v10425_v27  ;;  %v10485_v27 = vld [vmem:[#allocation6 + $0x318] ss:$12 sps:$4 sm:$0xff]  }
 0x338   :  { %7270 = vmatpush2.bf16.msra.mxu1 %v10428_v29  ;;  %7230 = vmatprep.subr.bf16.mxu0 %v10433_v31  ;;  %v10488_v29 = vld [vmem:[#allocation6 + $0x498] ss:$12 sps:$4 sm:$0xff]  }
 0x339   :  { %7271 = vmatprep.subr.bf16.mxu1 %v10436_v63  ;;  %v10493_v31 = vld [vmem:[#allocation6 + $0x304] ss:$12 sps:$4 sm:$0xff]  }
 0x33a   :  { %v10496_v63 = vld [vmem:[#allocation6 + $0x484] ss:$12 sps:$4 sm:$0xff]  }
 0x33b   :  { %7231 = vmatpush2.bf16.msra.mxu0 %v10431_v40  ;;  %v10491_v40 = vld [vmem:[#allocation6 + $0x300] ss:$12 sps:$4 sm:$0xff]  }
 0x33c   :  { %7272 = vmatpush2.bf16.msra.mxu1 %v10434_v37  ;;  %7232 = vmatprep.subr.bf16.mxu0 %v10439_v39  ;;  %v10494_v37 = vld [vmem:[#allocation6 + $0x480] ss:$12 sps:$4 sm:$0xff]  }
 0x33d   :  { %7273 = vmatprep.subr.bf16.mxu1 %v10442_v42  ;;  %v10499_v39 = vld [vmem:[#allocation6 + $0x46c] ss:$12 sps:$4 sm:$0xff]  }
 0x33e   :  { %v10502_v42 = vld [vmem:[#allocation6 + $0x5ec] ss:$12 sps:$4 sm:$0xff]  }
 0x33f   :  { %7233 = vmatpush2.bf16.msra.mxu0 %v10437_v43  ;;  %v10497_v43 = vld [vmem:[#allocation6 + $0x468] ss:$12 sps:$4 sm:$0xff]  }
 0x340   :  { %7274 = vmatpush2.bf16.msra.mxu1 %v10440_v7  ;;  %7234 = vmatprep.subr.bf16.mxu0 %v10445_v46  ;;  %v10500_v7 = vld [vmem:[#allocation6 + $0x5e8] ss:$12 sps:$4 sm:$0xff]  }
 0x341   :  { %7275 = vmatprep.subr.bf16.mxu1 %v10448_v48  ;;  %v10505_v46 = vld [vmem:[#allocation6 + $0x454] ss:$12 sps:$4 sm:$0xff]  }
 0x342   :  { %v10508_v48 = vld [vmem:[#allocation6 + $0x5d4] ss:$12 sps:$4 sm:$0xff]  }
 0x343   :  { %7235 = vmatpush2.bf16.msra.mxu0 %v10443_v50 }
 0x344   :  { %7276 = vmatpush2.bf16.msra.mxu1 %v10446_v53  ;;  %7286 = vmatprep.subr.bf16.mxu0 %v10451_v54  ;;  %v10503_v53 = vld [vmem:[#allocation6 + $0x450] ss:$12 sps:$4 sm:$0xff]  }
 0x345   :  { %7327 = vmatprep.subr.bf16.mxu1 %v10454_v55  ;;  %v10511_v55 = vld [vmem:[#allocation6 + $0x43c] ss:$12 sps:$4 sm:$0xff]  }
 0x346   :  { %7237 = vmatmul.mubr.bf16.vlgmr.msra.gmra.mxu0 %v11241_v61 }
 0x347   :  { %v11247_v49 = vpop.f32.mrf.mxu1  ;;  %7278 = vmatmul.mubr.bf16.vlgmr.msra.gmra.mxu1 %v11243_v23  ;;  %7287 = vmatpush1.bf16.msra.mxu0 %v10449_v62 }
 0x348   :  { %7318 = vmatprep.mubr.bf16.mxu0 %v11245_v1  ;;  %7328 = vmatpush1.bf16.msra.mxu1 %v10452_v0  ;;  %v10509_v0 = vld [vmem:[#allocation6 + $0x438] ss:$12 sps:$4 sm:$0xff]  }
 0x349   :  { %v11254_v3 = vpop.f32.mrf.mxu1  ;;  %7359 = vmatprep.mubr.bf16.mxu1 %v11250_v2  ;;  %7288 = vmatprep.subr.bf16.mxu0 %v10457_v60 }
 0x34a   :  { %7329 = vmatprep.subr.bf16.mxu1 %v10460_v30  ;;  %v10512_v30 = vld [vmem:[#allocation6 + $0x5b8] ss:$12 sps:$4 sm:$0xff]  }
 0x34b   :  { %v5076_v8 = vpop.f32.mrf.mxu1  ;;  %7289 = vmatpush1.bf16.msra.mxu0 %v10455_v45  ;;  %v10520_v45 = vld [vmem:[#allocation6 + $0x5a4] ss:$12 sps:$4 sm:$0xff]  }
 0x34c   :  { %7330 = vmatpush1.bf16.msra.mxu1 %v10458_v4  ;;  %7290 = vmatprep.subr.bf16.mxu0 %v10463_v35  ;;  %v10515_v4 = vld [vmem:[#allocation6 + $0x420] ss:$12 sps:$4 sm:$0xff]   ;;  %v10521_v8 = vld [vmem:[#allocation6 + $0x408] ss:$12 sps:$4 sm:$0xff]  }
 0x34d   :  { %v5077_v44 = vpop.f32.mrf.mxu1  ;;  %7331 = vmatprep.subr.bf16.mxu1 %v10466_v5  ;;  %v10518_v35 = vld [vmem:[#allocation6 + $0x5a0] ss:$12 sps:$4 sm:$0xff]  }
 0x34e   :  { %v10523_v5 = vld [vmem:[#allocation6 + $0x40c] ss:$12 sps:$4 sm:$0xff]   ;;  %v10529_v44 = vld [vmem:[#allocation6 + $0x3f4] ss:$12 sps:$4 sm:$0xff]  }
 0x34f   :  { %7291 = vmatpush1.bf16.msra.mxu0 %v10461_v9  ;;  %v10524_v9 = vld [vmem:[#allocation6 + $0x588] ss:$12 sps:$4 sm:$0xff]  }
 0x350   :  { %7332 = vmatpush1.bf16.msra.mxu1 %v10464_v51  ;;  %7292 = vmatprep.subr.bf16.mxu0 %v10469_v12  ;;  %v10532_v51 = vld [vmem:[#allocation6 + $0x574] ss:$12 sps:$4 sm:$0xff]   ;;  %v10527_v12 = vld [vmem:[#allocation6 + $0x3f0] ss:$12 sps:$4 sm:$0xff]  }
 0x351   :  { %7333 = vmatprep.subr.bf16.mxu1 %v10472_v57  ;;  %v10530_v57 = vld [vmem:[#allocation6 + $0x570] ss:$12 sps:$4 sm:$0xff]  }
 0x353   :  { %7293 = vmatpush1.bf16.msra.mxu0 %v10467_v15  ;;  %v10535_v15 = vld [vmem:[#allocation6 + $0x3dc] ss:$12 sps:$4 sm:$0xff]  }
 0x354   :  { %7334 = vmatpush1.bf16.msra.mxu1 %v10470_v18  ;;  %7294 = vmatprep.subr.bf16.mxu0 %v10475_v13  ;;  %v10538_v18 = vld [vmem:[#allocation6 + $0x55c] ss:$12 sps:$4 sm:$0xff]  }
 0x355   :  { %7335 = vmatprep.subr.bf16.mxu1 %v10478_v26  ;;  %v10533_v26 = vld [vmem:[#allocation6 + $0x3d8] ss:$12 sps:$4 sm:$0xff]  }
 0x357   :  { %7295 = vmatpush1.bf16.msra.mxu0 %v10473_v58  ;;  %v10536_v58 = vld [vmem:[#allocation6 + $0x558] ss:$12 sps:$4 sm:$0xff]  }
 0x358   :  { %7336 = vmatpush1.bf16.msra.mxu1 %v10476_v47  ;;  %7296 = vmatprep.subr.bf16.mxu0 %v10481_v21  ;;  %v10541_v47 = vld [vmem:[#allocation6 + $0x3c4] ss:$12 sps:$4 sm:$0xff]  }
 0x359   :  { %7337 = vmatprep.subr.bf16.mxu1 %v10484_v22  ;;  %v10544_v21 = vld [vmem:[#allocation6 + $0x544] ss:$12 sps:$4 sm:$0xff]  }
 0x35b   :  { %7297 = vmatpush1.bf16.msra.mxu0 %v10479_v14  ;;  %v10539_v14 = vld [vmem:[#allocation6 + $0x3c0] ss:$12 sps:$4 sm:$0xff]  }
 0x35c   :  { %7338 = vmatpush1.bf16.msra.mxu1 %v10482_v17  ;;  %7298 = vmatprep.subr.bf16.mxu0 %v10487_v24  ;;  %v5247_v17 = vmax.f32 %v11184_v10, 0.0  ;;  %v10542_v24 = vld [vmem:[#allocation6 + $0x540] ss:$12 sps:$4 sm:$0xff]  }
 0x35d   :  { %7339 = vmatprep.subr.bf16.mxu1 %v10490_v25  ;;  %v10547_v25 = vld [vmem:[#allocation6 + $0x6ac] ss:$12 sps:$4 sm:$0xff]  }
 0x35f   :  { %7299 = vmatpush1.bf16.msra.mxu0 %v10485_v27  ;;  %v10556_v27 = vld [vmem:[#allocation6 + $0x82c] ss:$12 sps:$4 sm:$0xff]  }
 0x360   :  { %7340 = vmatpush1.bf16.msra.mxu1 %v10488_v29  ;;  %7300 = vmatprep.subr.bf16.mxu0 %v10493_v31  ;;  %v10545_v31 = vld [vmem:[#allocation6 + $0x6a8] ss:$12 sps:$4 sm:$0xff]  }
 0x361   :  { %7341 = vmatprep.subr.bf16.mxu1 %v10496_v63  ;;  %v11265_v63 = vpack.c.bf16 %v5247_v17, %v5247_v17 }
 0x363   :  { %7301 = vmatpush1.bf16.msra.mxu0 %v10491_v40 }
 0x364   :  { %7342 = vmatpush1.bf16.msra.mxu1 %v10494_v37  ;;  %7302 = vmatprep.subr.bf16.mxu0 %v10499_v39  ;;  %v10554_v37 = vld [vmem:[#allocation6 + $0x828] ss:$12 sps:$4 sm:$0xff]  }
 0x365   :  { %7343 = vmatprep.subr.bf16.mxu1 %v10502_v42  ;;  %v10548_v42 = vld [vmem:[#allocation6 + $0x690] ss:$12 sps:$4 sm:$0xff]  }
 0x366   :  { %v5031_v50 = vpop.f32.mrf.mxu0 }
 0x367   :  { %v5032_v52 = vadd.f32 %v5031_v50, %v11233_v11  ;;  %7303 = vmatpush2.bf16.msra.mxu0 %v10497_v43  ;;  %v10517_v11 = vld [vmem:[#allocation6 + $0x424] ss:$12 sps:$4 sm:$0xff]   ;;  %v10568_v50 = vld [vmem:[#allocation6 + $0x7fc] ss:$12 sps:$4 sm:$0xff]  }
 0x368   :  { %7344 = vmatpush2.bf16.msra.mxu1 %v10500_v7  ;;  %v5033_v54 = vpop.f32.mrf.mxu0  ;;  %7304 = vmatprep.subr.bf16.mxu0 %v10505_v46  ;;  %v10553_v7 = vld [vmem:[#allocation6 + $0x67c] ss:$12 sps:$4 sm:$0xff]  }
 0x369   :  { %v11259_v59 = vadd.f32 %v11247_v49, %v5032_v52  ;;  %7345 = vmatprep.subr.bf16.mxu1 %v10508_v48  ;;  %v10526_v49 = vld [vmem:[#allocation6 + $0x58c] ss:$12 sps:$4 sm:$0xff]   ;;  %v5034_v13 = vadd.f32 %v5033_v54, %v11235_v20  ;;  %v5249_v20 = vmax.f32 %v11209_v41, 0.0  ;;  %v10562_v41 = vld [vmem:[#allocation6 + $0x814] ss:$12 sps:$4 sm:$0xff]  }
 0x36a   :  { %v5035_v62 = vpop.f32.mrf.mxu0  ;;  %v10560_v46 = vld [vmem:[#allocation6 + $0x810] ss:$12 sps:$4 sm:$0xff]   ;;  %v10551_v52 = vld [vmem:[#allocation6 + $0x678] ss:$12 sps:$4 sm:$0xff]  }
 0x36b   :  { %7305 = vmatpush2.bf16.msra.mxu0 %v10503_v53  ;;  %v5075_v22 = vadd.f32 %v11254_v3, %v5034_v13  ;;  %v10550_v3 = vld [vmem:[#allocation6 + $0x694] ss:$12 sps:$4 sm:$0xff]   ;;  %v11267_v40 = vpack.c.bf16 %v5249_v20, %v5249_v20  ;;  %v10559_v54 = vld [vmem:[#allocation6 + $0x664] ss:$12 sps:$4 sm:$0xff]   ;;  %v10565_v62 = vld [vmem:[#allocation6 + $0x64c] ss:$12 sps:$4 sm:$0xff]  }
 0x36c   :  { %7346 = vmatpush2.bf16.msra.mxu1 %v10506_v56  ;;  %v5036_v60 = vpop.f32.mrf.mxu0  ;;  %7306 = vmatprep.subr.bf16.mxu0 %v10511_v55  ;;  %v10566_v56 = vld [vmem:[#allocation6 + $0x7f8] ss:$12 sps:$4 sm:$0xff]  }
 0x36d   :  { %7347 = vmatprep.subr.bf16.mxu1 %v10514_v6  ;;  %v5252_v29 = vmax.f32 %v5075_v22, 0.0  ;;  %v10574_v55 = vld [vmem:[#allocation6 + $0x7e4] ss:$12 sps:$4 sm:$0xff]   ;;  %v10557_v6 = vld [vmem:[#allocation6 + $0x660] ss:$12 sps:$4 sm:$0xff]  }
 0x36e   :  { %v10580_v60 = vld [vmem:[#allocation6 + $0x7cc] ss:$12 sps:$4 sm:$0xff]   ;;  %v10610_v22 = vld [vmem:[#allocation6 + $0x8d4] ss:$12 sps:$4 sm:$0xff]  }
 0x36f   :  { %7307 = vmatpush2.bf16.msra.mxu0 %v10509_v0  ;;  %v11269_v10 = vpack.c.bf16 %v5252_v29, %v5252_v29  ;;  %v10572_v0 = vld [vmem:[#allocation6 + $0x7e0] ss:$12 sps:$4 sm:$0xff]   ;;  %v10599_v29 = vld [vmem:[#allocation6 + $0x738] ss:$12 sps:$4 sm:$0xff]  }
 0x370   :  { %7348 = vmatpush2.bf16.msra.mxu1 %v10512_v30  ;;  %7308 = vmatprep.subr.bf16.mxu0 %v10517_v11  ;;  %v10563_v30 = vld [vmem:[#allocation6 + $0x648] ss:$12 sps:$4 sm:$0xff]   ;;  %v10604_v13 = vld [vmem:[#allocation6 + $0x8ec] ss:$12 sps:$4 sm:$0xff]  }
 0x371   :  { %7349 = vmatprep.subr.bf16.mxu1 %v10520_v45  ;;  %v10571_v11 = vld [vmem:[#allocation6 + $0x634] ss:$12 sps:$4 sm:$0xff]  }
 0x372   :  { %v10578_v45 = vld [vmem:[#allocation6 + $0x7c8] ss:$12 sps:$4 sm:$0xff]  }
 0x373   :  { %7309 = vmatpush2.bf16.msra.mxu0 %v10515_v4  ;;  %v10586_v4 = vld [vmem:[#allocation6 + $0x7b4] ss:$12 sps:$4 sm:$0xff]  }
 0x374   :  { %7350 = vmatpush2.bf16.msra.mxu1 %v10518_v35  ;;  %7310 = vmatprep.subr.bf16.mxu0 %v10523_v5  ;;  %v10569_v35 = vld [vmem:[#allocation6 + $0x630] ss:$12 sps:$4 sm:$0xff]  }
 0x375   :  { %7351 = vmatprep.subr.bf16.mxu1 %v10526_v49  ;;  %v10577_v5 = vld [vmem:[#allocation6 + $0x61c] ss:$12 sps:$4 sm:$0xff]  }
 0x376   :  { %v10584_v49 = vld [vmem:[#allocation6 + $0x7b0] ss:$12 sps:$4 sm:$0xff]  }
 0x377   :  { %7311 = vmatpush2.bf16.msra.mxu0 %v10521_v8  ;;  %v10592_v8 = vld [vmem:[#allocation6 + $0x79c] ss:$12 sps:$4 sm:$0xff]  }
 0x378   :  { %7352 = vmatpush2.bf16.msra.mxu1 %v10524_v9  ;;  %7312 = vmatprep.subr.bf16.mxu0 %v10529_v44  ;;  %v10575_v9 = vld [vmem:[#allocation6 + $0x618] ss:$12 sps:$4 sm:$0xff]  }
 0x379   :  { %7353 = vmatprep.subr.bf16.mxu1 %v10532_v51  ;;  %v10583_v44 = vld [vmem:[#allocation6 + $0x604] ss:$12 sps:$4 sm:$0xff]  }
 0x37a   :  { %v10590_v51 = vld [vmem:[#allocation6 + $0x798] ss:$12 sps:$4 sm:$0xff]  }
 0x37b   :  { %7313 = vmatpush2.bf16.msra.mxu0 %v10527_v12  ;;  %v10598_v12 = vld [vmem:[#allocation6 + $0x784] ss:$12 sps:$4 sm:$0xff]  }
 0x37c   :  { %7354 = vmatpush2.bf16.msra.mxu1 %v10530_v57  ;;  %7314 = vmatprep.subr.bf16.mxu0 %v10535_v15  ;;  %v10581_v57 = vld [vmem:[#allocation6 + $0x600] ss:$12 sps:$4 sm:$0xff]  }
 0x37d   :  { %7355 = vmatprep.subr.bf16.mxu1 %v10538_v18  ;;  %v10589_v15 = vld [vmem:[#allocation6 + $0x76c] ss:$12 sps:$4 sm:$0xff]  }
 0x37e   :  { %v10596_v18 = vld [vmem:[#allocation6 + $0x780] ss:$12 sps:$4 sm:$0xff]  }
 0x37f   :  { %7315 = vmatpush2.bf16.msra.mxu0 %v10533_v26  ;;  %v10587_v26 = vld [vmem:[#allocation6 + $0x768] ss:$12 sps:$4 sm:$0xff]  }
 0x380   :  { %7356 = vmatpush2.bf16.msra.mxu1 %v10536_v58  ;;  %7316 = vmatprep.subr.bf16.mxu0 %v10541_v47  ;;  %v10595_v58 = vld [vmem:[#allocation6 + $0x754] ss:$12 sps:$4 sm:$0xff]  }
 0x381   :  { %7357 = vmatprep.subr.bf16.mxu1 %v10544_v21  ;;  %v10602_v47 = vld [vmem:[#allocation6 + $0x8e8] ss:$12 sps:$4 sm:$0xff]  }
 0x383   :  { %7317 = vmatpush2.bf16.msra.mxu0 %v10539_v14  ;;  %v10593_v14 = vld [vmem:[#allocation6 + $0x750] ss:$12 sps:$4 sm:$0xff]  }
 0x384   :  { %7358 = vmatpush2.bf16.msra.mxu1 %v10542_v24  ;;  %7368 = vmatprep.subr.bf16.mxu0 %v10547_v25  ;;  %v10601_v24 = vld [vmem:[#allocation6 + $0x73c] ss:$12 sps:$4 sm:$0xff]  }
 0x385   :  { %7409 = vmatprep.subr.bf16.mxu1 %v10556_v27  ;;  %v10608_v25 = vld [vmem:[#allocation6 + $0x8d0] ss:$12 sps:$4 sm:$0xff]  }
 0x386   :  { %7319 = vmatmul.mubr.bf16.vlgmr.msra.gmra.mxu0 %v11265_v63  ;;  %v10616_v27 = vld [vmem:[#allocation6 + $0x8bc] ss:$12 sps:$4 sm:$0xff]  }
 0x387   :  { %v11271_v39 = vpop.f32.mrf.mxu1  ;;  %7360 = vmatmul.mubr.bf16.vlgmr.msra.gmra.mxu1 %v11267_v40  ;;  %7369 = vmatpush1.bf16.msra.mxu0 %v10545_v31 }
 0x388   :  { %7400 = vmatprep.mubr.bf16.mxu0 %v11269_v10  ;;  %7370 = vmatprep.subr.bf16.mxu0 %v10550_v3  ;;  %v10607_v3 = vld [vmem:[#allocation6 + $0x724] ss:$12 sps:$4 sm:$0xff]  }
 0x389   :  { %v11276_v43 = vpop.f32.mrf.mxu1  ;;  %7410 = vmatpush1.bf16.msra.mxu1 %v10554_v37  ;;  %v10614_v37 = vld [vmem:[#allocation6 + $0x8b8] ss:$12 sps:$4 sm:$0xff]  }
 0x38a   :  { %7411 = vmatprep.subr.bf16.mxu1 %v10562_v41  ;;  %v10622_v41 = vld [vmem:[#allocation6 + $0x8a4] ss:$12 sps:$4 sm:$0xff]  }
 0x38b   :  { %v5117_v48 = vpop.f32.mrf.mxu1  ;;  %7371 = vmatpush1.bf16.msra.mxu0 %v10548_v42  ;;  %v10605_v42 = vld [vmem:[#allocation6 + $0x720] ss:$12 sps:$4 sm:$0xff]  }
 0x38c   :  { %7372 = vmatprep.subr.bf16.mxu0 %v10553_v7  ;;  %v10613_v7 = vld [vmem:[#allocation6 + $0x70c] ss:$12 sps:$4 sm:$0xff]  }
 0x38d   :  { %v5118_v53 = vpop.f32.mrf.mxu1  ;;  %7412 = vmatpush1.bf16.msra.mxu1 %v10560_v46  ;;  %v10620_v46 = vld [vmem:[#allocation6 + $0x8a0] ss:$12 sps:$4 sm:$0xff]  }
 0x38e   :  { %7413 = vmatprep.subr.bf16.mxu1 %v10568_v50  ;;  %v10628_v48 = vld [vmem:[#allocation6 + $0x88c] ss:$12 sps:$4 sm:$0xff]   ;;  %v10611_v50 = vld [vmem:[#allocation6 + $0x708] ss:$12 sps:$4 sm:$0xff]  }
 0x38f   :  { %7373 = vmatpush1.bf16.msra.mxu0 %v10551_v52  ;;  %v10619_v52 = vld [vmem:[#allocation6 + $0x6f4] ss:$12 sps:$4 sm:$0xff]  }
 0x390   :  { %7374 = vmatprep.subr.bf16.mxu0 %v10559_v54  ;;  %v10626_v53 = vld [vmem:[#allocation6 + $0x888] ss:$12 sps:$4 sm:$0xff]  }
 0x391   :  { %7414 = vmatpush1.bf16.msra.mxu1 %v10566_v56  ;;  %v10634_v54 = vld [vmem:[#allocation6 + $0x874] ss:$12 sps:$4 sm:$0xff]   ;;  %v10617_v56 = vld [vmem:[#allocation6 + $0x6f0] ss:$12 sps:$4 sm:$0xff]  }
 0x392   :  { %7415 = vmatprep.subr.bf16.mxu1 %v10574_v55  ;;  %v10625_v55 = vld [vmem:[#allocation6 + $0x6dc] ss:$12 sps:$4 sm:$0xff]  }
 0x393   :  { %7375 = vmatpush1.bf16.msra.mxu0 %v10557_v6  ;;  %v10632_v6 = vld [vmem:[#allocation6 + $0x870] ss:$12 sps:$4 sm:$0xff]  }
 0x394   :  { %7376 = vmatprep.subr.bf16.mxu0 %v10565_v62  ;;  %v10639_v62 = vld [vmem:[#allocation6 + $0x85c] ss:$12 sps:$4 sm:$0xff]  }
 0x395   :  { %7416 = vmatpush1.bf16.msra.mxu1 %v10572_v0  ;;  %v10623_v0 = vld [vmem:[#allocation6 + $0x6d8] ss:$12 sps:$4 sm:$0xff]  }
 0x396   :  { %7417 = vmatprep.subr.bf16.mxu1 %v10580_v60  ;;  %v10631_v60 = vld [vmem:[#allocation6 + $0x6c4] ss:$12 sps:$4 sm:$0xff]  }
 0x397   :  { %7377 = vmatpush1.bf16.msra.mxu0 %v10563_v30  ;;  %v10637_v30 = vld [vmem:[#allocation6 + $0x858] ss:$12 sps:$4 sm:$0xff]  }
 0x398   :  { %7378 = vmatprep.subr.bf16.mxu0 %v10571_v11  ;;  %v10644_v11 = vld [vmem:[#allocation6 + $0x844] ss:$12 sps:$4 sm:$0xff]  }
 0x399   :  { %7418 = vmatpush1.bf16.msra.mxu1 %v10578_v45  ;;  %v857_v45 = vrot.slane %v11227_v16, %v11130_v32 }
 0x39a   :  { %7419 = vmatprep.subr.bf16.mxu1 %v10586_v4  ;;  %v10629_v4 = vld [vmem:[#allocation6 + $0x6c0] ss:$12 sps:$4 sm:$0xff]  }
 0x39b   :  { %7379 = vmatpush1.bf16.msra.mxu0 %v10569_v35  ;;  %v5251_v35 = vmax.f32 %v11259_v59, 0.0 }
 0x39c   :  { %7380 = vmatprep.subr.bf16.mxu0 %v10577_v5  ;;  %v10635_v5 = vld [vmem:[#allocation6 + $0x170] ss:$12 sps:$4 sm:$0xff]  }
 0x39d   :  { %7420 = vmatpush1.bf16.msra.mxu1 %v10584_v49  ;;  %v861_v49 = vrot.slane %v11227_v16, %v828_v33 }
 0x39e   :  { %7421 = vmatprep.subr.bf16.mxu1 %v10592_v8  ;;  %v10642_v8 = vld [vmem:[#allocation6 + $0x840] ss:$12 sps:$4 sm:$0xff]  }
 0x39f   :  { %7381 = vmatpush1.bf16.msra.mxu0 %v10575_v9  ;;  %v10647_v9 = vld [vmem:[#allocation6 + $0x2f0] ss:$12 sps:$4 sm:$0xff]   ;;  %v5116_v59 = vadd.f32 %v11276_v43, %v861_v49  ;;  %v10672_v49 = vld [vmem:[#allocation6 + $0x1a0] ss:$12 sps:$4 sm:$0xff]  }
 0x3a0   :  { %7382 = vmatprep.subr.bf16.mxu0 %v10583_v44  ;;  %v5114_v44 = vadd.f32 %v11271_v39, %v857_v45  ;;  %v10641_v39 = vld [vmem:[#allocation6 + $0x98] ss:$12 sps:$4 sm:$0xff]  }
 0x3a1   :  { %7422 = vmatpush1.bf16.msra.mxu1 %v10590_v51  ;;  %v10636_v51 = vld [vmem:[#allocation6 + $0xb0] ss:$12 sps:$4 sm:$0xff]   ;;  %v10668_v45 = vld [vmem:[#allocation6 + $0x1b8] ss:$12 sps:$4 sm:$0xff]  }
 0x3a2   :  { %7423 = vmatprep.subr.bf16.mxu1 %v10598_v12  ;;  %v11289_v12 = vpack.c.bf16 %v5251_v35, %v5251_v35  ;;  %v10671_v35 = vld [vmem:[#allocation6 + $0x260] ss:$12 sps:$4 sm:$0xff]  }
 0x3a3   :  { %7383 = vmatpush1.bf16.msra.mxu0 %v10581_v57  ;;  %v10640_v57 = vld [vmem:[#allocation6 + $0x158] ss:$12 sps:$4 sm:$0xff]  }
 0x3a4   :  { %7384 = vmatprep.subr.bf16.mxu0 %v10589_v15 }
 0x3a5   :  { %7424 = vmatpush1.bf16.msra.mxu1 %v10596_v18 }
 0x3a6   :  { %v11278_v21 = vpop.f32.mrf.mxu0  ;;  %7425 = vmatprep.subr.bf16.mxu1 %v10604_v13 }
 0x3a7   :  { %7385 = vmatpush2.bf16.msra.mxu0 %v10587_v26  ;;  %v5155_v15 = vadd.f32 %v11278_v21, %v5114_v44  ;;  %v10677_v44 = vld [vmem:[#allocation6 + $0x440] ss:$12 sps:$4 sm:$0xff]  }
 0x3a8   :  { %v11280_v17 = vpop.f32.mrf.mxu0  ;;  %7386 = vmatprep.subr.bf16.mxu0 %v10595_v58  ;;  %v10645_v58 = vld [vmem:[#allocation6 + $0x140] ss:$12 sps:$4 sm:$0xff]  }
 0x3a9   :  { %7426 = vmatpush2.bf16.msra.mxu1 %v10602_v47  ;;  %v5157_v33 = vadd.f32 %v11280_v17, %v5116_v59  ;;  %v10648_v17 = vld [vmem:[#allocation6 + $0x128] ss:$12 sps:$4 sm:$0xff]   ;;  %v10679_v59 = vld [vmem:[#allocation6 + $0x5f0] ss:$12 sps:$4 sm:$0xff]  }
 0x3aa   :  { %v5158_v20 = vpop.f32.mrf.mxu0  ;;  %7427 = vmatprep.subr.bf16.mxu1 %v10610_v22 }
 0x3ab   :  { %7387 = vmatpush2.bf16.msra.mxu0 %v10593_v14 }
 0x3ac   :  { %v5159_v31 = vpop.f32.mrf.mxu0  ;;  %7388 = vmatprep.subr.bf16.mxu0 %v10601_v24  ;;  %v10646_v24 = vld [vmem:[#allocation6 + $0x80] ss:$12 sps:$4 sm:$0xff]  }
 0x3ad   :  { %7428 = vmatpush2.bf16.msra.mxu1 %v10608_v25 }
 0x3ae   :  { %7429 = vmatprep.subr.bf16.mxu1 %v10616_v27 }
 0x3af   :  { %7389 = vmatpush2.bf16.msra.mxu0 %v10599_v29 }
 0x3b0   :  { %7390 = vmatprep.subr.bf16.mxu0 %v10607_v3  ;;  %v10650_v3 = vld [vmem:[#allocation6 + $0x68] ss:$12 sps:$4 sm:$0xff]  }
 0x3b1   :  { %7430 = vmatpush2.bf16.msra.mxu1 %v10614_v37 }
 0x3b2   :  { %7431 = vmatprep.subr.bf16.mxu1 %v10622_v41  ;;  %v10651_v41 = vld [vmem:[#allocation6 + $0x2d8] ss:$12 sps:$4 sm:$0xff]  }
 0x3b3   :  { %7391 = vmatpush2.bf16.msra.mxu0 %v10605_v42  ;;  %v10652_v42 = vld [vmem:[#allocation6 + $0x110] ss:$12 sps:$4 sm:$0xff]  }
 0x3b4   :  { %7392 = vmatprep.subr.bf16.mxu0 %v10613_v7  ;;  %v10653_v7 = vld [vmem:[#allocation6 + $0x218] ss:$12 sps:$4 sm:$0xff]  }
 0x3b5   :  { %7432 = vmatpush2.bf16.msra.mxu1 %v10620_v46  ;;  %v10654_v46 = vld [vmem:[#allocation6 + $0x50] ss:$12 sps:$4 sm:$0xff]  }
 0x3b6   :  { %7433 = vmatprep.subr.bf16.mxu1 %v10628_v48  ;;  %v10655_v48 = vld [vmem:[#allocation6 + $0x2c0] ss:$12 sps:$4 sm:$0xff]  }
 0x3b7   :  { %7393 = vmatpush2.bf16.msra.mxu0 %v10611_v50  ;;  %v10656_v50 = vld [vmem:[#allocation6 + $0xf8] ss:$12 sps:$4 sm:$0xff]  }
 0x3b8   :  { %7394 = vmatprep.subr.bf16.mxu0 %v10619_v52  ;;  %v10657_v52 = vld [vmem:[#allocation6 + $0x200] ss:$12 sps:$4 sm:$0xff]  }
 0x3b9   :  { %7434 = vmatpush2.bf16.msra.mxu1 %v10626_v53  ;;  %v10658_v53 = vld [vmem:[#allocation6 + $0x38] ss:$12 sps:$4 sm:$0xff]  }
 0x3ba   :  { %7435 = vmatprep.subr.bf16.mxu1 %v10634_v54  ;;  %v10659_v54 = vld [vmem:[#allocation6 + $0x2a8] ss:$12 sps:$4 sm:$0xff]  }
 0x3bb   :  { %7395 = vmatpush2.bf16.msra.mxu0 %v10617_v56  ;;  %v10660_v56 = vld [vmem:[#allocation6 + $0xe0] ss:$12 sps:$4 sm:$0xff]  }
 0x3bc   :  { %7396 = vmatprep.subr.bf16.mxu0 %v10625_v55  ;;  %v10661_v55 = vld [vmem:[#allocation6 + $0x1e8] ss:$12 sps:$4 sm:$0xff]  }
 0x3bd   :  { %7436 = vmatpush2.bf16.msra.mxu1 %v10632_v6  ;;  %v10662_v6 = vld [vmem:[#allocation6 + $0x20] ss:$12 sps:$4 sm:$0xff]  }
 0x3be   :  { %7437 = vmatprep.subr.bf16.mxu1 %v10639_v62  ;;  %v10663_v62 = vld [vmem:[#allocation6 + $0x290] ss:$12 sps:$4 sm:$0xff]  }
 0x3bf   :  { %7397 = vmatpush2.bf16.msra.mxu0 %v10623_v0  ;;  %v10665_v0 = vld [vmem:[#allocation6 + $0x1d0] ss:$12 sps:$4 sm:$0xff]  }
 0x3c0   :  { %7398 = vmatprep.subr.bf16.mxu0 %v10631_v60  ;;  %v10666_v60 = vld [vmem:[#allocation6 + $0x8] ss:$12 sps:$4 sm:$0xff]  }
 0x3c1   :  { %7438 = vmatpush2.bf16.msra.mxu1 %v10637_v30  ;;  %v10667_v30 = vld [vmem:[#allocation6 + $0x278] ss:$12 sps:$4 sm:$0xff]  }
 0x3c2   :  { %7439 = vmatprep.subr.bf16.mxu1 %v10644_v11  ;;  %v10669_v11 = vld [vmem:[#allocation6 + $0x470] ss:$12 sps:$4 sm:$0xff]  }
 0x3c3   :  { %7399 = vmatpush2.bf16.msra.mxu0 %v10629_v4  ;;  %v10670_v4 = vld [vmem:[#allocation6 + $0x3b0] ss:$12 sps:$4 sm:$0xff]  }
 0x3c4   :  { %9109 = vmatprep.subr.bf16.mxu0 %v10635_v5  ;;  %v10673_v5 = vld [vmem:[#allocation6 + $0x458] ss:$12 sps:$4 sm:$0xff]  }
 0x3c5   :  { %7440 = vmatpush2.bf16.msra.mxu1 %v10642_v8  ;;  %v10674_v8 = vld [vmem:[#allocation6 + $0x398] ss:$12 sps:$4 sm:$0xff]  }
 0x3c6   :  { %v5236_v18 = vpop.f32.mrf.mxu0  ;;  %7401 = vmatmul.mubr.bf16.vlgmr.msra.gmra.mxu0 %v11289_v12  ;;  %9131 = vmatprep.subr.bf16.mxu1 %v10647_v9  ;;  %v10675_v9 = vld [vmem:[#allocation6 + $0x248] ss:$12 sps:$4 sm:$0xff]  }
 0x3c7   :  { %v5195_v28 = vpop.f32.mrf.mxu1  ;;  %9110 = vmatpush3.bf16.msra.mxu0 %v10636_v51  ;;  %7482 = vmatprep.mubr.bf16.mxu0 %v11217_v19  ;;  %v10649_v19 = vld [vmem:[#allocation6 + $0x230] ss:$12 sps:$4 sm:$0xff]   ;;  %v10676_v51 = vld [vmem:[#allocation6 + $0x188] ss:$12 sps:$4 sm:$0xff]  }
 0x3c8   :  { %v5196_v16 = vadd.f32 %v5195_v28, %v5155_v15  ;;  %v5238_v26 = vpop.f32.mrf.mxu0  ;;  %9111 = vmatprep.subr.bf16.mxu0 %v10640_v57  ;;  %v10678_v57 = vld [vmem:[#allocation6 + $0x380] ss:$12 sps:$4 sm:$0xff]   ;;  %v10680_v15 = vld [vmem:[#allocation6 + $0x428] ss:$12 sps:$4 sm:$0xff]  }
 0x3c9   :  { %v5197_v13 = vpop.f32.mrf.mxu1  ;;  %v10682_v28 = vld [vmem:[#allocation6 + $0x368] ss:$12 sps:$4 sm:$0xff]  }
 0x3ca   :  { %v5237_v43 = vadd.f32 %v5236_v18, %v5196_v16  ;;  %v5198_v47 = vadd.f32 %v5197_v13, %v5157_v33  ;;  %v5240_v22 = vpop.f32.mrf.mxu0  ;;  %v10683_v18 = vld [vmem:[#allocation6 + $0x5d8] ss:$12 sps:$4 sm:$0xff]   ;;  %v10686_v16 = vld [vmem:[#allocation6 + $0x350] ss:$12 sps:$4 sm:$0xff]  }
 0x3cb   :  { %v5199_v21 = vpop.f32.mrf.mxu1  ;;  %9112 = vmatpush3.bf16.msra.mxu0 %v10641_v39  ;;  %v10685_v33 = vld [vmem:[#allocation6 + $0x518] ss:$12 sps:$4 sm:$0xff]   ;;  %v10687_v39 = vld [vmem:[#allocation6 + $0x5c0] ss:$12 sps:$4 sm:$0xff]   ;;  %v10696_v22 = vld [vmem:[#allocation6 + $0x3c8] ss:$12 sps:$4 sm:$0xff]  }
 0x3cc   :  { %v5239_v14 = vadd.f32 %v5238_v26, %v5198_v47  ;;  %v5253_v25 = vmax.f32 %v5237_v43, 0.0  ;;  %v5241_v27 = vpop.f32.mrf.mxu0  ;;  %9113 = vmatprep.subr.bf16.mxu0 %v10645_v58  ;;  %v10688_v13 = vld [vmem:[#allocation6 + $0x3f8] ss:$12 sps:$4 sm:$0xff]   ;;  %v10689_v26 = vld [vmem:[#allocation6 + $0x500] ss:$12 sps:$4 sm:$0xff]  }
 0x3cd   :  { %v5200_v20 = vpop.f32.mrf.mxu1  ;;  %v10690_v58 = vld [vmem:[#allocation6 + $0x338] ss:$12 sps:$4 sm:$0xff]   ;;  %v10691_v43 = vld [vmem:[#allocation6 + $0x5a8] ss:$12 sps:$4 sm:$0xff]   ;;  %v10692_v47 = vld [vmem:[#allocation6 + $0x3e0] ss:$12 sps:$4 sm:$0xff]  }
 0x3ce   :  { %v5254_v29 = vmax.f32 %v5239_v14, 0.0  ;;  %v11298_v37 = vpack.c.bf16 %v5253_v25, %v5253_v25  ;;  %v10695_v21 = vld [vmem:[#allocation6 + $0x590] ss:$12 sps:$4 sm:$0xff]   ;;  %v10699_v25 = vld [vmem:[#allocation6 + $0x578] ss:$12 sps:$4 sm:$0xff]  }
 0x3cf   :  { %9114 = vmatpush3.bf16.msra.mxu0 %v10646_v24  ;;  %v10697_v14 = vld [vmem:[#allocation6 + $0x4d0] ss:$12 sps:$4 sm:$0xff]   ;;  %v10698_v24 = vld [vmem:[#allocation6 + $0x308] ss:$12 sps:$4 sm:$0xff]   ;;  %v11307_v20 = vld [vmem:[#allocation7] sm:$0x7] }
 0x3d0   :  { %v11296_v31 = vpack.c.bf16 %v5254_v29, %v5254_v29  ;;  %9115 = vmatprep.subr.bf16.mxu0 %v10648_v17  ;;  %v10701_v27 = vld [vmem:[#allocation6 + $0x770] ss:$12 sps:$4 sm:$0xff]   ;;  %v5656_v17 = vrot.slane %v11307_v20, %v11092_v34  ;;  %v10700_v29 = vld [vmem:[#allocation6 + $0x4b8] ss:$12 sps:$4 sm:$0xff]  }
 0x3d2   :  { %7441 = vmatprep.mubr.bf16.mxu1 %v11296_v31 }
 0x3d3   :  { %7442 = vmatmul.mubr.bf16.vlgmr.msra.gmra.mxu1 %v11298_v37  ;;  %9116 = vmatpush3.bf16.msra.mxu0 %v10650_v3  ;;  %v5660_v3 = vrot.slane %v11307_v20, %v11095_v38  ;;  %v10709_v38 = vld [vmem:[#allocation6 + $0x740] ss:$12 sps:$4 sm:$0xff]  }
 0x3d4   :  { %9132 = vmatpush3.bf16.msra.mxu1 %v10649_v19  ;;  %7522 = vmatprep.mubr.bf16.mxu1 %v11219_v36  ;;  %v10664_v36 = vld [vmem:[#allocation6 + $0xc8] ss:$12 sps:$4 sm:$0xff]   ;;  %v10702_v19 = vld [vmem:[#allocation6 + $0x6b0] ss:$12 sps:$4 sm:$0xff]  }
 0x3d5   :  { %9133 = vmatprep.subr.bf16.mxu1 %v10651_v41  ;;  %9117 = vmatprep.subr.bf16.mxu0 %v10652_v42  ;;  %v10703_v41 = vld [vmem:[#allocation6 + $0x560] ss:$12 sps:$4 sm:$0xff]   ;;  %v10705_v42 = vld [vmem:[#allocation6 + $0x758] ss:$12 sps:$4 sm:$0xff]  }
 0x3d7   :  { %9118 = vmatpush3.bf16.msra.mxu0 %v10654_v46 }
 0x3d8   :  { %9134 = vmatpush3.bf16.msra.mxu1 %v10653_v7  ;;  %9119 = vmatprep.subr.bf16.mxu0 %v10656_v50  ;;  %v10704_v50 = vld [vmem:[#allocation6 + $0x4a0] ss:$12 sps:$4 sm:$0xff]  }
 0x3d9   :  { %9135 = vmatprep.subr.bf16.mxu1 %v10655_v48 }
 0x3db   :  { %9120 = vmatpush3.bf16.msra.mxu0 %v10658_v53  ;;  %v10707_v53 = vld [vmem:[#allocation6 + $0x548] ss:$12 sps:$4 sm:$0xff]  }
 0x3dc   :  { %9136 = vmatpush3.bf16.msra.mxu1 %v10657_v52  ;;  %9121 = vmatprep.subr.bf16.mxu0 %v10660_v56  ;;  %v10706_v52 = vld [vmem:[#allocation6 + $0x698] ss:$12 sps:$4 sm:$0xff]  }
 0x3dd   :  { %9137 = vmatprep.subr.bf16.mxu1 %v10659_v54 }
 0x3df   :  { %9122 = vmatpush3.bf16.msra.mxu0 %v10662_v6 }
 0x3e0   :  { %9138 = vmatpush3.bf16.msra.mxu1 %v10661_v55  ;;  %9123 = vmatprep.subr.bf16.mxu0 %v10664_v36 }
 0x3e1   :  { %9139 = vmatprep.subr.bf16.mxu1 %v10663_v62 }
 0x3e3   :  { %9124 = vmatpush3.bf16.msra.mxu0 %v10666_v60  ;;  %v10711_v60 = vld [vmem:[#allocation6 + $0x8f0] ss:$12 sps:$4 sm:$0xff]  }
 0x3e4   :  { %9140 = vmatpush3.bf16.msra.mxu1 %v10665_v0  ;;  %9153 = vmatprep.subr.bf16.mxu0 %v10669_v11  ;;  %v10712_v11 = vld [vmem:[#allocation6 + $0x728] ss:$12 sps:$4 sm:$0xff]  }
 0x3e5   :  { %9141 = vmatprep.subr.bf16.mxu1 %v10667_v30 }
 0x3e6   :  { %7483 = vmatmul.mubr.bf16.vlgmr.msra.gmra.mxu0 %v11241_v61  ;;  %v10681_v61 = vld [vmem:[#allocation6 + $0x530] ss:$12 sps:$4 sm:$0xff]  }
 0x3e7   :  { %9154 = vmatpush3.bf16.msra.mxu0 %v10670_v4  ;;  %7562 = vmatprep.mubr.bf16.mxu0 %v11245_v1  ;;  %v10684_v1 = vld [vmem:[#allocation6 + $0x410] ss:$12 sps:$4 sm:$0xff]   ;;  %v10714_v4 = vld [vmem:[#allocation6 + $0x668] ss:$12 sps:$4 sm:$0xff]  }
 0x3e8   :  { %9142 = vmatpush3.bf16.msra.mxu1 %v10668_v45  ;;  %9155 = vmatprep.subr.bf16.mxu0 %v10673_v5  ;;  %v10713_v45 = vld [vmem:[#allocation6 + $0x830] ss:$12 sps:$4 sm:$0xff]  }
 0x3e9   :  { %9143 = vmatprep.subr.bf16.mxu1 %v10671_v35  ;;  %v10715_v35 = vld [vmem:[#allocation6 + $0x8d8] ss:$12 sps:$4 sm:$0xff]   ;;  %v10716_v5 = vld [vmem:[#allocation6 + $0x710] ss:$12 sps:$4 sm:$0xff]  }
 0x3eb   :  { %9156 = vmatpush3.bf16.msra.mxu0 %v10674_v8  ;;  %v10718_v8 = vld [vmem:[#allocation6 + $0x650] ss:$12 sps:$4 sm:$0xff]  }
 0x3ec   :  { %9144 = vmatpush3.bf16.msra.mxu1 %v10672_v49  ;;  %9157 = vmatprep.subr.bf16.mxu0 %v10677_v44  ;;  %v10717_v49 = vld [vmem:[#allocation6 + $0x818] ss:$12 sps:$4 sm:$0xff]  }
 0x3ed   :  { %9145 = vmatprep.subr.bf16.mxu1 %v10675_v9  ;;  %v10719_v9 = vld [vmem:[#allocation6 + $0x8c0] ss:$12 sps:$4 sm:$0xff]   ;;  %v10720_v44 = vld [vmem:[#allocation6 + $0x6f8] ss:$12 sps:$4 sm:$0xff]  }
 0x3ef   :  { %9158 = vmatpush3.bf16.msra.mxu0 %v10678_v57  ;;  %v10722_v57 = vld [vmem:[#allocation6 + $0x638] ss:$12 sps:$4 sm:$0xff]  }
 0x3f0   :  { %9146 = vmatpush3.bf16.msra.mxu1 %v10676_v51  ;;  %9159 = vmatprep.subr.bf16.mxu0 %v10680_v15  ;;  %v10721_v51 = vld [vmem:[#allocation6 + $0x800] ss:$12 sps:$4 sm:$0xff]  }
 0x3f1   :  { %9175 = vmatprep.subr.bf16.mxu1 %v10679_v59  ;;  %v10723_v59 = vld [vmem:[#allocation6 + $0x8a8] ss:$12 sps:$4 sm:$0xff]   ;;  %v10724_v15 = vld [vmem:[#allocation6 + $0x6e0] ss:$12 sps:$4 sm:$0xff]  }
 0x3f3   :  { %7523 = vmatmul.mubr.bf16.vlgmr.msra.gmra.mxu1 %v11243_v23  ;;  %9160 = vmatpush3.bf16.msra.mxu0 %v10682_v28  ;;  %v10693_v23 = vld [vmem:[#allocation6 + $0x4e8] ss:$12 sps:$4 sm:$0xff]  }
 0x3f4   :  { %9176 = vmatpush3.bf16.msra.mxu1 %v10681_v61  ;;  %7602 = vmatprep.mubr.bf16.mxu1 %v11250_v2  ;;  %v10694_v2 = vld [vmem:[#allocation6 + $0x320] ss:$12 sps:$4 sm:$0xff]   ;;  %v10727_v61 = vld [vmem:[#allocation6 + $0x890] ss:$12 sps:$4 sm:$0xff]   ;;  %v10728_v28 = vld [vmem:[#allocation6 + $0x6c8] ss:$12 sps:$4 sm:$0xff]  }
 0x3f5   :  { %9177 = vmatprep.subr.bf16.mxu1 %v10683_v18  ;;  %9161 = vmatprep.subr.bf16.mxu0 %v10684_v1  ;;  %v10729_v18 = vld [vmem:[#allocation6 + $0x7d0] ss:$12 sps:$4 sm:$0xff]   ;;  %v10730_v1 = vld [vmem:[#allocation6 + $0x608] ss:$12 sps:$4 sm:$0xff]  }
 0x3f7   :  { %9162 = vmatpush3.bf16.msra.mxu0 %v10686_v16  ;;  %v10737_v16 = vld [vmem:[#allocation9 + $0x78] sm:$0xff]  }
 0x3f8   :  { %9178 = vmatpush3.bf16.msra.mxu1 %v10685_v33  ;;  %9163 = vmatprep.subr.bf16.mxu0 %v10688_v13  ;;  %v10731_v33 = vld [vmem:[#allocation6 + $0x878] ss:$12 sps:$4 sm:$0xff]   ;;  %v10733_v13 = vld [vmem:[#allocation6 + $0x860] ss:$12 sps:$4 sm:$0xff]  }
 0x3f9   :  { %9179 = vmatprep.subr.bf16.mxu1 %v10687_v39  ;;  %v10732_v39 = vld [vmem:[#allocation6 + $0x7b8] ss:$12 sps:$4 sm:$0xff]  }
 0x3fb   :  { %9164 = vmatpush3.bf16.msra.mxu0 %v10690_v58  ;;  %v10739_v58 = vld [vmem:[#allocation9 + $0x70] sm:$0xff]  }
 0x3fc   :  { %9180 = vmatpush3.bf16.msra.mxu1 %v10689_v26  ;;  %9165 = vmatprep.subr.bf16.mxu0 %v10692_v47  ;;  %v10738_v26 = vld [vmem:[#allocation9 + $0x38] sm:$0xff]   ;;  %v10735_v47 = vld [vmem:[#allocation6 + $0x848] ss:$12 sps:$4 sm:$0xff]  }
 0x3fd   :  { %9181 = vmatprep.subr.bf16.mxu1 %v10691_v43  ;;  %v10734_v43 = vld [vmem:[#allocation6 + $0x7a0] ss:$12 sps:$4 sm:$0xff]  }
 0x3ff   :  { %9166 = vmatpush3.bf16.msra.mxu0 %v10694_v2  ;;  %v10741_v2 = vld [vmem:[#allocation9 + $0x68] sm:$0xff]  }
 0x400   :  { %9182 = vmatpush3.bf16.msra.mxu1 %v10693_v23  ;;  %9167 = vmatprep.subr.bf16.mxu0 %v10696_v22  ;;  %v10740_v23 = vld [vmem:[#allocation9 + $0x30] sm:$0xff]   ;;  %v10742_v22 = vld [vmem:[#allocation9 + $0x28] sm:$0xff]  }
 0x401   :  { %9183 = vmatprep.subr.bf16.mxu1 %v10695_v21  ;;  %v10736_v21 = vld [vmem:[#allocation6 + $0x788] ss:$12 sps:$4 sm:$0xff]  }
 0x403   :  { %9168 = vmatpush3.bf16.msra.mxu0 %v10698_v24  ;;  %v10744_v24 = vld [vmem:[#allocation9 + $0x20] sm:$0xff]  }
 0x404   :  { %9184 = vmatpush3.bf16.msra.mxu1 %v10697_v14  ;;  %9197 = vmatprep.subr.bf16.mxu0 %v10701_v27  ;;  %v10743_v14 = vld [vmem:[#allocation9 + $0x60] sm:$0xff]   ;;  %v10747_v27 = vld [vmem:[#allocation9 + $0x50] sm:$0xff]  }
 0x405   :  { %9185 = vmatprep.subr.bf16.mxu1 %v10699_v25  ;;  %v10746_v25 = vld [vmem:[#allocation9 + $0x18] sm:$0xff]  }
 0x406   :  { %v7238_v7 = vpop.f32.mrf.mxu0  ;;  %7563 = vmatmul.mubr.bf16.vlgmr.msra.gmra.mxu0 %v11265_v63  ;;  %v10708_v63 = vld [vmem:[#allocation6 + $0x488] ss:$12 sps:$4 sm:$0xff]  }
 0x407   :  { %v7239_v46 = vadd.f32 %v7238_v7, %v5656_v17  ;;  %v7279_v48 = vpop.f32.mrf.mxu1  ;;  %9198 = vmatpush3.bf16.msra.mxu0 %v10702_v19  ;;  %7642 = vmatprep.mubr.bf16.mxu0 %v11269_v10  ;;  %v10710_v10 = vld [vmem:[#allocation6 + $0x680] ss:$12 sps:$4 sm:$0xff]   ;;  %v10748_v17 = vld [vmem:[#allocation9 + $0x10] sm:$0xff]  }
 0x408   :  { %9186 = vmatpush3.bf16.msra.mxu1 %v10700_v29  ;;  %v7240_v34 = vpop.f32.mrf.mxu0  ;;  %9199 = vmatprep.subr.bf16.mxu0 %v10705_v42  ;;  %v10749_v29 = vld [vmem:[#allocation9 + $0x48] sm:$0xff]  }
 0x409   :  { %v11315_v54 = vadd.f32 %v7279_v48, %v7239_v46  ;;  %v7241_v56 = vadd.f32 %v7240_v34, %v5660_v3  ;;  %v7281_v55 = vpop.f32.mrf.mxu1  ;;  %9187 = vmatprep.subr.bf16.mxu1 %v10703_v41  ;;  %v10750_v19 = vld [vmem:[#allocation9 + $0x8] sm:$0xff]   ;;  %v10751_v3 = vld [vmem:[#allocation9 + $0x40] sm:$0xff]  }
 0x40a   :  { %v7242_v6 = vpop.f32.mrf.mxu0  ;;  %v10752_v41 = vld [vmem:[#allocation9] sm:$0xff]  }
 0x40b   :  { %v11317_v62 = vadd.f32 %v7281_v55, %v7241_v56  ;;  %v7283_v36 = vpop.f32.mrf.mxu1  ;;  %9200 = vmatpush3.bf16.msra.mxu0 %v10706_v52  ;;  %v10753_v6 = vld [vmem:[#allocation9 + $0xb8] sm:$0xff]  }
 0x40c   :  { %9188 = vmatpush3.bf16.msra.mxu1 %v10704_v50  ;;  %v7243_v0 = vpop.f32.mrf.mxu0  ;;  %9201 = vmatprep.subr.bf16.mxu0 %v10709_v38  ;;  %v10963_v36 = vmov 0.0  }
 0x40d   :  { %9189 = vmatprep.subr.bf16.mxu1 %v10707_v53  ;;  %v7284_v30 = vpop.f32.mrf.mxu1  ;;  %v10757_v0 = vld [vmem:[#allocation9 + $0x98] sm:$0xff]  }
 0x40e   :  { %v10760_v30 = vld [vmem:[#allocation9 + $0x80] sm:$0xff]  }
 0x40f   :  { %9202 = vmatpush3.bf16.msra.mxu0 %v10710_v10  ;;  %v10758_v10 = vld [vmem:[#allocation9 + $0x90] sm:$0xff]  }
 0x410   :  { %9190 = vmatpush3.bf16.msra.mxu1 %v10708_v63  ;;  %9203 = vmatprep.subr.bf16.mxu0 %v10712_v11  ;;  %v10754_v63 = vld [vmem:[#allocation9 + $0xb0] sm:$0xff]  }
 0x411   :  { %9219 = vmatprep.subr.bf16.mxu1 %v10711_v60  ;;  %v10759_v60 = vld [vmem:[#allocation9 + $0x88] sm:$0xff]  }
 0x413   :  { %7603 = vmatmul.mubr.bf16.vlgmr.msra.gmra.mxu1 %v11267_v40  ;;  %9204 = vmatpush3.bf16.msra.mxu0 %v10714_v4  ;;  %v10725_v40 = vld [vmem:[#allocation6 + $0x7e8] ss:$12 sps:$4 sm:$0xff]  }
 0x414   :  { %9220 = vmatpush3.bf16.msra.mxu1 %v10713_v45  ;;  %7682 = vmatprep.mubr.bf16.mxu1 %v11296_v31  ;;  %v10726_v31 = vld [vmem:[#allocation6 + $0x620] ss:$12 sps:$4 sm:$0xff]  }
 0x415   :  { %9221 = vmatprep.subr.bf16.mxu1 %v10715_v35  ;;  %9205 = vmatprep.subr.bf16.mxu0 %v10716_v5 }
 0x417   :  { %9206 = vmatpush3.bf16.msra.mxu0 %v10718_v8 }
 0x418   :  { %9222 = vmatpush3.bf16.msra.mxu1 %v10717_v49  ;;  %9207 = vmatprep.subr.bf16.mxu0 %v10720_v44 }
 0x419   :  { %9223 = vmatprep.subr.bf16.mxu1 %v10719_v9 }
 0x41b   :  { %9208 = vmatpush3.bf16.msra.mxu0 %v10722_v57 }
 0x41c   :  { %9224 = vmatpush3.bf16.msra.mxu1 %v10721_v51  ;;  %9209 = vmatprep.subr.bf16.mxu0 %v10724_v15 }
 0x41d   :  { %9225 = vmatprep.subr.bf16.mxu1 %v10723_v59 }
 0x41f   :  { %9210 = vmatpush3.bf16.msra.mxu0 %v10726_v31 }
 0x420   :  { %9226 = vmatpush3.bf16.msra.mxu1 %v10725_v40  ;;  %9211 = vmatprep.subr.bf16.mxu0 %v10728_v28 }
 0x421   :  { %9227 = vmatprep.subr.bf16.mxu1 %v10727_v61 }
 0x423   :  { %9212 = vmatpush3.bf16.msra.mxu0 %v10730_v1 }
 0x424   :  { %9228 = vmatpush3.bf16.msra.mxu1 %v10729_v18  ;;  %9241 = vmatprep.subr.bf16.mxu0 %v10737_v16 }
 0x425   :  { %9229 = vmatprep.subr.bf16.mxu1 %v10731_v33 }
 0x426   :  { %7643 = vmatmul.mubr.bf16.vlgmr.msra.gmra.mxu0 %v11289_v12  ;;  %v10745_v12 = vld [vmem:[#allocation9 + $0x58] sm:$0xff]  }
 0x427   :  { %9242 = vmatpush3.bf16.msra.mxu0 %v10738_v26 }
 0x428   :  { %9230 = vmatpush3.bf16.msra.mxu1 %v10732_v39  ;;  %9243 = vmatprep.subr.bf16.mxu0 %v10739_v58 }
 0x429   :  { %9231 = vmatprep.subr.bf16.mxu1 %v10733_v13 }
 0x42b   :  { %9244 = vmatpush3.bf16.msra.mxu0 %v10740_v23 }
 0x42c   :  { %9232 = vmatpush3.bf16.msra.mxu1 %v10734_v43  ;;  %9245 = vmatprep.subr.bf16.mxu0 %v10741_v2 }
 0x42d   :  { %9233 = vmatprep.subr.bf16.mxu1 %v10735_v47 }
 0x42f   :  { %9246 = vmatpush3.bf16.msra.mxu0 %v10742_v22 }
 0x430   :  { %9234 = vmatpush3.bf16.msra.mxu1 %v10736_v21  ;;  %9247 = vmatprep.subr.bf16.mxu0 %v10743_v14 }
 0x431   :  { %9281 = vmatprep.subr.bf16.mxu1 %v10963_v36 }
 0x433   :  { %7683 = vmatmul.mubr.bf16.vlgmr.msra.gmra.mxu1 %v11298_v37  ;;  %9248 = vmatpush3.bf16.msra.mxu0 %v10744_v24 }
 0x434   :  { %9249 = vmatprep.subr.bf16.mxu0 %v10745_v12  ;;  %9282 = vmatpush3.bf16.msra.mxu1 %v10753_v6  ;;  %v10761_v12 = vld [vmem:[#allocation12 + $0x38] sm:$0xff]  }
 0x435   :  { %9283 = vmatprep.subr.bf16.mxu1 %v10963_v36  ;;  %9297 = vmatprep.mubr.msk.bf16.mxu1 %vm10964_vm0, %v10963_v36 }
 0x437   :  { %9250 = vmatpush3.bf16.msra.mxu0 %v10746_v25  ;;  %v10762_v25 = vld [vmem:[#allocation12 + $0x30] sm:$0xff]  }
 0x438   :  { %9251 = vmatprep.subr.bf16.mxu0 %v10747_v27  ;;  %9284 = vmatpush3.bf16.msra.mxu1 %v10754_v63 }
 0x439   :  { %9285 = vmatprep.subr.bf16.mxu1 %v10963_v36 }
 0x43b   :  { %9252 = vmatpush3.bf16.msra.mxu0 %v10748_v17  ;;  %v10763_v17 = vld [vmem:[#allocation12 + $0x28] sm:$0xff]  }
 0x43c   :  { %9253 = vmatprep.subr.bf16.mxu0 %v10749_v29  ;;  %v5664_v29 = vrot.slane %v11307_v20, %v11130_v32 }
 0x43f   :  { %9254 = vmatpush3.bf16.msra.mxu0 %v10750_v19 }
 0x440   :  { %9255 = vmatprep.subr.bf16.mxu0 %v10751_v3 }
 0x443   :  { %9256 = vmatpush3.bf16.msra.mxu0 %v10752_v41 }
 0x444   :  { %9301 = vmatprep.subr.bf16.mxu0 %v10963_v36 }
 0x446   :  { %v7320_v42 = vpop.f32.mrf.mxu0 }
 0x447   :  { %v7321_v7 = vadd.f32 %v7320_v42, %v11315_v54  ;;  %v7361_v37 = vpop.f32.mrf.mxu1  ;;  %v10755_v54 = vld [vmem:[#allocation9 + $0xa8] sm:$0xff]  }
 0x448   :  { %v7322_v46 = vpop.f32.mrf.mxu0  ;;  %9286 = vmatpush3.bf16.msra.mxu1 %v10755_v54  ;;  %v10764_v42 = vld [vmem:[#allocation12 + $0x20] sm:$0xff]  }
 0x449   :  { %v7362_v48 = vadd.f32 %v7361_v37, %v7321_v7  ;;  %v7323_v50 = vadd.f32 %v7322_v46, %v11317_v62  ;;  %v7363_v34 = vpop.f32.mrf.mxu1  ;;  %9287 = vmatprep.subr.bf16.mxu1 %v10963_v36  ;;  %v10756_v62 = vld [vmem:[#allocation9 + $0xa0] sm:$0xff]  }
 0x44a   :  { %v7324_v52 = vpop.f32.mrf.mxu0 }
 0x44b   :  { %v7364_v53 = vadd.f32 %v7363_v34, %v7323_v50  ;;  %v7365_v56 = vpop.f32.mrf.mxu1  ;;  %v10765_v34 = vld [vmem:[#allocation12 + $0x18] sm:$0xff]  }
 0x44c   :  { %v7325_v55 = vpop.f32.mrf.mxu0  ;;  %9288 = vmatpush3.bf16.msra.mxu1 %v10756_v62 }
 0x44d   :  { %v7366_v38 = vpop.f32.mrf.mxu1  ;;  %9289 = vmatprep.subr.bf16.mxu1 %v10963_v36  ;;  %v10766_v55 = vld [vmem:[#allocation12 + $0x10] sm:$0xff]  }
 0x450   :  { %9290 = vmatpush3.bf16.msra.mxu1 %v10757_v0 }
 0x451   :  { %9291 = vmatprep.subr.bf16.mxu1 %v10963_v36 }
 0x454   :  { %9292 = vmatpush3.bf16.msra.mxu1 %v10758_v10 }
 0x455   :  { %9293 = vmatprep.subr.bf16.mxu1 %v10963_v36 }
 0x458   :  { %9294 = vmatpush3.bf16.msra.mxu1 %v10759_v60  ;;  %v10767_v60 = vld [vmem:[#allocation12 + $0x8] sm:$0xff]  }
 0x459   :  { %9295 = vmatprep.subr.bf16.mxu1 %v10963_v36 }
 0x45c   :  { %9296 = vmatpush3.bf16.msra.mxu1 %v10760_v30  ;;  %v10768_v30 = vld [vmem:[#allocation12] sm:$0xff]  }
 0x486   :  { %v7402_v11 = vpop.f32.mrf.mxu0 }
 0x487   :  { %v7403_v5 = vadd.f32 %v7402_v11, %v7362_v48 }
 0x488   :  { %v7404_v45 = vpop.f32.mrf.mxu0 }
 0x489   :  { %v7405_v8 = vadd.f32 %v7404_v45, %v7364_v53 }
 0x48a   :  { %v7406_v4 = vpop.f32.mrf.mxu0 }
 0x48c   :  { %v7407_v35 = vpop.f32.mrf.mxu0 }
 0x493   :  { %v7443_v49 = vpop.f32.mrf.mxu1 }
 0x494   :  { %v7444_v9 = vadd.f32 %v7443_v49, %v7403_v5  ;;  %v9075_v49 = vld [vmem:[#allocation10] ss:$0 sm:$0xff] }
 0x495   :  { %v7445_v44 = vpop.f32.mrf.mxu1 }
 0x496   :  { %v7446_v51 = vadd.f32 %v7445_v44, %v7405_v8  ;;  %v7690_v57 = vmax.f32 %v7444_v9, 0.0 }
 0x497   :  { %v7447_v59 = vpop.f32.mrf.mxu1 }
 0x498   :  { %v7691_v15 = vmax.f32 %v7446_v51, 0.0  ;;  %v7693_v61 = vpack.c.bf16 %v7690_v57, %v7690_v57 }
 0x499   :  { %v7448_v40 = vpop.f32.mrf.mxu1 }
 0x49a   :  { %v7694_v31 = vpack.c.bf16 %v7691_v15, %v7691_v15 }
 0x49c   :  { %7927 = vmatprep.mubr.bf16.mxu0 %v7694_v31  ;;  %v9100_v31 = vld [vmem:[#allocation13] ss:$0 sm:$0xff] }
 0x49d   :  { %7928 = vmatmul.mubr.bf16.vlgmr.msra.gmra.mxu0 %v7693_v61 }
 0x49e   :  { %9317 = vmatprep.mubr.msk.bf16.mxu0 %vm10964_vm0, %v10963_v36  ;;  %9302 = vmatpush3.bf16.msra.mxu0 %v10761_v12 }
 0x49f   :  { %9303 = vmatprep.subr.bf16.mxu0 %v10963_v36 }
 0x4a2   :  { %9304 = vmatpush3.bf16.msra.mxu0 %v10762_v25 }
 0x4a3   :  { %9305 = vmatprep.subr.bf16.mxu0 %v10963_v36 }
 0x4a6   :  { %v9125_v28 = vpop.f32.mrf.mxu0  ;;  %9306 = vmatpush3.bf16.msra.mxu0 %v10763_v17 }
 0x4a7   :  { %9307 = vmatprep.subr.bf16.mxu0 %v10963_v36 }
 0x4a8   :  { %v9126_v18 = vpop.f32.mrf.mxu0 }
 0x4a9   :  { %v9127_v1 = vadd.f32 %v9126_v18, %v9125_v28 }
 0x4aa   :  { %v9128_v33 = vpop.f32.mrf.mxu0  ;;  %9308 = vmatpush3.bf16.msra.mxu0 %v10764_v42 }
 0x4ab   :  { %v7485_v7 = vadd.f32 %v9127_v1, %v5664_v29  ;;  %9309 = vmatprep.subr.bf16.mxu0 %v10963_v36 }
 0x4ac   :  { %v9129_v16 = vpop.f32.mrf.mxu0 }
 0x4ae   :  { %9310 = vmatpush3.bf16.msra.mxu0 %v10765_v34 }
 0x4af   :  { %9311 = vmatprep.subr.bf16.mxu0 %v10963_v36 }
 0x4b2   :  { %9312 = vmatpush3.bf16.msra.mxu0 %v10766_v55 }
 0x4b3   :  { %v9147_v39 = vpop.f32.mrf.mxu1  ;;  %9313 = vmatprep.subr.bf16.mxu0 %v10963_v36 }
 0x4b5   :  { %v9148_v13 = vpop.f32.mrf.mxu1 }
 0x4b6   :  { %v9149_v3 = vadd.f32 %v9148_v13, %v9147_v39  ;;  %9314 = vmatpush3.bf16.msra.mxu0 %v10767_v60 }
 0x4b7   :  { %v9150_v26 = vpop.f32.mrf.mxu1  ;;  %9315 = vmatprep.subr.bf16.mxu0 %v10963_v36 }
 0x4b8   :  { %v7525_v48 = vadd.f32 %v9149_v3, %v7485_v7 }
 0x4b9   :  { %v9151_v58 = vpop.f32.mrf.mxu1 }
 0x4ba   :  { %9316 = vmatpush3.bf16.msra.mxu0 %v10768_v30 }
 0x4c6   :  { %v9169_v43 = vpop.f32.mrf.mxu0 }
 0x4c8   :  { %v9170_v47 = vpop.f32.mrf.mxu0 }
 0x4c9   :  { %v9171_v37 = vadd.f32 %v9170_v47, %v9169_v43 }
 0x4ca   :  { %v9172_v23 = vpop.f32.mrf.mxu0 }
 0x4cb   :  { %v7565_v52 = vadd.f32 %v9171_v37, %v7525_v48 }
 0x4cc   :  { %v9173_v2 = vpop.f32.mrf.mxu0 }
 0x4d3   :  { %v9191_v21 = vpop.f32.mrf.mxu1 }
 0x4d5   :  { %v9192_v22 = vpop.f32.mrf.mxu1 }
 0x4d6   :  { %v9193_v50 = vadd.f32 %v9192_v22, %v9191_v21 }
 0x4d7   :  { %v9194_v14 = vpop.f32.mrf.mxu1 }
 0x4d8   :  { %v7605_v20 = vadd.f32 %v9193_v50, %v7565_v52 }
 0x4d9   :  { %v9195_v24 = vpop.f32.mrf.mxu1 }
 0x4e6   :  { %v9213_v27 = vpop.f32.mrf.mxu0 }
 0x4e8   :  { %v9214_v19 = vpop.f32.mrf.mxu0 }
 0x4e9   :  { %v9215_v53 = vadd.f32 %v9214_v19, %v9213_v27 }
 0x4ea   :  { %v9216_v41 = vpop.f32.mrf.mxu0 }
 0x4eb   :  { %v7645_v38 = vadd.f32 %v9215_v53, %v7605_v20 }
 0x4ec   :  { %v9217_v46 = vpop.f32.mrf.mxu0 }
 0x4f3   :  { %v9235_v32 = vpop.f32.mrf.mxu1 }
 0x4f5   :  { %v9236_v56 = vpop.f32.mrf.mxu1 }
 0x4f6   :  { %v9237_v6 = vadd.f32 %v9236_v56, %v9235_v32 }
 0x4f7   :  { %v9238_v63 = vpop.f32.mrf.mxu1 }
 0x4f8   :  { %v7685_v54 = vadd.f32 %v9237_v6, %v7645_v38 }
 0x4f9   :  { %v9239_v62 = vpop.f32.mrf.mxu1 }
 0x4fa   :  { %v7692_v0 = vmax.f32 %v7685_v54, 0.0 }
 0x4fc   :  { %v7695_v10 = vpack.c.bf16 %v7692_v0, %v7692_v0 }
 0x4fe   :  { %9298 = vmatmul.mubr.bf16.vlgmr.msra.gmra.mxu1 %v7695_v10 }
 0x55d   :  { %v9257_v11 = vpop.f32.mrf.mxu0 }
 0x55f   :  { %v9258_v45 = vpop.f32.mrf.mxu0 }
 0x560   :  { %v9259_v4 = vadd.f32 %v9258_v45, %v9257_v11 }
 0x561   :  { %v9260_v35 = vpop.f32.mrf.mxu0 }
 0x562   :  { %v7930_v8 = vadd.f32 %v9259_v4, %v9075_v49 }
 0x563   :  { %v9261_v5 = vpop.f32.mrf.mxu0 }
 0x5be   :  { %v7969_v9 = vpop.f32.mrf.mxu1 }
 0x5bf   :  { %v7970_v44 = vadd.f32 %v7969_v9, %v7930_v8 }
 0x5c0   :  { %v9299_v51 = vpop.f32.mrf.mxu1 }
 0x5c1   :  { %v7975_v57 = vmax.f32 %v7970_v44, 0.0 }
 0x5c2   :  { %v7972_v59 = vpop.f32.mrf.mxu1 }
 0x5c3   :  { %v7976_v15 = vpack.c.bf16 %v7975_v57, %v7975_v57 }
 0x5c4   :  { %v9300_v40 = vpop.f32.mrf.mxu1 }
 0x5c5   :  { %9318 = vmatmul.mubr.bf16.vlgmr.msra.gmra.mxu0 %v7976_v15 }
 0x685   :  { %v8082_v61 = vpop.f32.mrf.mxu0 }
 0x686   :  { %v8083_v36 = vadd.f32 %v9100_v31, %v8082_v61 }
 0x687   :  { %v9319_v28 = vpop.f32.mrf.mxu0 }
 0x688   :  { %8088 = vmax.xlane.f32.xlu0 %v8083_v36 }
 0x689   :  { %v8085_v18 = vpop.f32.mrf.mxu0 }
 0x68b   :  { %v9320_v1 = vpop.f32.mrf.mxu0 }
 0x711   :  { %v8089_v33 = vpop.xlane.xlu0 %8088 }
 0x712   :  { %v8090_v16 = vsub.f32 %v8083_v36, %v8089_v33 }
 0x714   :  { %v8091_v39 = vmul.f32 1.442695, %v8090_v16 }
 0x716   :  { %10769 = vpow2.f32 %v8091_v39 }
 0x723   :  { %v10770_v13 = vpop.eup %10769 }
 0x724   :  { %8093 = vadd.xlane.f32.xlu0 %v10770_v13 }
 0x7ad   :  { %v8094_v26 = vpop.xlane.xlu0 %8093 }
 0x7ae   :  { %10771 = vlog2.f32 %v8094_v26 }
 0x7bb   :  { %v10772_v58 = vpop.eup %10771 }
 0x7bc   :  { %v8096_v43 = vmul.f32 0.6931472, %v10772_v58 }
 0x7be   :  { %v8097_v47 = vsub.f32 %v8090_v16, %v8096_v43 }
 0x7c0   :  { %8098 = vst [vmem:[%s11359_s9] sm:$0xff] %v8097_v47 }
 0x7c1   :  { %8103 = vsyncpa [#allocation3], 1 }
 0x7c2   :  { %8104 = vsyncpa [#allocation5], 1 }
 0x7c3   :  { %8105 = vsyncpa [#allocation8], 1 }
 0x7c4   :  { %8106 = vsyncpa [#allocation11], 1 }
 0x7c5   :  { %8107 = vsyncpa [#allocation14], 1 }

</bundles_post_ra>
